<compile_context>
chip_gen: v7x
topology: tpu7x:2x2x1
jax: 0.10.0
libtpu: 0.0.40
codegen_flags: <defaults>
</compile_context>

<pallas_src>
import functools

import jax
import jax.numpy as jnp
from jax.experimental import pallas as pl
from jax.experimental.pallas import tpu as pltpu

MOPED_DELTA = 0.5  # moped_delta from const_bnn_prior_parameters
BN_EPS = 1e-5


def _round_up(x, m):
    return (x + m - 1) // m * m


def _choose_tn(n):
    """Output-channel tile: full N if <=256, else 256 (mult. of 128, >=2 tiles)."""
    if n > 256 and n % 256 == 0:
        return 256
    return n


# ----------------------------------------------------------------------------
# Fused Flipout (matmul_mu + matmul_pert) + sign_out + [bias] + [BN] + [res] + [ReLU]
# ----------------------------------------------------------------------------
def _flipout_fused_kernel(*refs, has_bias, has_bn, has_residual, relu):
    a_ref, s_ref, wmu_ref, wd_ref, so_ref = refs[:5]
    i = 5
    if has_bias:
        bmu_ref, bd_ref = refs[i], refs[i + 1]
        i += 2
    if has_bn:
        g_ref, b_ref = refs[i], refs[i + 1]
        i += 2
    if has_residual:
        r_ref = refs[i]
        i += 1
    o_ref = refs[i]

    a = a_ref[...]                                   # (M, K) f32 patches
    s = s_ref[...].astype(jnp.float32)               # (M, K) +/-1 input sign
    a_bf = a.astype(jnp.bfloat16)
    ap_bf = (a * s).astype(jnp.bfloat16)             # flipout-perturbed input

    mu = jnp.dot(a_bf, wmu_ref[...], preferred_element_type=jnp.float32)
    pert = jnp.dot(ap_bf, wd_ref[...], preferred_element_type=jnp.float32)
    if has_bias:
        mu = mu + bmu_ref[...]
        pert = pert + bd_ref[...]
    y = mu + pert * so_ref[...]

    if has_bn:  # training-mode batch statistics (fresh nn.BatchNorm2d)
        mean = jnp.mean(y, axis=0, keepdims=True)
        var = jnp.mean(jnp.square(y - mean), axis=0, keepdims=True)
        y = (y - mean) * jax.lax.rsqrt(var + BN_EPS) * g_ref[...] + b_ref[...]
    if has_residual:
        y = y + r_ref[...]
    if relu:
        y = jnp.maximum(y, 0.0)
    o_ref[...] = y


def _fused_flipout_call(a, s, w_t, w_delta, sign_out, *, bias=None, bn=None,
                        residual=None, relu=False):
    """a/s: (M, K); w_t/w_delta: (K, N); sign_out: (M, N). Returns (M, N) f32."""
    M, Kp = a.shape
    _, N = w_t.shape
    tn = _choose_tn(N)
    nj = N // tn

    in_arrays = [a, s, w_t, w_delta, sign_out]
    in_specs = [
        pl.BlockSpec((M, Kp), lambda j: (0, 0)),
        pl.BlockSpec((M, Kp), lambda j: (0, 0)),
        pl.BlockSpec((Kp, tn), lambda j: (0, j)),
        pl.BlockSpec((Kp, tn), lambda j: (0, j)),
        pl.BlockSpec((M, tn), lambda j: (0, j)),
    ]
    has_bias = bias is not None
    has_bn = bn is not None
    has_res = residual is not None
    if has_bias:
        b_mu, b_delta = bias
        in_arrays += [b_mu.reshape(1, N), b_delta.reshape(1, N)]
        in_specs += [pl.BlockSpec((1, tn), lambda j: (0, j))] * 2
    if has_bn:
        in_arrays += [bn["gamma"].reshape(1, N), bn["beta"].reshape(1, N)]
        in_specs += [pl.BlockSpec((1, tn), lambda j: (0, j))] * 2
    if has_res:
        in_arrays.append(residual)
        in_specs.append(pl.BlockSpec((M, tn), lambda j: (0, j)))

    return pl.pallas_call(
        functools.partial(_flipout_fused_kernel, has_bias=has_bias,
                          has_bn=has_bn, has_residual=has_res, relu=relu),
        out_shape=jax.ShapeDtypeStruct((M, N), jnp.float32),
        grid=(nj,),
        in_specs=in_specs,
        out_specs=pl.BlockSpec((M, tn), lambda j: (0, j)),
        compiler_params=pltpu.CompilerParams(
            dimension_semantics=("parallel",)),
    )(*in_arrays)


# ----------------------------------------------------------------------------
# Pooling kernels (reduce over middle axis -> no activation transposes)
# ----------------------------------------------------------------------------
def _max_axis1_kernel(x_ref, o_ref):
    o_ref[...] = jnp.max(x_ref[...], axis=1)


def _mean_axis1_kernel(x_ref, o_ref):
    o_ref[...] = jnp.mean(x_ref[...], axis=1)


def maxpool2d(x, k=3, stride=2, pad=1):
    """x: (N,H,W,C) -> maxpool (PyTorch semantics via -inf padding)."""
    p, (N, OH, OW) = pool_patches(x, k, stride, pad, -jnp.inf)  # (R, KK, C)
    R, KK, C = p.shape
    out = pl.pallas_call(
        _max_axis1_kernel,
        out_shape=jax.ShapeDtypeStruct((R, C), jnp.float32),
        grid=(1,),
        in_specs=[pl.BlockSpec((R, KK, C), lambda i: (0, 0, 0))],
        out_specs=pl.BlockSpec((R, C), lambda i: (0, 0)),
    )(p)
    return out.reshape(N, OH, OW, C)


def global_avgpool(x):
    """x: (N,H,W,C) -> (N, C) (adaptive avg pool to 1x1)."""
    N, H, W, C = x.shape
    xr = x.reshape(N, H * W, C)
    return pl.pallas_call(
        _mean_axis1_kernel,
        out_shape=jax.ShapeDtypeStruct((N, C), jnp.float32),
        grid=(1,),
        in_specs=[pl.BlockSpec((N, H * W, C), lambda i: (0, 0, 0))],
        out_specs=pl.BlockSpec((N, C), lambda i: (0, 0)),
    )(xr)


# ----------------------------------------------------------------------------
# Glue: patch extraction (layout plumbing only)
# ----------------------------------------------------------------------------
def pool_patches(x, k, stride, pad, pad_value):
    N, H, W, C = x.shape
    xp = jnp.pad(x, ((0, 0), (pad, pad), (pad, pad), (0, 0)),
                 constant_values=pad_value)
    oh = (H + 2 * pad - k) // stride + 1
    ow = (W + 2 * pad - k) // stride + 1
    cols = [xp[:, i:i + stride * oh:stride, j:j + stride * ow:stride, :]
            for i in range(k) for j in range(k)]
    p = jnp.stack(cols, axis=3)                       # (N, OH, OW, KK, C)
    return p.reshape(N * oh * ow, k * k, C), (N, oh, ow)


def conv_patches(x, kh, kw, stride, pad):
    """x: (N,H,W,C) -> (N*OH*OW, KH*KW*C). K ordering = (kh, kw, cin)."""
    N, H, W, C = x.shape
    xp = jnp.pad(x, ((0, 0), (pad, pad), (pad, pad), (0, 0)))
    oh = (H + 2 * pad - kh) // stride + 1
    ow = (W + 2 * pad - kw) // stride + 1
    cols = [xp[:, i:i + stride * oh:stride, j:j + stride * ow:stride, :]
            for i in range(kh) for j in range(kw)]
    p = jnp.stack(cols, axis=3)                       # (N, OH, OW, KK, C)
    return p.reshape(N * oh * ow, kh * kw * C), (N, oh, ow)


def rademacher(key, shape, dtype=jnp.float32):
    """Exact +/-1 signs (never 0)."""
    return jnp.where(jax.random.bernoulli(key, 0.5, shape), 1.0, -1.0).astype(dtype)


# ----------------------------------------------------------------------------
# Flipout layers (bayesian-torch semantics), fused variants
# ----------------------------------------------------------------------------
def flipout_conv_fused(x, cp, stride, pad, key, *, bn=None, relu=False,
                       residual2d=None):
    """x: (N,H,W,Cin). cp: conv params (pre-transposed (K,Cout) weights).
    Returns (out2d (M, Cout) f32, (N, OH, OW, Cout))."""
    kh, kw = cp["kh"], cp["kw"]
    Kp, Cout = cp["w_t"].shape
    k_eps, k_si, k_so = jax.random.split(key, 3)

    patches, (N, OH, OW) = conv_patches(x, kh, kw, stride, pad)     # (M, Kreal)
    sign_in = rademacher(k_si, x.shape)                             # per input element
    sign_patches, _ = conv_patches(sign_in, kh, kw, stride, pad)
    M, Kreal = patches.shape
    if Kreal != Kp:  # only conv1 (K=147 -> 152); zero pad matches zero weight rows
        patches = jnp.pad(patches, ((0, 0), (0, Kp - Kreal)))
        sign_patches = jnp.pad(sign_patches, ((0, 0), (0, Kp - Kreal)))

    sign_out = rademacher(k_so, (M, Cout))
    # TODO(synk): generate eps and form delta_w in-kernel via pltpu PRNG to avoid
    # materializing the perturbation weights in HBM.
    w_delta = (cp["sigma_t"] *
               jax.random.normal(k_eps, (Kp, Cout), jnp.float32)).astype(jnp.bfloat16)

    out2d = _fused_flipout_call(patches, sign_patches, cp["w_t"], w_delta,
                                sign_out, bn=bn, residual=residual2d, relu=relu)
    return out2d, (N, OH, OW, Cout)


def flipout_linear_fused(x2d, fcp, key):
    """x2d: (M, Fin). Returns logits (M, num_classes)."""
    M, Fin = x2d.shape
    Kp, Np = fcp["w_t"].shape
    k_eps, k_beps, k_si, k_so = jax.random.split(key, 4)

    sign_in = rademacher(k_si, (M, Fin))
    sign_out = rademacher(k_so, (M, Np))
    w_delta = (fcp["sigma_t"] *
               jax.random.normal(k_eps, (Kp, Np), jnp.float32)).astype(jnp.bfloat16)
    b_delta = fcp["b_sigma"] * jax.random.normal(k_beps, (Np,), jnp.float32)

    out = _fused_flipout_call(x2d, sign_in, fcp["w_t"], w_delta, sign_out,
                              bias=(fcp["b_mu"], b_delta))
    return out[:, :fcp["n_real"]]


# ----------------------------------------------------------------------------
# Parameter construction (deterministic, MOPED-style sigma = delta * |mu|)
# Weights are stored pre-transposed (K, Cout), K-padded to a multiple of 8,
# mu in bf16 for the MXU, sigma in f32 for the perturbation draw.
# ----------------------------------------------------------------------------
def make_conv_params(key, cout, cin, kh, kw):
    fan_in = cin * kh * kw
    std = (2.0 / fan_in) ** 0.5
    w = std * jax.random.normal(key, (cout, cin, kh, kw), jnp.float32)
    # (Cout,Cin,KH,KW) -> (KH,KW,Cin,Cout) -> (K,Cout): matches patch K ordering
    w_t = jnp.transpose(w, (2, 3, 1, 0)).reshape(kh * kw * cin, cout)
    sigma_t = MOPED_DELTA * jnp.abs(w_t)
    k_real = kh * kw * cin
    k_pad = _round_up(k_real, 8)
    if k_pad != k_real:
        w_t = jnp.pad(w_t, ((0, k_pad - k_real), (0, 0)))
        sigma_t = jnp.pad(sigma_t, ((0, k_pad - k_real), (0, 0)))
    return {"w_t": w_t.astype(jnp.bfloat16), "sigma_t": sigma_t,
            "kh": kh, "kw": kw}


def make_bn_params(c):
    return {"gamma": jnp.ones((c,), jnp.float32),
            "beta": jnp.zeros((c,), jnp.float32)}


def make_fc_params(key, num_classes, fin):
    kw_, kb_ = jax.random.split(key)
    w = (1.0 / (fin ** 0.5)) * jax.random.normal(kw_, (num_classes, fin), jnp.float32)
    b = 0.01 * jax.random.normal(kb_, (num_classes,), jnp.float32)
    w_t = w.T                                          # (Fin, num_classes)
    sigma_t = MOPED_DELTA * jnp.abs(w_t)
    n_pad = max(_round_up(num_classes, 128), 128)      # lane-dense output, padded once
    pn = n_pad - num_classes
    return {"w_t": jnp.pad(w_t, ((0, 0), (0, pn))).astype(jnp.bfloat16),
            "sigma_t": jnp.pad(sigma_t, ((0, 0), (0, pn))),
            "b_mu": jnp.pad(b, (0, pn)),
            "b_sigma": jnp.pad(MOPED_DELTA * jnp.abs(b), (0, pn)),
            "n_real": num_classes}


def make_basic_block_params(key, inplanes, planes, stride):
    k1, k2, k3 = jax.random.split(key, 3)
    p = {"conv1": make_conv_params(k1, planes, inplanes, 3, 3),
         "bn1": make_bn_params(planes),
         "conv2": make_conv_params(k2, planes, planes, 3, 3),
         "bn2": make_bn_params(planes),
         "stride": stride}
    if stride != 1 or inplanes != planes:
        p["downsample"] = {"conv": make_conv_params(k3, planes, inplanes, 1, 1),
                           "bn": make_bn_params(planes)}
    return p


def make_params(key, layers=(1, 1, 1, 1), num_classes=10):
    widths = (64, 128, 256, 512)
    params = {}
    key, k = jax.random.split(key)
    params["conv1"] = make_conv_params(k, 64, 3, 7, 7)
    params["bn1"] = make_bn_params(64)
    inplanes = 64
    for li, (planes, nblocks) in enumerate(zip(widths, layers), start=1):
        first_stride = 1 if li == 1 else 2
        blocks = []
        for bi in range(nblocks):
            key, k = jax.random.split(key)
            s = first_stride if bi == 0 else 1
            blocks.append(make_basic_block_params(k, inplanes, planes, s))
            inplanes = planes
        params[f"layer{li}"] = blocks
    key, k = jax.random.split(key)
    params["fc"] = make_fc_params(k, num_classes, 512)
    return params


# ----------------------------------------------------------------------------
# Forward pass (SVIResNet.forward == ResNet forward with Flipout layers)
# ----------------------------------------------------------------------------
def basic_block_forward(x, p, key):
    N, H, W, C = x.shape
    k1, k2, k3 = jax.random.split(key, 3)

    out2d, (n, oh, ow, c) = flipout_conv_fused(
        x, p["conv1"], p["stride"], 1, k1, bn=p["bn1"], relu=True)
    out = out2d.reshape(n, oh, ow, c)

    if "downsample" in p:
        id2d, _ = flipout_conv_fused(
            x, p["downsample"]["conv"], p["stride"], 0, k3,
            bn=p["downsample"]["bn"], relu=False)
    else:
        id2d = x.reshape(N * H * W, C)

    out2d, (n2, oh2, ow2, c2) = flipout_conv_fused(
        out, p["conv2"], 1, 1, k2, bn=p["bn2"], relu=True, residual2d=id2d)
    return out2d.reshape(n2, oh2, ow2, c2)


def svi_resnet_forward(params, x_nchw, key):
    # NCHW (PyTorch) -> NHWC internal layout.
    x = jnp.transpose(x_nchw, (0, 2, 3, 1)).astype(jnp.float32)

    # conv1 7x7/2 + bn + relu (single fused call)
    key, k = jax.random.split(key)
    out2d, (n, oh, ow, c) = flipout_conv_fused(
        x, params["conv1"], 2, 3, k, bn=params["bn1"], relu=True)
    x = out2d.reshape(n, oh, ow, c)

    # maxpool 3x3/2 pad 1 (-inf padding == PyTorch semantics)
    x = maxpool2d(x, 3, 2, 1)

    # residual stages
    for lname in ("layer1", "layer2", "layer3", "layer4"):
        for block_p in params[lname]:
            key, k = jax.random.split(key)
            x = basic_block_forward(x, block_p, k)

    # adaptive avg pool -> (N, 512)
    pooled = global_avgpool(x)

    # Flipout fc (bias handled in fused epilogue)
    key, k = jax.random.split(key)
    logits = flipout_linear_fused(pooled, params["fc"], k)
    return logits
    # TODO(synk): KL divergence accumulation of the Flipout layers (used only in
    # the ELBO loss, not returned by forward) is not reproduced here.


if __name__ == "__main__":
    num_classes = 10
    params = make_params(jax.random.PRNGKey(42), layers=(1, 1, 1, 1),
                         num_classes=num_classes)
    x = jax.random.normal(jax.random.PRNGKey(0), (2, 3, 32, 32),
                          dtype=jnp.float32)
    sample_key = jax.random.PRNGKey(1)

    logits = svi_resnet_forward(params, x, sample_key)
    logits = jax.block_until_ready(logits)

    assert logits.shape == (2, num_classes), logits.shape
    assert bool(jnp.all(jnp.isfinite(logits)))
    print("KERNEL_OK")
</pallas_src>

<mosaic_0001>
module attributes {stable_mosaic.version = 11 : i64} {
  func.func @_flipout_fused_kernel(%arg0: i32, %arg1: memref<512x152xf32, #tpu.memory_space<vmem>>, %arg2: memref<512x152xf32, #tpu.memory_space<vmem>>, %arg3: memref<152x64xbf16, #tpu.memory_space<vmem>>, %arg4: memref<152x64xbf16, #tpu.memory_space<vmem>>, %arg5: memref<512x64xf32, #tpu.memory_space<vmem>>, %arg6: memref<1x64xf32, #tpu.memory_space<vmem>>, %arg7: memref<1x64xf32, #tpu.memory_space<vmem>>, %arg8: memref<512x64xf32, #tpu.memory_space<vmem>>) attributes {dimension_semantics = [#tpu.dimension_semantics<parallel>], iteration_bounds = array<i64: 1>, scalar_prefetch = 0 : i64, scratch_operands = 0 : i64, tpu.core_type = #tpu.core_type<tc>, window_params = [{pipeline_mode = #tpu.pipeline_mode<synchronous>, transform_indices = @transform_0, window_bounds = array<i64: 512, 152>}, {pipeline_mode = #tpu.pipeline_mode<synchronous>, transform_indices = @transform_1, window_bounds = array<i64: 512, 152>}, {transform_indices = @transform_2, window_bounds = array<i64: 152, 64>}, {transform_indices = @transform_3, window_bounds = array<i64: 152, 64>}, {transform_indices = @transform_4, window_bounds = array<i64: 512, 64>}, {transform_indices = @transform_5, window_bounds = array<i64: 1, 64>}, {transform_indices = @transform_6, window_bounds = array<i64: 1, 64>}, {transform_indices = @transform_7, window_bounds = array<i64: 512, 64>}]} {
    %c0 = arith.constant 0 : index
    %c0_0 = arith.constant 0 : index
    %0 = vector.load %arg1[%c0, %c0_0] : memref<512x152xf32, #tpu.memory_space<vmem>>, vector<512x152xf32>
    %c0_1 = arith.constant 0 : index
    %c0_2 = arith.constant 0 : index
    %1 = vector.load %arg2[%c0_1, %c0_2] : memref<512x152xf32, #tpu.memory_space<vmem>>, vector<512x152xf32>
    %2 = arith.truncf %0 : vector<512x152xf32> to vector<512x152xbf16>
    %3 = arith.mulf %0, %1 : vector<512x152xf32>
    %4 = arith.truncf %3 : vector<512x152xf32> to vector<512x152xbf16>
    %c0_3 = arith.constant 0 : index
    %c0_4 = arith.constant 0 : index
    %5 = vector.load %arg3[%c0_3, %c0_4] : memref<152x64xbf16, #tpu.memory_space<vmem>>, vector<152x64xbf16>
    %cst = arith.constant dense<0.000000e+00> : vector<512x64xf32>
    %6 = tpu.matmul %2, %5, %cst {dimension_numbers = #tpu.dot_dimension_numbers<[1], [0], [0], [1], [0, 0, 1, 1], [], []>} : vector<512x152xbf16>, vector<152x64xbf16>, vector<512x64xf32> -> vector<512x64xf32>
    %c0_5 = arith.constant 0 : index
    %c0_6 = arith.constant 0 : index
    %7 = vector.load %arg4[%c0_5, %c0_6] : memref<152x64xbf16, #tpu.memory_space<vmem>>, vector<152x64xbf16>
    %cst_7 = arith.constant dense<0.000000e+00> : vector<512x64xf32>
    %8 = tpu.matmul %4, %7, %cst_7 {dimension_numbers = #tpu.dot_dimension_numbers<[1], [0], [0], [1], [0, 0, 1, 1], [], []>} : vector<512x152xbf16>, vector<152x64xbf16>, vector<512x64xf32> -> vector<512x64xf32>
    %c0_8 = arith.constant 0 : index
    %c0_9 = arith.constant 0 : index
    %9 = vector.load %arg5[%c0_8, %c0_9] : memref<512x64xf32, #tpu.memory_space<vmem>>, vector<512x64xf32>
    %10 = arith.mulf %8, %9 : vector<512x64xf32>
    %11 = arith.addf %6, %10 : vector<512x64xf32>
    %cst_10 = arith.constant dense<0.000000e+00> : vector<64xf32>
    %12 = vector.multi_reduction <add>, %11, %cst_10 [0] : vector<512x64xf32> to vector<64xf32>
    %13 = vector.shape_cast %12 : vector<64xf32> to vector<1x64xf32>
    %cst_11 = arith.constant 5.120000e+02 : f32
    %14 = vector.broadcast %cst_11 : f32 to vector<1x64xf32>
    %15 = arith.divf %13, %14 : vector<1x64xf32>
    %16 = vector.broadcast %15 : vector<1x64xf32> to vector<512x64xf32>
    %17 = arith.subf %11, %16 : vector<512x64xf32>
    %18 = arith.mulf %17, %17 : vector<512x64xf32>
    %cst_12 = arith.constant dense<0.000000e+00> : vector<64xf32>
    %19 = vector.multi_reduction <add>, %18, %cst_12 [0] : vector<512x64xf32> to vector<64xf32>
    %20 = vector.shape_cast %19 : vector<64xf32> to vector<1x64xf32>
    %cst_13 = arith.constant 5.120000e+02 : f32
    %21 = vector.broadcast %cst_13 : f32 to vector<1x64xf32>
    %22 = arith.divf %20, %21 : vector<1x64xf32>
    %23 = vector.broadcast %15 : vector<1x64xf32> to vector<512x64xf32>
    %24 = arith.subf %11, %23 : vector<512x64xf32>
    %cst_14 = arith.constant 9.99999974E-6 : f32
    %25 = vector.broadcast %cst_14 : f32 to vector<1x64xf32>
    %26 = arith.addf %22, %25 : vector<1x64xf32>
    %27 = math.rsqrt %26 : vector<1x64xf32>
    %28 = vector.broadcast %27 : vector<1x64xf32> to vector<512x64xf32>
    %29 = arith.mulf %24, %28 : vector<512x64xf32>
    %c0_15 = arith.constant 0 : index
    %c0_16 = arith.constant 0 : index
    %30 = vector.load %arg6[%c0_15, %c0_16] : memref<1x64xf32, #tpu.memory_space<vmem>>, vector<1x64xf32>
    %31 = vector.broadcast %30 : vector<1x64xf32> to vector<512x64xf32>
    %32 = arith.mulf %29, %31 : vector<512x64xf32>
    %c0_17 = arith.constant 0 : index
    %c0_18 = arith.constant 0 : index
    %33 = vector.load %arg7[%c0_17, %c0_18] : memref<1x64xf32, #tpu.memory_space<vmem>>, vector<1x64xf32>
    %34 = vector.broadcast %33 : vector<1x64xf32> to vector<512x64xf32>
    %35 = arith.addf %32, %34 : vector<512x64xf32>
    %cst_19 = arith.constant 0.000000e+00 : f32
    %36 = vector.broadcast %cst_19 : f32 to vector<512x64xf32>
    %37 = arith.maximumf %35, %36 : vector<512x64xf32>
    %c0_20 = arith.constant 0 : index
    %c0_21 = arith.constant 0 : index
    %38 = vector.load %arg8[%c0_20, %c0_21] : memref<512x64xf32, #tpu.memory_space<vmem>>, vector<512x64xf32>
    tpu.vector_store %arg8[%c0_20, %c0_21], %37 {strides = array<i32>} : memref<512x64xf32, #tpu.memory_space<vmem>>, vector<512x64xf32>,
    return
  }
  func.func @transform_0(%arg0: i32) -> (i32, i32) {
    %c0_i32 = arith.constant 0 : i32
    %c0_i32_0 = arith.constant 0 : i32
    %c0_i32_1 = arith.constant 0 : i32
    return %c0_i32, %c0_i32_0 : i32, i32
  }
  func.func @transform_1(%arg0: i32) -> (i32, i32) {
    %c0_i32 = arith.constant 0 : i32
    %c0_i32_0 = arith.constant 0 : i32
    %c0_i32_1 = arith.constant 0 : i32
    return %c0_i32, %c0_i32_0 : i32, i32
  }
  func.func @transform_2(%arg0: i32) -> (i32, i32) {
    %c0_i32 = arith.constant 0 : i32
    %c0_i32_0 = arith.constant 0 : i32
    return %c0_i32, %arg0 : i32, i32
  }
  func.func @transform_3(%arg0: i32) -> (i32, i32) {
    %c0_i32 = arith.constant 0 : i32
    %c0_i32_0 = arith.constant 0 : i32
    return %c0_i32, %arg0 : i32, i32
  }
  func.func @transform_4(%arg0: i32) -> (i32, i32) {
    %c0_i32 = arith.constant 0 : i32
    %c0_i32_0 = arith.constant 0 : i32
    return %c0_i32, %arg0 : i32, i32
  }
  func.func @transform_5(%arg0: i32) -> (i32, i32) {
    %c0_i32 = arith.constant 0 : i32
    %c0_i32_0 = arith.constant 0 : i32
    return %c0_i32, %arg0 : i32, i32
  }
  func.func @transform_6(%arg0: i32) -> (i32, i32) {
    %c0_i32 = arith.constant 0 : i32
    %c0_i32_0 = arith.constant 0 : i32
    return %c0_i32, %arg0 : i32, i32
  }
  func.func @transform_7(%arg0: i32) -> (i32, i32) {
    %c0_i32 = arith.constant 0 : i32
    %c0_i32_0 = arith.constant 0 : i32
    return %c0_i32, %arg0 : i32, i32
  }
}

</mosaic_0001>

<bundles_post_ra>
// kernel: tpu_custom_call.1
= control target key start
LH: loop header
LB: loop body
LE: loop exit
PB: predicated region body
PF: predicated region fallthrough
CT: control target
= control target key end

     0   :  { %v2444_v0 = vmov 0   ;;  %vm634_vm0 = vcmask 195584   ;;  %vm731_vm1 = vcmask 1043456   ;;  %vm1597_vm2 = vcmask 523264   ;;  %s5371_s3 = inlined_call_operand.vmem [shape: bf16[152,64], index: 3, kind: input, shape index: {}]   ;;  %s5372_s2 = inlined_call_operand.vmem [shape: bf16[152,64], index: 2, kind: input, shape index: {}]   ;;  %s5373_s0 = inlined_call_operand.vmem [shape: f32[512,152], index: 0, kind: input, shape index: {}]   ;;  %s5374_s1 = inlined_call_operand.vmem [shape: f32[512,152], index: 1, kind: input, shape index: {}]   ;;  %s5375_s4 = inlined_call_operand.vmem [shape: f32[512,64], index: 4, kind: input, shape index: {}]   ;;  %s5376_s5 = inlined_call_operand.vmem [shape: f32[1,64], index: 5, kind: input, shape index: {}]   ;;  %s5377_s6 = inlined_call_operand.vmem [shape: f32[1,64], index: 6, kind: input, shape index: {}]   ;;  %s5378_s7 = inlined_call_operand.vmem [shape: f32[512,64], index: 7, kind: output, shape index: {}]  }
   0x1   :  { %735 = vmatprep.subr.bf16.mxu0 %v2444_v0  ;;  %1308 = vmatprep.subr.bf16.mxu1 %v2444_v0  ;;  %v2422_v1 = vld [vmem:[%s5371_s3] sm:$0xff]   ;;  %v2424_v3 = vld [vmem:[%s5371_s3 + $0x8] sm:$0xff]   ;;  %v2426_v5 = vld [vmem:[%s5371_s3 + $0x10] sm:$0xff]  }
   0x2   :  { %v2423_v2 = vld [vmem:[%s5372_s2] sm:$0xff]   ;;  %736 = vmatpush1.bf16.msra.mxu0 %v2422_v1  ;;  %v2425_v4 = vld [vmem:[%s5372_s2 + $0x8] sm:$0xff]   ;;  %v2427_v6 = vld [vmem:[%s5372_s2 + $0x10] sm:$0xff]  }
   0x3   :  { %1309 = vmatpush1.bf16.msra.mxu1 %v2423_v2  ;;  %737 = vmatprep.subr.bf16.mxu0 %v2444_v0  ;;  %v2428_v7 = vld [vmem:[%s5371_s3 + $0x18] sm:$0xff]   ;;  %v2430_v9 = vld [vmem:[%s5371_s3 + $0x20] sm:$0xff]   ;;  %v2432_v11 = vld [vmem:[%s5371_s3 + $0x28] sm:$0xff]  }
   0x4   :  { %1310 = vmatprep.subr.bf16.mxu1 %v2444_v0  ;;  %v2429_v8 = vld [vmem:[%s5372_s2 + $0x18] sm:$0xff]   ;;  %v2431_v10 = vld [vmem:[%s5372_s2 + $0x20] sm:$0xff]   ;;  %v2433_v12 = vld [vmem:[%s5372_s2 + $0x28] sm:$0xff]  }
   0x5   :  { %v28_v13 = vld [vmem:[%s5373_s0 + $0x8] sm:$0xff]  ;;  %v30_v14 = vld [vmem:[%s5373_s0 + $0x18] sm:$0xff]  ;;  %v2434_v20 = vld [vmem:[%s5371_s3 + $0x30] sm:$0xff]  }
   0x6   :  { %738 = vmatpush1.bf16.msra.mxu0 %v2424_v3  ;;  %v156_v15 = vld [vmem:[%s5374_s1 + $0x8] sm:$0xff]  ;;  %v158_v16 = vld [vmem:[%s5374_s1 + $0x18] sm:$0xff]  ;;  %v284_v17 = vpack.c.bf16 %v30_v14, %v28_v13  ;;  %v2435_v21 = vld [vmem:[%s5372_s2 + $0x30] sm:$0xff]  }
   0x7   :  { %1311 = vmatpush1.bf16.msra.mxu1 %v2425_v4  ;;  %739 = vmatprep.subr.bf16.mxu0 %v2444_v0  ;;  %v348_v18 = vmul.f32 %v156_v15, %v28_v13  ;;  %v350_v19 = vmul.f32 %v158_v16, %v30_v14  ;;  %v2436_v23 = vld [vmem:[%s5371_s3 + $0x38] sm:$0xff]   ;;  %v2438_v25 = vld [vmem:[%s5371_s3 + $0x40] sm:$0xff]   ;;  %v2440_v27 = vld [vmem:[%s5371_s3 + $0x48] ss:$0 sps:$4 sm:$0xff]  }
   0x8   :  { %1312 = vmatprep.subr.bf16.mxu1 %v2444_v0  ;;  %2387 = vmatprep.mubr.msk.bf16.mxu1 %vm634_vm0, %v284_v17  ;;  %v2437_v24 = vld [vmem:[%s5372_s2 + $0x38] sm:$0xff]   ;;  %v2439_v26 = vld [vmem:[%s5372_s2 + $0x40] sm:$0xff]   ;;  %v29_v29 = vld [vmem:[%s5373_s0 + $0x10] sm:$0xff]  ;;  %v733_v41 = vsel %vm731_vm1, %v2440_v27, 0 }
   0x9   :  { %v476_v22 = vpack.c.bf16 %v350_v19, %v348_v18  ;;  %v27_v28 = vld [vmem:[%s5373_s0] sm:$0xff]  ;;  %v157_v31 = vld [vmem:[%s5374_s1 + $0x10] sm:$0xff]  ;;  %v32_v32 = vld [vmem:[%s5373_s0 + $0x28] sm:$0xff] }
   0xa   :  { %740 = vmatpush1.bf16.msra.mxu0 %v2426_v5  ;;  %v155_v30 = vld [vmem:[%s5374_s1] sm:$0xff]  ;;  %v34_v33 = vld [vmem:[%s5373_s0 + $0x38] sm:$0xff]  ;;  %v160_v34 = vld [vmem:[%s5374_s1 + $0x28] sm:$0xff]  ;;  %v349_v38 = vmul.f32 %v157_v31, %v29_v29  ;;  %v283_v46 = vpack.c.bf16 %v29_v29, %v27_v28 }
   0xb   :  { %1313 = vmatpush1.bf16.msra.mxu1 %v2427_v6  ;;  %741 = vmatprep.subr.bf16.mxu0 %v2444_v0  ;;  %v162_v35 = vld [vmem:[%s5374_s1 + $0x38] sm:$0xff]  ;;  %v2441_v36 = vld [vmem:[%s5372_s2 + $0x48] ss:$0 sps:$4 sm:$0xff]   ;;  %v347_v37 = vmul.f32 %v155_v30, %v27_v28  ;;  %v352_v39 = vmul.f32 %v160_v34, %v32_v32  ;;  %v31_v44 = vld [vmem:[%s5373_s0 + $0x20] sm:$0xff]  ;;  %v286_v51 = vpack.c.bf16 %v34_v33, %v32_v32 }
   0xc   :  { %1314 = vmatprep.subr.bf16.mxu1 %v2444_v0  ;;  %2345 = vmatprep.mubr.msk.bf16.mxu0 %vm634_vm0, %v476_v22  ;;  %v354_v40 = vmul.f32 %v162_v35, %v34_v33  ;;  %v1306_v42 = vsel %vm731_vm1, %v2441_v36, 0  ;;  %v33_v45 = vld [vmem:[%s5373_s0 + $0x30] sm:$0xff]  ;;  %v159_v48 = vld [vmem:[%s5374_s1 + $0x20] sm:$0xff]  ;;  %v36_v50 = vld [vmem:[%s5373_s0 + $0x48] sm:$0xff] }
   0xd   :  { %v475_v43 = vpack.c.bf16 %v349_v38, %v347_v37  ;;  %v161_v49 = vld [vmem:[%s5374_s1 + $0x30] sm:$0xff]  ;;  %v38_v52 = vld [vmem:[%s5373_s0 + $0x58] sm:$0xff]  ;;  %v164_v53 = vld [vmem:[%s5374_s1 + $0x48] sm:$0xff]  ;;  %v351_v55 = vmul.f32 %v159_v48, %v31_v44  ;;  %v285_v62 = vpack.c.bf16 %v33_v45, %v31_v44 }
   0xe   :  { %742 = vmatpush1.bf16.msra.mxu0 %v2428_v7  ;;  %v478_v47 = vpack.c.bf16 %v354_v40, %v352_v39  ;;  %v166_v54 = vld [vmem:[%s5374_s1 + $0x58] sm:$0xff]  ;;  %v353_v56 = vmul.f32 %v161_v49, %v33_v45  ;;  %v356_v57 = vmul.f32 %v164_v53, %v36_v50  ;;  %v35_v60 = vld [vmem:[%s5373_s0 + $0x40] sm:$0xff]  ;;  %v37_v61 = vld [vmem:[%s5373_s0 + $0x50] sm:$0xff]  ;;  %v288_v3 = vpack.c.bf16 %v38_v52, %v36_v50 }
   0xf   :  { %1315 = vmatpush1.bf16.msra.mxu1 %v2429_v8  ;;  %743 = vmatprep.subr.bf16.mxu0 %v2444_v0  ;;  %v358_v58 = vmul.f32 %v166_v54, %v38_v52  ;;  %v165_v1 = vld [vmem:[%s5374_s1 + $0x50] sm:$0xff]  ;;  %v40_v2 = vld [vmem:[%s5373_s0 + $0x68] sm:$0xff]  ;;  %v42_v4 = vld [vmem:[%s5373_s0 + $0x78] sm:$0xff]  ;;  %v287_v14 = vpack.c.bf16 %v37_v61, %v35_v60 }
  0x10   :  { %1316 = vmatprep.subr.bf16.mxu1 %v2444_v0  ;;  %v477_v59 = vpack.c.bf16 %v353_v56, %v351_v55  ;;  %v168_v5 = vld [vmem:[%s5374_s1 + $0x68] sm:$0xff]  ;;  %v170_v6 = vld [vmem:[%s5374_s1 + $0x78] sm:$0xff]  ;;  %v357_v8 = vmul.f32 %v165_v1, %v37_v61  ;;  %v41_v13 = vld [vmem:[%s5373_s0 + $0x70] sm:$0xff]  ;;  %v290_v19 = vpack.c.bf16 %v42_v4, %v40_v2 }
  0x11   :  { %v480_v63 = vpack.c.bf16 %v358_v58, %v356_v57  ;;  %v167_v16 = vld [vmem:[%s5374_s1 + $0x60] sm:$0xff]  ;;  %v169_v17 = vld [vmem:[%s5374_s1 + $0x70] sm:$0xff]  ;;  %v44_v18 = vld [vmem:[%s5373_s0 + $0x88] sm:$0xff] }
  0x12   :  { %744 = vmatpush1.bf16.msra.mxu0 %v2430_v9  ;;  %v360_v9 = vmul.f32 %v168_v5, %v40_v2  ;;  %v174_v22 = vld [vmem:[%s5374_s1 + $0x98] sm:$0xff]  ;;  %v43_v28 = vld [vmem:[%s5373_s0 + $0x80] sm:$0xff]  ;;  %v45_v29 = vld [vmem:[%s5373_s0 + $0x90] sm:$0xff] }
  0x13   :  { %1317 = vmatpush1.bf16.msra.mxu1 %v2431_v10  ;;  %745 = vmatprep.subr.bf16.mxu0 %v2444_v0  ;;  %v362_v10 = vmul.f32 %v170_v6, %v42_v4  ;;  %v171_v32 = vld [vmem:[%s5374_s1 + $0x80] sm:$0xff]  ;;  %v173_v33 = vld [vmem:[%s5374_s1 + $0x90] sm:$0xff]  ;;  %v48_v34 = vld [vmem:[%s5373_s0 + $0xa8] sm:$0xff] }
  0x14   :  { %1318 = vmatprep.subr.bf16.mxu1 %v2444_v0  ;;  %v50_v36 = vld [vmem:[%s5373_s0 + $0xb8] sm:$0xff]  ;;  %v176_v37 = vld [vmem:[%s5374_s1 + $0xa8] sm:$0xff]  ;;  %v363_v39 = vmul.f32 %v171_v32, %v43_v28  ;;  %v365_v40 = vmul.f32 %v173_v33, %v45_v29  ;;  %v47_v44 = vld [vmem:[%s5373_s0 + $0xa0] sm:$0xff] }
  0x15   :  { %v482_v15 = vpack.c.bf16 %v362_v10, %v360_v9  ;;  %v178_v38 = vld [vmem:[%s5374_s1 + $0xb8] sm:$0xff]  ;;  %v49_v45 = vld [vmem:[%s5373_s0 + $0xb0] sm:$0xff]  ;;  %v175_v48 = vld [vmem:[%s5374_s1 + $0xa0] sm:$0xff] }
  0x16   :  { %746 = vmatpush1.bf16.msra.mxu0 %v2432_v11  ;;  %v177_v49 = vld [vmem:[%s5374_s1 + $0xb0] sm:$0xff]  ;;  %v52_v50 = vld [vmem:[%s5373_s0 + $0xc8] sm:$0xff]  ;;  %v54_v52 = vld [vmem:[%s5373_s0 + $0xd8] sm:$0xff]  ;;  %v367_v55 = vmul.f32 %v175_v48, %v47_v44 }
  0x17   :  { %1319 = vmatpush1.bf16.msra.mxu1 %v2433_v12  ;;  %747 = vmatprep.subr.bf16.mxu0 %v2444_v0  ;;  %v39_v12 = vld [vmem:[%s5373_s0 + $0x60] sm:$0xff]  ;;  %v180_v53 = vld [vmem:[%s5374_s1 + $0xc8] sm:$0xff]  ;;  %v182_v54 = vld [vmem:[%s5374_s1 + $0xd8] sm:$0xff]  ;;  %v369_v56 = vmul.f32 %v177_v49, %v49_v45 }
  0x18   :  { %1320 = vmatprep.subr.bf16.mxu1 %v2444_v0  ;;  %v289_v30 = vpack.c.bf16 %v41_v13, %v39_v12  ;;  %v372_v57 = vmul.f32 %v180_v53, %v52_v50  ;;  %v374_v58 = vmul.f32 %v182_v54, %v54_v52  ;;  %v53_v61 = vld [vmem:[%s5373_s0 + $0xd0] sm:$0xff]  ;;  %v56_v2 = vld [vmem:[%s5373_s0 + $0xe8] sm:$0xff]  ;;  %v58_v4 = vld [vmem:[%s5373_s0 + $0xf8] sm:$0xff] }
  0x19   :  { %v181_v1 = vld [vmem:[%s5374_s1 + $0xd0] sm:$0xff]  ;;  %v184_v5 = vld [vmem:[%s5374_s1 + $0xe8] sm:$0xff]  ;;  %v186_v6 = vld [vmem:[%s5374_s1 + $0xf8] sm:$0xff] }
  0x1a   :  { %748 = vmatpush1.bf16.msra.mxu0 %v2434_v20  ;;  %v46_v20 = vld [vmem:[%s5373_s0 + $0x98] sm:$0xff]  ;;  %v376_v9 = vmul.f32 %v184_v5, %v56_v2  ;;  %v378_v10 = vmul.f32 %v186_v6, %v58_v4  ;;  %v187_v32 = vld [vmem:[%s5374_s1 + $0x100] sm:$0xff]  ;;  %v189_v33 = vld [vmem:[%s5374_s1 + $0x110] sm:$0xff] }
  0x1b   :  { %1321 = vmatpush1.bf16.msra.mxu1 %v2435_v21  ;;  %749 = vmatprep.subr.bf16.mxu0 %v2444_v0  ;;  %v172_v21 = vld [vmem:[%s5374_s1 + $0x88] sm:$0xff]  ;;  %v292_v35 = vpack.c.bf16 %v46_v20, %v44_v18  ;;  %v191_v48 = vld [vmem:[%s5374_s1 + $0x120] sm:$0xff]  ;;  %v193_v49 = vld [vmem:[%s5374_s1 + $0x130] sm:$0xff] }
  0x1c   :  { %1322 = vmatprep.subr.bf16.mxu1 %v2444_v0  ;;  %v196_v53 = vld [vmem:[%s5374_s1 + $0x148] sm:$0xff]  ;;  %v198_v54 = vld [vmem:[%s5374_s1 + $0x158] sm:$0xff] }
  0x1d   :  { %v200_v5 = vld [vmem:[%s5374_s1 + $0x168] sm:$0xff]  ;;  %v202_v6 = vld [vmem:[%s5374_s1 + $0x178] sm:$0xff] }
  0x1e   :  { %750 = vmatpush1.bf16.msra.mxu0 %v2436_v23  ;;  %v359_v23 = vmul.f32 %v167_v16, %v39_v12  ;;  %v55_v12 = vld [vmem:[%s5373_s0 + $0xe0] sm:$0xff] }
  0x1f   :  { %1323 = vmatpush1.bf16.msra.mxu1 %v2437_v24  ;;  %751 = vmatprep.subr.bf16.mxu0 %v2444_v0  ;;  %v361_v24 = vmul.f32 %v169_v17, %v41_v13  ;;  %v57_v13 = vld [vmem:[%s5373_s0 + $0xf0] sm:$0xff]  ;;  %v183_v16 = vld [vmem:[%s5374_s1 + $0xe0] sm:$0xff] }
  0x20   :  { %1324 = vmatprep.subr.bf16.mxu1 %v2444_v0  ;;  %v185_v17 = vld [vmem:[%s5374_s1 + $0xf0] sm:$0xff] }
  0x21   :  { %v481_v27 = vpack.c.bf16 %v361_v24, %v359_v23  ;;  %v375_v23 = vmul.f32 %v183_v16, %v55_v12  ;;  %v377_v24 = vmul.f32 %v185_v17, %v57_v13  ;;  %v199_v16 = vld [vmem:[%s5374_s1 + $0x160] sm:$0xff]  ;;  %v201_v17 = vld [vmem:[%s5374_s1 + $0x170] sm:$0xff] }
  0x22   :  { %752 = vmatpush1.bf16.msra.mxu0 %v2438_v25  ;;  %v364_v25 = vmul.f32 %v172_v21, %v44_v18  ;;  %v60_v18 = vld [vmem:[%s5373_s0 + $0x108] sm:$0xff] }
  0x23   :  { %1325 = vmatpush1.bf16.msra.mxu1 %v2439_v26  ;;  %753 = vmatprep.subr.bf16.mxu0 %v2444_v0  ;;  %v366_v26 = vmul.f32 %v174_v22, %v46_v20  ;;  %v62_v20 = vld [vmem:[%s5373_s0 + $0x118] sm:$0xff]  ;;  %v188_v21 = vld [vmem:[%s5374_s1 + $0x108] sm:$0xff] }
  0x24   :  { %1326 = vmatprep.subr.bf16.mxu1 %v2444_v0  ;;  %v163_v0 = vld [vmem:[%s5374_s1 + $0x40] sm:$0xff]  ;;  %v190_v22 = vld [vmem:[%s5374_s1 + $0x118] sm:$0xff] }
  0x25   :  { %v355_v7 = vmul.f32 %v163_v0, %v35_v60  ;;  %v484_v31 = vpack.c.bf16 %v366_v26, %v364_v25  ;;  %v51_v60 = vld [vmem:[%s5373_s0 + $0xc0] sm:$0xff]  ;;  %v380_v25 = vmul.f32 %v188_v21, %v60_v18  ;;  %v382_v26 = vmul.f32 %v190_v22, %v62_v20  ;;  %v204_v21 = vld [vmem:[%s5374_s1 + $0x188] sm:$0xff]  ;;  %v206_v22 = vld [vmem:[%s5374_s1 + $0x198] sm:$0xff] }
  0x26   :  { %754 = vmatpush1.bf16.msra.mxu0 %v733_v41  ;;  %v368_v41 = vmul.f32 %v176_v37, %v48_v34  ;;  %v179_v0 = vld [vmem:[%s5374_s1 + $0xc0] sm:$0xff]  ;;  %v192_v37 = vld [vmem:[%s5374_s1 + $0x128] sm:$0xff] }
  0x27   :  { %1327 = vmatpush1.bf16.msra.mxu1 %v1306_v42  ;;  %v479_v11 = vpack.c.bf16 %v357_v8, %v355_v7  ;;  %v370_v42 = vmul.f32 %v178_v38, %v50_v36  ;;  %v371_v7 = vmul.f32 %v179_v0, %v51_v60  ;;  %v373_v8 = vmul.f32 %v181_v1, %v53_v61  ;;  %v194_v38 = vld [vmem:[%s5374_s1 + $0x138] sm:$0xff]  ;;  %v195_v0 = vld [vmem:[%s5374_s1 + $0x140] sm:$0xff]  ;;  %v197_v1 = vld [vmem:[%s5374_s1 + $0x150] sm:$0xff] }
  0x29   :  { %768 = vmatmul.mubr.bf16.vlgmr.msra.gmra.mrb[0].mxu0 %v475_v43  ;;  %v483_v43 = vpack.c.bf16 %v365_v40, %v363_v39 }
  0x2a   :  { %1341 = vmatmul.mubr.bf16.vlgmr.msra.gmra.mrb[0].mxu1 %v283_v46  ;;  %2346 = vmatprep.mubr.msk.bf16.mxu0 %vm634_vm0, %v478_v47  ;;  %v291_v46 = vpack.c.bf16 %v45_v29, %v43_v28  ;;  %v486_v47 = vpack.c.bf16 %v370_v42, %v368_v41  ;;  %v59_v28 = vld [vmem:[%s5373_s0 + $0x100] sm:$0xff]  ;;  %v61_v29 = vld [vmem:[%s5373_s0 + $0x110] sm:$0xff] }
  0x2b   :  { %2388 = vmatprep.mubr.msk.bf16.mxu1 %vm634_vm0, %v286_v51  ;;  %v294_v51 = vpack.c.bf16 %v50_v36, %v48_v34  ;;  %v64_v34 = vld [vmem:[%s5373_s0 + $0x128] sm:$0xff]  ;;  %v66_v36 = vld [vmem:[%s5373_s0 + $0x138] sm:$0xff]  ;;  %v379_v39 = vmul.f32 %v187_v32, %v59_v28  ;;  %v381_v40 = vmul.f32 %v189_v33, %v61_v29  ;;  %v203_v32 = vld [vmem:[%s5374_s1 + $0x180] sm:$0xff] }
  0x2c   :  { %v384_v41 = vmul.f32 %v192_v37, %v64_v34  ;;  %v386_v42 = vmul.f32 %v194_v38, %v66_v36  ;;  %v205_v33 = vld [vmem:[%s5374_s1 + $0x190] sm:$0xff]  ;;  %v208_v37 = vld [vmem:[%s5374_s1 + $0x1a8] sm:$0xff]  ;;  %v210_v38 = vld [vmem:[%s5374_s1 + $0x1b8] sm:$0xff] }
  0x31   :  { %776 = vmatmul.mubr.bf16.gmra.mrb[4].mxu0 %v477_v59  ;;  %v485_v59 = vpack.c.bf16 %v369_v56, %v367_v55 }
  0x32   :  { %1349 = vmatmul.mubr.bf16.gmra.mrb[4].mxu1 %v285_v62  ;;  %2347 = vmatprep.mubr.msk.bf16.mxu0 %vm634_vm0, %v480_v63  ;;  %v293_v62 = vpack.c.bf16 %v49_v45, %v47_v44  ;;  %v488_v63 = vpack.c.bf16 %v374_v58, %v372_v57  ;;  %v63_v44 = vld [vmem:[%s5373_s0 + $0x120] sm:$0xff]  ;;  %v65_v45 = vld [vmem:[%s5373_s0 + $0x130] sm:$0xff] }
  0x33   :  { %2389 = vmatprep.mubr.msk.bf16.mxu1 %vm634_vm0, %v288_v3  ;;  %v296_v3 = vpack.c.bf16 %v54_v52, %v52_v50  ;;  %v68_v50 = vld [vmem:[%s5373_s0 + $0x148] sm:$0xff]  ;;  %v70_v52 = vld [vmem:[%s5373_s0 + $0x158] sm:$0xff]  ;;  %v383_v55 = vmul.f32 %v191_v48, %v63_v44  ;;  %v385_v56 = vmul.f32 %v193_v49, %v65_v45  ;;  %v207_v48 = vld [vmem:[%s5374_s1 + $0x1a0] sm:$0xff] }
  0x34   :  { %v388_v57 = vmul.f32 %v196_v53, %v68_v50  ;;  %v390_v58 = vmul.f32 %v198_v54, %v70_v52  ;;  %v209_v49 = vld [vmem:[%s5374_s1 + $0x1b0] sm:$0xff]  ;;  %v212_v53 = vld [vmem:[%s5374_s1 + $0x1c8] sm:$0xff]  ;;  %v214_v54 = vld [vmem:[%s5374_s1 + $0x1d8] sm:$0xff] }
  0x39   :  { %784 = vmatmul.mubr.bf16.gmra.mrb[8].mxu0 %v479_v11  ;;  %v487_v11 = vpack.c.bf16 %v373_v8, %v371_v7 }
  0x3a   :  { %1357 = vmatmul.mubr.bf16.gmra.mrb[8].mxu1 %v287_v14  ;;  %2348 = vmatprep.mubr.msk.bf16.mxu0 %vm634_vm0, %v482_v15  ;;  %v295_v14 = vpack.c.bf16 %v53_v61, %v51_v60  ;;  %v490_v15 = vpack.c.bf16 %v378_v10, %v376_v9  ;;  %v67_v60 = vld [vmem:[%s5373_s0 + $0x140] sm:$0xff]  ;;  %v69_v61 = vld [vmem:[%s5373_s0 + $0x150] sm:$0xff] }
  0x3b   :  { %2390 = vmatprep.mubr.msk.bf16.mxu1 %vm634_vm0, %v290_v19  ;;  %v298_v19 = vpack.c.bf16 %v58_v4, %v56_v2  ;;  %v72_v2 = vld [vmem:[%s5373_s0 + $0x168] sm:$0xff]  ;;  %v74_v4 = vld [vmem:[%s5373_s0 + $0x178] sm:$0xff]  ;;  %v387_v7 = vmul.f32 %v195_v0, %v67_v60  ;;  %v389_v8 = vmul.f32 %v197_v1, %v69_v61  ;;  %v211_v0 = vld [vmem:[%s5374_s1 + $0x1c0] sm:$0xff] }
  0x3c   :  { %v392_v9 = vmul.f32 %v200_v5, %v72_v2  ;;  %v394_v10 = vmul.f32 %v202_v6, %v74_v4  ;;  %v213_v1 = vld [vmem:[%s5374_s1 + $0x1d0] sm:$0xff]  ;;  %v216_v5 = vld [vmem:[%s5374_s1 + $0x1e8] sm:$0xff]  ;;  %v218_v6 = vld [vmem:[%s5374_s1 + $0x1f8] sm:$0xff] }
  0x41   :  { %792 = vmatmul.mubr.bf16.gmra.mrb[12].mxu0 %v481_v27  ;;  %v489_v27 = vpack.c.bf16 %v377_v24, %v375_v23 }
  0x42   :  { %1365 = vmatmul.mubr.bf16.gmra.mrb[12].mxu1 %v289_v30  ;;  %2349 = vmatprep.mubr.msk.bf16.mxu0 %vm634_vm0, %v484_v31  ;;  %v297_v30 = vpack.c.bf16 %v57_v13, %v55_v12  ;;  %v492_v31 = vpack.c.bf16 %v382_v26, %v380_v25  ;;  %v71_v12 = vld [vmem:[%s5373_s0 + $0x160] sm:$0xff]  ;;  %v73_v13 = vld [vmem:[%s5373_s0 + $0x170] sm:$0xff] }
  0x43   :  { %2391 = vmatprep.mubr.msk.bf16.mxu1 %vm634_vm0, %v292_v35  ;;  %v300_v35 = vpack.c.bf16 %v62_v20, %v60_v18  ;;  %v76_v18 = vld [vmem:[%s5373_s0 + $0x188] sm:$0xff]  ;;  %v78_v20 = vld [vmem:[%s5373_s0 + $0x198] sm:$0xff]  ;;  %v391_v23 = vmul.f32 %v199_v16, %v71_v12  ;;  %v393_v24 = vmul.f32 %v201_v17, %v73_v13  ;;  %v215_v16 = vld [vmem:[%s5374_s1 + $0x1e0] sm:$0xff] }
  0x44   :  { %v396_v25 = vmul.f32 %v204_v21, %v76_v18  ;;  %v398_v26 = vmul.f32 %v206_v22, %v78_v20  ;;  %v217_v17 = vld [vmem:[%s5374_s1 + $0x1f0] sm:$0xff]  ;;  %v220_v21 = vld [vmem:[%s5374_s1 + $0x208] sm:$0xff]  ;;  %v222_v22 = vld [vmem:[%s5374_s1 + $0x218] sm:$0xff] }
  0x49   :  { %800 = vmatmul.mubr.bf16.gmra.mrb[16].mxu0 %v483_v43  ;;  %v491_v43 = vpack.c.bf16 %v381_v40, %v379_v39 }
  0x4a   :  { %1373 = vmatmul.mubr.bf16.gmra.mrb[16].mxu1 %v291_v46  ;;  %2350 = vmatprep.mubr.msk.bf16.mxu0 %vm634_vm0, %v486_v47  ;;  %v299_v46 = vpack.c.bf16 %v61_v29, %v59_v28  ;;  %v494_v47 = vpack.c.bf16 %v386_v42, %v384_v41  ;;  %v75_v28 = vld [vmem:[%s5373_s0 + $0x180] sm:$0xff]  ;;  %v77_v29 = vld [vmem:[%s5373_s0 + $0x190] sm:$0xff] }
  0x4b   :  { %2392 = vmatprep.mubr.msk.bf16.mxu1 %vm634_vm0, %v294_v51  ;;  %v302_v51 = vpack.c.bf16 %v66_v36, %v64_v34  ;;  %v80_v34 = vld [vmem:[%s5373_s0 + $0x1a8] sm:$0xff]  ;;  %v82_v36 = vld [vmem:[%s5373_s0 + $0x1b8] sm:$0xff]  ;;  %v395_v39 = vmul.f32 %v203_v32, %v75_v28  ;;  %v397_v40 = vmul.f32 %v205_v33, %v77_v29  ;;  %v219_v32 = vld [vmem:[%s5374_s1 + $0x200] sm:$0xff] }
  0x4c   :  { %v400_v41 = vmul.f32 %v208_v37, %v80_v34  ;;  %v402_v42 = vmul.f32 %v210_v38, %v82_v36  ;;  %v221_v33 = vld [vmem:[%s5374_s1 + $0x210] sm:$0xff]  ;;  %v224_v37 = vld [vmem:[%s5374_s1 + $0x228] sm:$0xff]  ;;  %v226_v38 = vld [vmem:[%s5374_s1 + $0x238] sm:$0xff] }
  0x51   :  { %808 = vmatmul.mubr.bf16.gmra.mrb[20].mxu0 %v485_v59  ;;  %v493_v59 = vpack.c.bf16 %v385_v56, %v383_v55 }
  0x52   :  { %1381 = vmatmul.mubr.bf16.gmra.mrb[20].mxu1 %v293_v62  ;;  %2351 = vmatprep.mubr.msk.bf16.mxu0 %vm634_vm0, %v488_v63  ;;  %v301_v62 = vpack.c.bf16 %v65_v45, %v63_v44  ;;  %v496_v63 = vpack.c.bf16 %v390_v58, %v388_v57  ;;  %v79_v44 = vld [vmem:[%s5373_s0 + $0x1a0] sm:$0xff]  ;;  %v81_v45 = vld [vmem:[%s5373_s0 + $0x1b0] sm:$0xff] }
  0x53   :  { %2393 = vmatprep.mubr.msk.bf16.mxu1 %vm634_vm0, %v296_v3  ;;  %v304_v3 = vpack.c.bf16 %v70_v52, %v68_v50  ;;  %v84_v50 = vld [vmem:[%s5373_s0 + $0x1c8] sm:$0xff]  ;;  %v86_v52 = vld [vmem:[%s5373_s0 + $0x1d8] sm:$0xff]  ;;  %v399_v55 = vmul.f32 %v207_v48, %v79_v44  ;;  %v401_v56 = vmul.f32 %v209_v49, %v81_v45  ;;  %v223_v48 = vld [vmem:[%s5374_s1 + $0x220] sm:$0xff] }
  0x54   :  { %v404_v57 = vmul.f32 %v212_v53, %v84_v50  ;;  %v406_v58 = vmul.f32 %v214_v54, %v86_v52  ;;  %v225_v49 = vld [vmem:[%s5374_s1 + $0x230] sm:$0xff]  ;;  %v228_v53 = vld [vmem:[%s5374_s1 + $0x248] sm:$0xff]  ;;  %v230_v54 = vld [vmem:[%s5374_s1 + $0x258] sm:$0xff] }
  0x59   :  { %816 = vmatmul.mubr.bf16.gmra.mrb[24].mxu0 %v487_v11  ;;  %v495_v11 = vpack.c.bf16 %v389_v8, %v387_v7 }
  0x5a   :  { %1389 = vmatmul.mubr.bf16.gmra.mrb[24].mxu1 %v295_v14  ;;  %2352 = vmatprep.mubr.msk.bf16.mxu0 %vm634_vm0, %v490_v15  ;;  %v303_v14 = vpack.c.bf16 %v69_v61, %v67_v60  ;;  %v498_v15 = vpack.c.bf16 %v394_v10, %v392_v9  ;;  %v83_v60 = vld [vmem:[%s5373_s0 + $0x1c0] sm:$0xff]  ;;  %v85_v61 = vld [vmem:[%s5373_s0 + $0x1d0] sm:$0xff] }
  0x5b   :  { %2394 = vmatprep.mubr.msk.bf16.mxu1 %vm634_vm0, %v298_v19  ;;  %v306_v19 = vpack.c.bf16 %v74_v4, %v72_v2  ;;  %v88_v2 = vld [vmem:[%s5373_s0 + $0x1e8] sm:$0xff]  ;;  %v90_v4 = vld [vmem:[%s5373_s0 + $0x1f8] sm:$0xff]  ;;  %v403_v7 = vmul.f32 %v211_v0, %v83_v60  ;;  %v405_v8 = vmul.f32 %v213_v1, %v85_v61  ;;  %v227_v0 = vld [vmem:[%s5374_s1 + $0x240] sm:$0xff] }
  0x5c   :  { %v408_v9 = vmul.f32 %v216_v5, %v88_v2  ;;  %v410_v10 = vmul.f32 %v218_v6, %v90_v4  ;;  %v229_v1 = vld [vmem:[%s5374_s1 + $0x250] sm:$0xff]  ;;  %v232_v5 = vld [vmem:[%s5374_s1 + $0x268] sm:$0xff]  ;;  %v234_v6 = vld [vmem:[%s5374_s1 + $0x278] sm:$0xff] }
  0x61   :  { %824 = vmatmul.mubr.bf16.gmra.mrb[28].mxu0 %v489_v27  ;;  %v497_v27 = vpack.c.bf16 %v393_v24, %v391_v23 }
  0x62   :  { %1397 = vmatmul.mubr.bf16.gmra.mrb[28].mxu1 %v297_v30  ;;  %2353 = vmatprep.mubr.msk.bf16.mxu0 %vm634_vm0, %v492_v31  ;;  %v305_v30 = vpack.c.bf16 %v73_v13, %v71_v12  ;;  %v500_v31 = vpack.c.bf16 %v398_v26, %v396_v25  ;;  %v87_v12 = vld [vmem:[%s5373_s0 + $0x1e0] sm:$0xff]  ;;  %v89_v13 = vld [vmem:[%s5373_s0 + $0x1f0] sm:$0xff] }
  0x63   :  { %2395 = vmatprep.mubr.msk.bf16.mxu1 %vm634_vm0, %v300_v35  ;;  %v308_v35 = vpack.c.bf16 %v78_v20, %v76_v18  ;;  %v92_v18 = vld [vmem:[%s5373_s0 + $0x208] sm:$0xff]  ;;  %v94_v20 = vld [vmem:[%s5373_s0 + $0x218] sm:$0xff]  ;;  %v407_v23 = vmul.f32 %v215_v16, %v87_v12  ;;  %v409_v24 = vmul.f32 %v217_v17, %v89_v13  ;;  %v231_v16 = vld [vmem:[%s5374_s1 + $0x260] sm:$0xff] }
  0x64   :  { %v412_v25 = vmul.f32 %v220_v21, %v92_v18  ;;  %v414_v26 = vmul.f32 %v222_v22, %v94_v20  ;;  %v233_v17 = vld [vmem:[%s5374_s1 + $0x270] sm:$0xff]  ;;  %v236_v21 = vld [vmem:[%s5374_s1 + $0x288] sm:$0xff]  ;;  %v238_v22 = vld [vmem:[%s5374_s1 + $0x298] sm:$0xff] }
  0x69   :  { %832 = vmatmul.mubr.bf16.gmra.mrb[32].mxu0 %v491_v43  ;;  %v499_v43 = vpack.c.bf16 %v397_v40, %v395_v39 }
  0x6a   :  { %1405 = vmatmul.mubr.bf16.gmra.mrb[32].mxu1 %v299_v46  ;;  %2354 = vmatprep.mubr.msk.bf16.mxu0 %vm634_vm0, %v494_v47  ;;  %v307_v46 = vpack.c.bf16 %v77_v29, %v75_v28  ;;  %v502_v47 = vpack.c.bf16 %v402_v42, %v400_v41  ;;  %v91_v28 = vld [vmem:[%s5373_s0 + $0x200] sm:$0xff]  ;;  %v93_v29 = vld [vmem:[%s5373_s0 + $0x210] sm:$0xff] }
  0x6b   :  { %2396 = vmatprep.mubr.msk.bf16.mxu1 %vm634_vm0, %v302_v51  ;;  %v310_v51 = vpack.c.bf16 %v82_v36, %v80_v34  ;;  %v96_v34 = vld [vmem:[%s5373_s0 + $0x228] sm:$0xff]  ;;  %v98_v36 = vld [vmem:[%s5373_s0 + $0x238] sm:$0xff]  ;;  %v411_v39 = vmul.f32 %v219_v32, %v91_v28  ;;  %v413_v40 = vmul.f32 %v221_v33, %v93_v29  ;;  %v235_v32 = vld [vmem:[%s5374_s1 + $0x280] sm:$0xff] }
  0x6c   :  { %v416_v41 = vmul.f32 %v224_v37, %v96_v34  ;;  %v418_v42 = vmul.f32 %v226_v38, %v98_v36  ;;  %v237_v33 = vld [vmem:[%s5374_s1 + $0x290] sm:$0xff]  ;;  %v240_v37 = vld [vmem:[%s5374_s1 + $0x2a8] sm:$0xff]  ;;  %v242_v38 = vld [vmem:[%s5374_s1 + $0x2b8] sm:$0xff] }
  0x71   :  { %840 = vmatmul.mubr.bf16.gmra.mrb[36].mxu0 %v493_v59  ;;  %v501_v59 = vpack.c.bf16 %v401_v56, %v399_v55 }
  0x72   :  { %1413 = vmatmul.mubr.bf16.gmra.mrb[36].mxu1 %v301_v62  ;;  %2355 = vmatprep.mubr.msk.bf16.mxu0 %vm634_vm0, %v496_v63  ;;  %v309_v62 = vpack.c.bf16 %v81_v45, %v79_v44  ;;  %v504_v63 = vpack.c.bf16 %v406_v58, %v404_v57  ;;  %v95_v44 = vld [vmem:[%s5373_s0 + $0x220] sm:$0xff]  ;;  %v97_v45 = vld [vmem:[%s5373_s0 + $0x230] sm:$0xff] }
  0x73   :  { %2397 = vmatprep.mubr.msk.bf16.mxu1 %vm634_vm0, %v304_v3  ;;  %v312_v3 = vpack.c.bf16 %v86_v52, %v84_v50  ;;  %v100_v50 = vld [vmem:[%s5373_s0 + $0x248] sm:$0xff]  ;;  %v102_v52 = vld [vmem:[%s5373_s0 + $0x258] sm:$0xff]  ;;  %v415_v55 = vmul.f32 %v223_v48, %v95_v44  ;;  %v417_v56 = vmul.f32 %v225_v49, %v97_v45  ;;  %v239_v48 = vld [vmem:[%s5374_s1 + $0x2a0] sm:$0xff] }
  0x74   :  { %v420_v57 = vmul.f32 %v228_v53, %v100_v50  ;;  %v422_v58 = vmul.f32 %v230_v54, %v102_v52  ;;  %v241_v49 = vld [vmem:[%s5374_s1 + $0x2b0] sm:$0xff]  ;;  %v244_v53 = vld [vmem:[%s5374_s1 + $0x2c8] sm:$0xff]  ;;  %v246_v54 = vld [vmem:[%s5374_s1 + $0x2d8] sm:$0xff] }
  0x79   :  { %848 = vmatmul.mubr.bf16.gmra.mrb[40].mxu0 %v495_v11  ;;  %v503_v11 = vpack.c.bf16 %v405_v8, %v403_v7 }
  0x7a   :  { %1421 = vmatmul.mubr.bf16.gmra.mrb[40].mxu1 %v303_v14  ;;  %2356 = vmatprep.mubr.msk.bf16.mxu0 %vm634_vm0, %v498_v15  ;;  %v311_v14 = vpack.c.bf16 %v85_v61, %v83_v60  ;;  %v506_v15 = vpack.c.bf16 %v410_v10, %v408_v9  ;;  %v99_v60 = vld [vmem:[%s5373_s0 + $0x240] sm:$0xff]  ;;  %v101_v61 = vld [vmem:[%s5373_s0 + $0x250] sm:$0xff] }
  0x7b   :  { %2398 = vmatprep.mubr.msk.bf16.mxu1 %vm634_vm0, %v306_v19  ;;  %v314_v19 = vpack.c.bf16 %v90_v4, %v88_v2  ;;  %v104_v2 = vld [vmem:[%s5373_s0 + $0x268] sm:$0xff]  ;;  %v106_v4 = vld [vmem:[%s5373_s0 + $0x278] sm:$0xff]  ;;  %v419_v7 = vmul.f32 %v227_v0, %v99_v60  ;;  %v421_v8 = vmul.f32 %v229_v1, %v101_v61  ;;  %v243_v0 = vld [vmem:[%s5374_s1 + $0x2c0] sm:$0xff] }
  0x7c   :  { %v424_v9 = vmul.f32 %v232_v5, %v104_v2  ;;  %v426_v10 = vmul.f32 %v234_v6, %v106_v4  ;;  %v245_v1 = vld [vmem:[%s5374_s1 + $0x2d0] sm:$0xff]  ;;  %v248_v5 = vld [vmem:[%s5374_s1 + $0x2e8] sm:$0xff]  ;;  %v250_v6 = vld [vmem:[%s5374_s1 + $0x2f8] sm:$0xff] }
  0x81   :  { %856 = vmatmul.mubr.bf16.gmra.mrb[44].mxu0 %v497_v27  ;;  %v505_v27 = vpack.c.bf16 %v409_v24, %v407_v23 }
  0x82   :  { %1429 = vmatmul.mubr.bf16.gmra.mrb[44].mxu1 %v305_v30  ;;  %2357 = vmatprep.mubr.msk.bf16.mxu0 %vm634_vm0, %v500_v31  ;;  %v313_v30 = vpack.c.bf16 %v89_v13, %v87_v12  ;;  %v508_v31 = vpack.c.bf16 %v414_v26, %v412_v25  ;;  %v103_v12 = vld [vmem:[%s5373_s0 + $0x260] sm:$0xff]  ;;  %v105_v13 = vld [vmem:[%s5373_s0 + $0x270] sm:$0xff] }
  0x83   :  { %2399 = vmatprep.mubr.msk.bf16.mxu1 %vm634_vm0, %v308_v35  ;;  %v316_v35 = vpack.c.bf16 %v94_v20, %v92_v18  ;;  %v108_v18 = vld [vmem:[%s5373_s0 + $0x288] sm:$0xff]  ;;  %v110_v20 = vld [vmem:[%s5373_s0 + $0x298] sm:$0xff]  ;;  %v423_v23 = vmul.f32 %v231_v16, %v103_v12  ;;  %v425_v24 = vmul.f32 %v233_v17, %v105_v13  ;;  %v247_v16 = vld [vmem:[%s5374_s1 + $0x2e0] sm:$0xff] }
  0x84   :  { %v428_v25 = vmul.f32 %v236_v21, %v108_v18  ;;  %v430_v26 = vmul.f32 %v238_v22, %v110_v20  ;;  %v249_v17 = vld [vmem:[%s5374_s1 + $0x2f0] sm:$0xff]  ;;  %v252_v21 = vld [vmem:[%s5374_s1 + $0x308] sm:$0xff]  ;;  %v254_v22 = vld [vmem:[%s5374_s1 + $0x318] sm:$0xff] }
  0x89   :  { %864 = vmatmul.mubr.bf16.gmra.mrb[48].mxu0 %v499_v43  ;;  %v507_v43 = vpack.c.bf16 %v413_v40, %v411_v39 }
  0x8a   :  { %1437 = vmatmul.mubr.bf16.gmra.mrb[48].mxu1 %v307_v46  ;;  %2358 = vmatprep.mubr.msk.bf16.mxu0 %vm634_vm0, %v502_v47  ;;  %v315_v46 = vpack.c.bf16 %v93_v29, %v91_v28  ;;  %v510_v47 = vpack.c.bf16 %v418_v42, %v416_v41  ;;  %v107_v28 = vld [vmem:[%s5373_s0 + $0x280] sm:$0xff]  ;;  %v109_v29 = vld [vmem:[%s5373_s0 + $0x290] sm:$0xff] }
  0x8b   :  { %2400 = vmatprep.mubr.msk.bf16.mxu1 %vm634_vm0, %v310_v51  ;;  %v318_v51 = vpack.c.bf16 %v98_v36, %v96_v34  ;;  %v112_v34 = vld [vmem:[%s5373_s0 + $0x2a8] sm:$0xff]  ;;  %v114_v36 = vld [vmem:[%s5373_s0 + $0x2b8] sm:$0xff]  ;;  %v427_v39 = vmul.f32 %v235_v32, %v107_v28  ;;  %v429_v40 = vmul.f32 %v237_v33, %v109_v29  ;;  %v251_v32 = vld [vmem:[%s5374_s1 + $0x300] sm:$0xff] }
  0x8c   :  { %v432_v41 = vmul.f32 %v240_v37, %v112_v34  ;;  %v434_v42 = vmul.f32 %v242_v38, %v114_v36  ;;  %v253_v33 = vld [vmem:[%s5374_s1 + $0x310] sm:$0xff]  ;;  %v256_v37 = vld [vmem:[%s5374_s1 + $0x328] sm:$0xff]  ;;  %v258_v38 = vld [vmem:[%s5374_s1 + $0x338] sm:$0xff] }
  0x91   :  { %872 = vmatmul.mubr.bf16.gmra.mrb[52].mxu0 %v501_v59  ;;  %v509_v59 = vpack.c.bf16 %v417_v56, %v415_v55 }
  0x92   :  { %1445 = vmatmul.mubr.bf16.gmra.mrb[52].mxu1 %v309_v62  ;;  %2359 = vmatprep.mubr.msk.bf16.mxu0 %vm634_vm0, %v504_v63  ;;  %v317_v62 = vpack.c.bf16 %v97_v45, %v95_v44  ;;  %v512_v63 = vpack.c.bf16 %v422_v58, %v420_v57  ;;  %v111_v44 = vld [vmem:[%s5373_s0 + $0x2a0] sm:$0xff]  ;;  %v113_v45 = vld [vmem:[%s5373_s0 + $0x2b0] sm:$0xff] }
  0x93   :  { %2401 = vmatprep.mubr.msk.bf16.mxu1 %vm634_vm0, %v312_v3  ;;  %v320_v3 = vpack.c.bf16 %v102_v52, %v100_v50  ;;  %v116_v50 = vld [vmem:[%s5373_s0 + $0x2c8] sm:$0xff]  ;;  %v118_v52 = vld [vmem:[%s5373_s0 + $0x2d8] sm:$0xff]  ;;  %v431_v55 = vmul.f32 %v239_v48, %v111_v44  ;;  %v433_v56 = vmul.f32 %v241_v49, %v113_v45  ;;  %v255_v48 = vld [vmem:[%s5374_s1 + $0x320] sm:$0xff] }
  0x94   :  { %v436_v57 = vmul.f32 %v244_v53, %v116_v50  ;;  %v438_v58 = vmul.f32 %v246_v54, %v118_v52  ;;  %v257_v49 = vld [vmem:[%s5374_s1 + $0x330] sm:$0xff]  ;;  %v260_v53 = vld [vmem:[%s5374_s1 + $0x348] sm:$0xff]  ;;  %v262_v54 = vld [vmem:[%s5374_s1 + $0x358] sm:$0xff] }
  0x99   :  { %880 = vmatmul.mubr.bf16.gmra.mrb[56].mxu0 %v503_v11  ;;  %v511_v11 = vpack.c.bf16 %v421_v8, %v419_v7 }
  0x9a   :  { %1453 = vmatmul.mubr.bf16.gmra.mrb[56].mxu1 %v311_v14  ;;  %2360 = vmatprep.mubr.msk.bf16.mxu0 %vm634_vm0, %v506_v15  ;;  %v319_v14 = vpack.c.bf16 %v101_v61, %v99_v60  ;;  %v514_v15 = vpack.c.bf16 %v426_v10, %v424_v9  ;;  %v115_v60 = vld [vmem:[%s5373_s0 + $0x2c0] sm:$0xff]  ;;  %v117_v61 = vld [vmem:[%s5373_s0 + $0x2d0] sm:$0xff] }
  0x9b   :  { %2402 = vmatprep.mubr.msk.bf16.mxu1 %vm634_vm0, %v314_v19  ;;  %v322_v19 = vpack.c.bf16 %v106_v4, %v104_v2  ;;  %v120_v2 = vld [vmem:[%s5373_s0 + $0x2e8] sm:$0xff]  ;;  %v122_v4 = vld [vmem:[%s5373_s0 + $0x2f8] sm:$0xff]  ;;  %v435_v7 = vmul.f32 %v243_v0, %v115_v60  ;;  %v437_v8 = vmul.f32 %v245_v1, %v117_v61  ;;  %v259_v0 = vld [vmem:[%s5374_s1 + $0x340] sm:$0xff] }
  0x9c   :  { %v440_v9 = vmul.f32 %v248_v5, %v120_v2  ;;  %v442_v10 = vmul.f32 %v250_v6, %v122_v4  ;;  %v261_v1 = vld [vmem:[%s5374_s1 + $0x350] sm:$0xff]  ;;  %v264_v5 = vld [vmem:[%s5374_s1 + $0x368] sm:$0xff]  ;;  %v266_v6 = vld [vmem:[%s5374_s1 + $0x378] sm:$0xff] }
  0xa1   :  { %888 = vmatmul.mubr.bf16.gmra.mrb[60].mxu0 %v505_v27  ;;  %v513_v27 = vpack.c.bf16 %v425_v24, %v423_v23 }
  0xa2   :  { %1461 = vmatmul.mubr.bf16.gmra.mrb[60].mxu1 %v313_v30  ;;  %2361 = vmatprep.mubr.msk.bf16.mxu0 %vm634_vm0, %v508_v31  ;;  %v321_v30 = vpack.c.bf16 %v105_v13, %v103_v12  ;;  %v516_v31 = vpack.c.bf16 %v430_v26, %v428_v25  ;;  %v119_v12 = vld [vmem:[%s5373_s0 + $0x2e0] sm:$0xff]  ;;  %v121_v13 = vld [vmem:[%s5373_s0 + $0x2f0] sm:$0xff] }
  0xa3   :  { %2403 = vmatprep.mubr.msk.bf16.mxu1 %vm634_vm0, %v316_v35  ;;  %v324_v35 = vpack.c.bf16 %v110_v20, %v108_v18  ;;  %v124_v18 = vld [vmem:[%s5373_s0 + $0x308] sm:$0xff]  ;;  %v126_v20 = vld [vmem:[%s5373_s0 + $0x318] sm:$0xff]  ;;  %v439_v23 = vmul.f32 %v247_v16, %v119_v12  ;;  %v441_v24 = vmul.f32 %v249_v17, %v121_v13  ;;  %v263_v16 = vld [vmem:[%s5374_s1 + $0x360] sm:$0xff] }
  0xa4   :  { %v444_v25 = vmul.f32 %v252_v21, %v124_v18  ;;  %v446_v26 = vmul.f32 %v254_v22, %v126_v20  ;;  %v265_v17 = vld [vmem:[%s5374_s1 + $0x370] sm:$0xff]  ;;  %v268_v21 = vld [vmem:[%s5374_s1 + $0x388] sm:$0xff]  ;;  %v270_v22 = vld [vmem:[%s5374_s1 + $0x398] sm:$0xff] }
  0xa9   :  { %896 = vmatmul.mubr.bf16.gmra.mrb[64].mxu0 %v507_v43  ;;  %v515_v43 = vpack.c.bf16 %v429_v40, %v427_v39 }
  0xaa   :  { %1469 = vmatmul.mubr.bf16.gmra.mrb[64].mxu1 %v315_v46  ;;  %2362 = vmatprep.mubr.msk.bf16.mxu0 %vm634_vm0, %v510_v47  ;;  %v323_v46 = vpack.c.bf16 %v109_v29, %v107_v28  ;;  %v518_v47 = vpack.c.bf16 %v434_v42, %v432_v41  ;;  %v123_v28 = vld [vmem:[%s5373_s0 + $0x300] sm:$0xff]  ;;  %v125_v29 = vld [vmem:[%s5373_s0 + $0x310] sm:$0xff] }
  0xab   :  { %2404 = vmatprep.mubr.msk.bf16.mxu1 %vm634_vm0, %v318_v51  ;;  %v326_v51 = vpack.c.bf16 %v114_v36, %v112_v34  ;;  %v128_v34 = vld [vmem:[%s5373_s0 + $0x328] sm:$0xff]  ;;  %v130_v36 = vld [vmem:[%s5373_s0 + $0x338] sm:$0xff]  ;;  %v443_v39 = vmul.f32 %v251_v32, %v123_v28  ;;  %v445_v40 = vmul.f32 %v253_v33, %v125_v29 }
  0xac   :  { %v448_v41 = vmul.f32 %v256_v37, %v128_v34  ;;  %v450_v42 = vmul.f32 %v258_v38, %v130_v36 }
  0xb1   :  { %904 = vmatmul.mubr.bf16.gmra.mrb[68].mxu0 %v509_v59  ;;  %v517_v59 = vpack.c.bf16 %v433_v56, %v431_v55 }
  0xb2   :  { %1477 = vmatmul.mubr.bf16.gmra.mrb[68].mxu1 %v317_v62  ;;  %2363 = vmatprep.mubr.msk.bf16.mxu0 %vm634_vm0, %v512_v63  ;;  %v325_v62 = vpack.c.bf16 %v113_v45, %v111_v44  ;;  %v520_v63 = vpack.c.bf16 %v438_v58, %v436_v57  ;;  %v127_v44 = vld [vmem:[%s5373_s0 + $0x320] sm:$0xff]  ;;  %v129_v45 = vld [vmem:[%s5373_s0 + $0x330] sm:$0xff] }
  0xb3   :  { %2405 = vmatprep.mubr.msk.bf16.mxu1 %vm634_vm0, %v320_v3  ;;  %v328_v3 = vpack.c.bf16 %v118_v52, %v116_v50  ;;  %v132_v50 = vld [vmem:[%s5373_s0 + $0x348] sm:$0xff]  ;;  %v134_v52 = vld [vmem:[%s5373_s0 + $0x358] sm:$0xff]  ;;  %v447_v55 = vmul.f32 %v255_v48, %v127_v44  ;;  %v449_v56 = vmul.f32 %v257_v49, %v129_v45 }
  0xb4   :  { %v452_v57 = vmul.f32 %v260_v53, %v132_v50  ;;  %v454_v58 = vmul.f32 %v262_v54, %v134_v52  ;;  %v146_v48 = vld [vmem:[%s5373_s0 + $0x3b8] sm:$0xff]  ;;  %v272_v49 = vld [vmem:[%s5374_s1 + $0x3a8] sm:$0xff] }
  0xb9   :  { %912 = vmatmul.mubr.bf16.gmra.mrb[72].mxu0 %v511_v11  ;;  %v519_v11 = vpack.c.bf16 %v437_v8, %v435_v7 }
  0xba   :  { %1485 = vmatmul.mubr.bf16.gmra.mrb[72].mxu1 %v319_v14  ;;  %2364 = vmatprep.mubr.msk.bf16.mxu0 %vm634_vm0, %v514_v15  ;;  %v327_v14 = vpack.c.bf16 %v117_v61, %v115_v60  ;;  %v522_v15 = vpack.c.bf16 %v442_v10, %v440_v9  ;;  %v131_v60 = vld [vmem:[%s5373_s0 + $0x340] sm:$0xff]  ;;  %v133_v61 = vld [vmem:[%s5373_s0 + $0x350] sm:$0xff] }
  0xbb   :  { %2406 = vmatprep.mubr.msk.bf16.mxu1 %vm634_vm0, %v322_v19  ;;  %v330_v19 = vpack.c.bf16 %v122_v4, %v120_v2  ;;  %v136_v2 = vld [vmem:[%s5373_s0 + $0x368] sm:$0xff]  ;;  %v138_v4 = vld [vmem:[%s5373_s0 + $0x378] sm:$0xff]  ;;  %v451_v7 = vmul.f32 %v259_v0, %v131_v60  ;;  %v453_v8 = vmul.f32 %v261_v1, %v133_v61  ;;  %v143_v0 = vld [vmem:[%s5373_s0 + $0x3a0] sm:$0xff] }
  0xbc   :  { %v456_v9 = vmul.f32 %v264_v5, %v136_v2  ;;  %v458_v10 = vmul.f32 %v266_v6, %v138_v4  ;;  %v145_v1 = vld [vmem:[%s5373_s0 + $0x3b0] sm:$0xff]  ;;  %v271_v6 = vld [vmem:[%s5374_s1 + $0x3a0] sm:$0xff] }
  0xc1   :  { %920 = vmatmul.mubr.bf16.gmra.mrb[76].mxu0 %v513_v27  ;;  %v521_v27 = vpack.c.bf16 %v441_v24, %v439_v23 }
  0xc2   :  { %1493 = vmatmul.mubr.bf16.gmra.mrb[76].mxu1 %v321_v30  ;;  %2365 = vmatprep.mubr.msk.bf16.mxu0 %vm634_vm0, %v516_v31  ;;  %v329_v30 = vpack.c.bf16 %v121_v13, %v119_v12  ;;  %v524_v31 = vpack.c.bf16 %v446_v26, %v444_v25  ;;  %v135_v12 = vld [vmem:[%s5373_s0 + $0x360] sm:$0xff]  ;;  %v137_v13 = vld [vmem:[%s5373_s0 + $0x370] sm:$0xff] }
  0xc3   :  { %2407 = vmatprep.mubr.msk.bf16.mxu1 %vm634_vm0, %v324_v35  ;;  %v332_v35 = vpack.c.bf16 %v126_v20, %v124_v18  ;;  %v140_v18 = vld [vmem:[%s5373_s0 + $0x388] sm:$0xff]  ;;  %v142_v20 = vld [vmem:[%s5373_s0 + $0x398] sm:$0xff]  ;;  %v455_v23 = vmul.f32 %v263_v16, %v135_v12  ;;  %v457_v24 = vmul.f32 %v265_v17, %v137_v13  ;;  %v1024_v25 = vld [vmem:[%s5375_s4] sm:$0xff]  ;;  %v337_v38 = vpack.c.bf16 %v137_v13, %v135_v12 }
  0xc4   :  { %v460_v26 = vmul.f32 %v268_v21, %v140_v18  ;;  %v278_v16 = vld [vmem:[%s5374_s1 + $0x3d8] sm:$0xff]  ;;  %v1028_v21 = vld [vmem:[%s5375_s4 + $0x20] sm:$0xff] }
  0xc5   :  { %v529_v33 = vpack.c.bf16 %v457_v24, %v455_v23 }
  0xc9   :  { %928 = vmatmul.mubr.bf16.gmra.mrb[80].mxu0 %v515_v43  ;;  %v523_v43 = vpack.c.bf16 %v445_v40, %v443_v39  ;;  %v267_v40 = vld [vmem:[%s5374_s1 + $0x380] sm:$0xff] }
  0xca   :  { %1501 = vmatmul.mubr.bf16.gmra.mrb[80].mxu1 %v323_v46  ;;  %2366 = vmatprep.mubr.msk.bf16.mxu0 %vm634_vm0, %v518_v47  ;;  %v331_v46 = vpack.c.bf16 %v125_v29, %v123_v28  ;;  %v526_v47 = vpack.c.bf16 %v450_v42, %v448_v41  ;;  %v1025_v29 = vld [vmem:[%s5375_s4 + $0x8] sm:$0xff]  ;;  %v269_v41 = vld [vmem:[%s5374_s1 + $0x390] sm:$0xff] }
  0xcb   :  { %2408 = vmatprep.mubr.msk.bf16.mxu1 %vm634_vm0, %v326_v51  ;;  %v334_v51 = vpack.c.bf16 %v130_v36, %v128_v34  ;;  %v139_v34 = vld [vmem:[%s5373_s0 + $0x380] sm:$0xff]  ;;  %v144_v42 = vld [vmem:[%s5373_s0 + $0x3a8] sm:$0xff] }
  0xcc   :  { %v459_v53 = vmul.f32 %v267_v40, %v139_v34  ;;  %v342_v13 = vpack.c.bf16 %v146_v48, %v144_v42 }
  0xd1   :  { %936 = vmatmul.mubr.bf16.gmra.mrb[84].mxu0 %v517_v59  ;;  %v525_v59 = vpack.c.bf16 %v449_v56, %v447_v55  ;;  %v1026_v55 = vld [vmem:[%s5375_s4 + $0x10] sm:$0xff]  ;;  %v464_v56 = vmul.f32 %v272_v49, %v144_v42 }
  0xd2   :  { %1509 = vmatmul.mubr.bf16.gmra.mrb[84].mxu1 %v325_v62  ;;  %2367 = vmatprep.mubr.msk.bf16.mxu0 %vm634_vm0, %v520_v63  ;;  %v333_v62 = vpack.c.bf16 %v129_v45, %v127_v44  ;;  %v528_v63 = vpack.c.bf16 %v454_v58, %v452_v57 }
  0xd3   :  { %2409 = vmatprep.mubr.msk.bf16.mxu1 %vm634_vm0, %v328_v3  ;;  %v336_v3 = vpack.c.bf16 %v134_v52, %v132_v50  ;;  %v274_v50 = vld [vmem:[%s5374_s1 + $0x3b8] sm:$0xff] }
  0xd4   :  { %v466_v57 = vmul.f32 %v274_v50, %v146_v48 }
  0xd6   :  { %v534_v5 = vpack.c.bf16 %v466_v57, %v464_v56  ;;  %v1031_v57 = vld [vmem:[%s5375_s4 + $0x38] sm:$0xff] }
  0xd9   :  { %944 = vmatmul.mubr.bf16.gmra.mrb[88].mxu0 %v519_v11  ;;  %v527_v11 = vpack.c.bf16 %v453_v8, %v451_v7  ;;  %v273_v7 = vld [vmem:[%s5374_s1 + $0x3b0] sm:$0xff]  ;;  %v148_v8 = vld [vmem:[%s5373_s0 + $0x3c8] sm:$0xff] }
  0xda   :  { %1517 = vmatmul.mubr.bf16.gmra.mrb[88].mxu1 %v327_v14  ;;  %2368 = vmatprep.mubr.msk.bf16.mxu0 %vm634_vm0, %v522_v15  ;;  %v335_v14 = vpack.c.bf16 %v133_v61, %v131_v60  ;;  %v530_v15 = vpack.c.bf16 %v458_v10, %v456_v9 }
  0xdb   :  { %2410 = vmatprep.mubr.msk.bf16.mxu1 %vm634_vm0, %v330_v19  ;;  %v338_v19 = vpack.c.bf16 %v138_v4, %v136_v2 }
  0xe1   :  { %952 = vmatmul.mubr.bf16.gmra.mrb[92].mxu0 %v521_v27  ;;  %v462_v27 = vmul.f32 %v270_v22, %v142_v20 }
  0xe2   :  { %1525 = vmatmul.mubr.bf16.gmra.mrb[92].mxu1 %v329_v30  ;;  %2369 = vmatprep.mubr.msk.bf16.mxu0 %vm634_vm0, %v524_v31 }
  0xe3   :  { %2411 = vmatprep.mubr.msk.bf16.mxu1 %vm634_vm0, %v332_v35  ;;  %v141_v35 = vld [vmem:[%s5373_s0 + $0x390] sm:$0xff]  ;;  %v532_v39 = vpack.c.bf16 %v462_v27, %v460_v26 }
  0xe4   :  { %v461_v54 = vmul.f32 %v269_v41, %v141_v35  ;;  %v339_v4 = vpack.c.bf16 %v141_v35, %v139_v34  ;;  %v341_v34 = vpack.c.bf16 %v145_v1, %v143_v0 }
  0xe9   :  { %960 = vmatmul.mubr.bf16.gmra.mrb[96].mxu0 %v523_v43 }
  0xea   :  { %1533 = vmatmul.mubr.bf16.gmra.mrb[96].mxu1 %v331_v46  ;;  %2370 = vmatprep.mubr.msk.bf16.mxu0 %vm634_vm0, %v526_v47  ;;  %v340_v47 = vpack.c.bf16 %v142_v20, %v140_v18  ;;  %v465_v20 = vmul.f32 %v273_v7, %v145_v1 }
  0xeb   :  { %2412 = vmatprep.mubr.msk.bf16.mxu1 %vm634_vm0, %v334_v51 }
  0xf1   :  { %968 = vmatmul.mubr.bf16.gmra.mrb[100].mxu0 %v525_v59  ;;  %v1027_v59 = vld [vmem:[%s5375_s4 + $0x18] sm:$0xff] }
  0xf2   :  { %1541 = vmatmul.mubr.bf16.gmra.mrb[100].mxu1 %v333_v62  ;;  %2371 = vmatprep.mubr.msk.bf16.mxu0 %vm634_vm0, %v528_v63  ;;  %v531_v63 = vpack.c.bf16 %v461_v54, %v459_v53  ;;  %v1030_v53 = vld [vmem:[%s5375_s4 + $0x30] sm:$0xff] }
  0xf3   :  { %2413 = vmatprep.mubr.msk.bf16.mxu1 %vm634_vm0, %v336_v3 }
  0xf9   :  { %976 = vmatmul.mubr.bf16.gmra.mrb[104].mxu0 %v527_v11 }
  0xfa   :  { %1549 = vmatmul.mubr.bf16.gmra.mrb[104].mxu1 %v335_v14  ;;  %2372 = vmatprep.mubr.msk.bf16.mxu0 %vm634_vm0, %v530_v15  ;;  %v150_v14 = vld [vmem:[%s5373_s0 + $0x3d8] sm:$0xff]  ;;  %v276_v15 = vld [vmem:[%s5374_s1 + $0x3c8] sm:$0xff] }
  0xfb   :  { %2414 = vmatprep.mubr.msk.bf16.mxu1 %vm634_vm0, %v338_v19  ;;  %v463_v19 = vmul.f32 %v271_v6, %v143_v0  ;;  %v468_v22 = vmul.f32 %v276_v15, %v148_v8  ;;  %v470_v23 = vmul.f32 %v278_v16, %v150_v14  ;;  %v1032_v16 = vld [vmem:[%s5375_s4 + $0x40] sm:$0xff] }
  0xfc   :  { %v769_v28 = vpop.f32.mrb[0].mxu0 }
  0xfd   :  { %v1088_v30 = vmul.f32 %v1024_v25, %v769_v28  ;;  %v1342_v31 = vpop.f32.mrb[0].mxu1  ;;  %v771_v32 = vpop.f32.mrb[1].mxu0  ;;  %v1029_v25 = vld [vmem:[%s5375_s4 + $0x28] sm:$0xff]  ;;  %v536_v35 = vpack.c.bf16 %v470_v23, %v468_v22 }
  0xfe   :  { %v1344_v36 = vpop.f32.mrb[1].mxu1  ;;  %v772_v37 = vpop.f32.mrb[2].mxu0 }
  0xff   :  { %v3326_v43 = vadd.f32 %v1342_v31, %v1088_v30  ;;  %v1089_v44 = vmul.f32 %v1025_v29, %v772_v37  ;;  %v1345_v45 = vpop.f32.mrb[2].mxu1  ;;  %v774_v46 = vpop.f32.mrb[3].mxu0  ;;  %v533_v29 = vpack.c.bf16 %v465_v20, %v463_v19  ;;  %v147_v30 = vld [vmem:[%s5373_s0 + $0x3c0] sm:$0xff]  ;;  %v149_v31 = vld [vmem:[%s5373_s0 + $0x3d0] sm:$0xff]  ;;  %v1033_v19 = vld [vmem:[%s5375_s4 + $0x48] sm:$0xff] }
 0x100   :  { %v1347_v51 = vpop.f32.mrb[3].mxu1  ;;  %v275_v36 = vld [vmem:[%s5374_s1 + $0x3c0] sm:$0xff]  ;;  %v277_v37 = vld [vmem:[%s5374_s1 + $0x3d0] sm:$0xff]  ;;  %v280_v46 = vld [vmem:[%s5374_s1 + $0x3e8] sm:$0xff]  ;;  %v343_v1 = vpack.c.bf16 %v149_v31, %v147_v30 }
 0x101   :  { %v3337_v52 = vadd.f32 %v1345_v45, %v1089_v44  ;;  %984 = vmatmul.mubr.bf16.gmra.mrb[108].mxu0 %v529_v33  ;;  %v344_v44 = vpack.c.bf16 %v150_v14, %v148_v8  ;;  %v154_v45 = vld [vmem:[%s5373_s0 + $0x3f8] sm:$0xff]  ;;  %v467_v50 = vmul.f32 %v275_v36, %v147_v30  ;;  %v469_v51 = vmul.f32 %v277_v37, %v149_v31 }
 0x102   :  { %1557 = vmatmul.mubr.bf16.gmra.mrb[108].mxu1 %v337_v38  ;;  %2373 = vmatprep.mubr.msk.bf16.mxu0 %vm634_vm0, %v532_v39  ;;  %v152_v38 = vld [vmem:[%s5373_s0 + $0x3e8] sm:$0xff] }
 0x103   :  { %2415 = vmatprep.mubr.msk.bf16.mxu1 %vm634_vm0, %v340_v47  ;;  %v282_v47 = vld [vmem:[%s5374_s1 + $0x3f8] sm:$0xff]  ;;  %v472_v54 = vmul.f32 %v280_v46, %v152_v38 }
 0x104   :  { %v777_v58 = vpop.f32.mrb[4].mxu0 }
 0x105   :  { %v1090_v60 = vmul.f32 %v1026_v55, %v777_v58  ;;  %v1350_v61 = vpop.f32.mrb[4].mxu1  ;;  %v779_v62 = vpop.f32.mrb[5].mxu0  ;;  %v474_v55 = vmul.f32 %v282_v47, %v154_v45 }
 0x106   :  { %v1352_v2 = vpop.f32.mrb[5].mxu1  ;;  %v780_v3 = vpop.f32.mrb[6].mxu0  ;;  %v151_v62 = vld [vmem:[%s5373_s0 + $0x3e0] sm:$0xff] }
 0x107   :  { %v3362_v9 = vadd.f32 %v1350_v61, %v1090_v60  ;;  %v1091_v10 = vmul.f32 %v1027_v59, %v780_v3  ;;  %v1353_v11 = vpop.f32.mrb[6].mxu1  ;;  %v782_v12 = vpop.f32.mrb[7].mxu0  ;;  %v535_v61 = vpack.c.bf16 %v469_v51, %v467_v50  ;;  %v538_v2 = vpack.c.bf16 %v474_v55, %v472_v54  ;;  %v153_v3 = vld [vmem:[%s5373_s0 + $0x3f0] sm:$0xff]  ;;  %v1036_v50 = vld [vmem:[%s5375_s4 + $0x60] sm:$0xff] }
 0x108   :  { %v1355_v17 = vpop.f32.mrb[7].mxu1 }
 0x109   :  { %v3373_v18 = vadd.f32 %v1353_v11, %v1091_v10  ;;  %992 = vmatmul.mubr.bf16.gmra.mrb[112].mxu0 %v531_v63  ;;  %v346_v11 = vpack.c.bf16 %v154_v45, %v152_v38 }
 0x10a   :  { %1565 = vmatmul.mubr.bf16.gmra.mrb[112].mxu1 %v339_v4  ;;  %2374 = vmatprep.mubr.msk.bf16.mxu0 %vm634_vm0, %v534_v5  ;;  %v279_v4 = vld [vmem:[%s5374_s1 + $0x3e0] sm:$0xff]  ;;  %v281_v5 = vld [vmem:[%s5374_s1 + $0x3f0] sm:$0xff] }
 0x10b   :  { %2416 = vmatprep.mubr.msk.bf16.mxu1 %vm634_vm0, %v342_v13  ;;  %v471_v14 = vmul.f32 %v279_v4, %v151_v62  ;;  %v473_v15 = vmul.f32 %v281_v5, %v153_v3 }
 0x10c   :  { %v785_v24 = vpop.f32.mrb[8].mxu0 }
 0x10d   :  { %v1092_v26 = vmul.f32 %v1028_v21, %v785_v24  ;;  %v1358_v27 = vpop.f32.mrb[8].mxu1  ;;  %v787_v28 = vpop.f32.mrb[9].mxu0  ;;  %v537_v23 = vpack.c.bf16 %v473_v15, %v471_v14 }
 0x10e   :  { %v1360_v32 = vpop.f32.mrb[9].mxu1  ;;  %v788_v33 = vpop.f32.mrb[10].mxu0 }
 0x10f   :  { %v3398_v39 = vadd.f32 %v1358_v27, %v1092_v26  ;;  %v1093_v40 = vmul.f32 %v1029_v25, %v788_v33  ;;  %v1361_v41 = vpop.f32.mrb[10].mxu1  ;;  %v790_v42 = vpop.f32.mrb[11].mxu0  ;;  %v345_v26 = vpack.c.bf16 %v153_v3, %v151_v62  ;;  %v1034_v33 = vld [vmem:[%s5375_s4 + $0x50] sm:$0xff]  ;;  %v1039_v3 = vld [vmem:[%s5375_s4 + $0x78] sm:$0xff] }
 0x110   :  { %v1363_v48 = vpop.f32.mrb[11].mxu1 }
 0x111   :  { %v3409_v49 = vadd.f32 %v1361_v41, %v1093_v40  ;;  %1000 = vmatmul.mubr.bf16.gmra.mrb[116].mxu0 %v533_v29 }
 0x112   :  { %1573 = vmatmul.mubr.bf16.gmra.mrb[116].mxu1 %v341_v34  ;;  %2375 = vmatprep.mubr.msk.bf16.mxu0 %vm634_vm0, %v536_v35  ;;  %v1035_v35 = vld [vmem:[%s5375_s4 + $0x58] sm:$0xff] }
 0x113   :  { %2417 = vmatprep.mubr.msk.bf16.mxu1 %vm634_vm0, %v344_v44 }
 0x114   :  { %v793_v56 = vpop.f32.mrb[12].mxu0 }
 0x115   :  { %v1094_v58 = vmul.f32 %v1030_v53, %v793_v56  ;;  %v1366_v59 = vpop.f32.mrb[12].mxu1  ;;  %v795_v60 = vpop.f32.mrb[13].mxu0  ;;  %v1037_v53 = vld [vmem:[%s5375_s4 + $0x68] sm:$0xff] }
 0x116   :  { %v1368_v63 = vpop.f32.mrb[13].mxu1  ;;  %v796_v0 = vpop.f32.mrb[14].mxu0 }
 0x117   :  { %v3431_v6 = vadd.f32 %v1366_v59, %v1094_v58  ;;  %v1095_v7 = vmul.f32 %v1031_v57, %v796_v0  ;;  %v1369_v8 = vpop.f32.mrb[14].mxu1  ;;  %v798_v10 = vpop.f32.mrb[15].mxu0 }
 0x118   :  { %v1371_v12 = vpop.f32.mrb[15].mxu1 }
 0x119   :  { %v3433_v13 = vadd.f32 %v1369_v8, %v1095_v7  ;;  %1008 = vmatmul.mubr.bf16.gmra.mrb[120].mxu0 %v535_v61 }
 0x11a   :  { %1581 = vmatmul.mubr.bf16.gmra.mrb[120].mxu1 %v343_v1  ;;  %2376 = vmatprep.mubr.msk.bf16.mxu0 %vm634_vm0, %v538_v2  ;;  %v1038_v1 = vld [vmem:[%s5375_s4 + $0x70] sm:$0xff] }
 0x11b   :  { %2418 = vmatprep.mubr.msk.bf16.mxu1 %vm634_vm0, %v346_v11 }
 0x11c   :  { %v801_v17 = vpop.f32.mrb[16].mxu0 }
 0x11d   :  { %v1096_v20 = vmul.f32 %v1032_v16, %v801_v17  ;;  %v1374_v21 = vpop.f32.mrb[16].mxu1  ;;  %v803_v22 = vpop.f32.mrb[17].mxu0  ;;  %v1599_v17 = vsel %vm1597_vm2, %v3337_v52, 0.0 }
 0x11e   :  { %v1376_v24 = vpop.f32.mrb[17].mxu1  ;;  %v804_v25 = vpop.f32.mrb[18].mxu0  ;;  %v1601_v22 = vsel %vm1597_vm2, %v3362_v9, 0.0 }
 0x11f   :  { %v3443_v27 = vadd.f32 %v1374_v21, %v1096_v20  ;;  %v1097_v28 = vmul.f32 %v1033_v19, %v804_v25  ;;  %v1377_v29 = vpop.f32.mrb[18].mxu1  ;;  %v806_v30 = vpop.f32.mrb[19].mxu0  ;;  %v1040_v20 = vld [vmem:[%s5375_s4 + $0x80] sm:$0xff]  ;;  %v1598_v21 = vsel %vm1597_vm2, %v3326_v43, 0.0  ;;  %v1041_v25 = vld [vmem:[%s5375_s4 + $0x88] sm:$0xff] }
 0x120   :  { %v1379_v31 = vpop.f32.mrb[19].mxu1 }
 0x121   :  { %v3445_v32 = vadd.f32 %v1377_v29, %v1097_v28  ;;  %1016 = vmatmul.mubr.bf16.gmra.mrb[124].mxu0 %v537_v23  ;;  %v1600_v23 = vadd.f32 %v1599_v17, %v1598_v21 }
 0x122   :  { %1589 = vmatmul.mubr.bf16.gmra.mrb[124].mxu1 %v345_v26 }
 0x123   :  { %v1602_v30 = vadd.f32 %v1601_v22, %v1600_v23 }
 0x124   :  { %v809_v34 = vpop.f32.mrb[20].mxu0 }
 0x125   :  { %v1098_v36 = vmul.f32 %v1034_v33, %v809_v34  ;;  %v1382_v37 = vpop.f32.mrb[20].mxu1  ;;  %v811_v38 = vpop.f32.mrb[21].mxu0  ;;  %v1603_v34 = vsel %vm1597_vm2, %v3373_v18, 0.0 }
 0x126   :  { %v1384_v40 = vpop.f32.mrb[21].mxu1  ;;  %v812_v41 = vpop.f32.mrb[22].mxu0 }
 0x127   :  { %v3453_v42 = vadd.f32 %v1382_v37, %v1098_v36  ;;  %v1099_v44 = vmul.f32 %v1035_v35, %v812_v41  ;;  %v1385_v45 = vpop.f32.mrb[22].mxu1  ;;  %v814_v46 = vpop.f32.mrb[23].mxu0  ;;  %v1605_v41 = vsel %vm1597_vm2, %v3398_v39, 0.0 }
 0x128   :  { %v1387_v47 = vpop.f32.mrb[23].mxu1  ;;  %v1042_v46 = vld [vmem:[%s5375_s4 + $0x90] sm:$0xff] }
 0x129   :  { %v3455_v48 = vadd.f32 %v1385_v45, %v1099_v44  ;;  %v1604_v45 = vadd.f32 %v1603_v34, %v1602_v30  ;;  %v1615_v30 = vsel %vm1597_vm2, %v3445_v32, 0.0  ;;  %v1617_v34 = vsel %vm1597_vm2, %v3453_v42, 0.0 }
 0x12b   :  { %v1606_v47 = vadd.f32 %v1605_v41, %v1604_v45 }
 0x12c   :  { %v817_v51 = vpop.f32.mrb[24].mxu0 }
 0x12d   :  { %v1100_v54 = vmul.f32 %v1036_v50, %v817_v51  ;;  %v1390_v55 = vpop.f32.mrb[24].mxu1  ;;  %v819_v56 = vpop.f32.mrb[25].mxu0  ;;  %v1043_v51 = vld [vmem:[%s5375_s4 + $0x98] sm:$0xff] }
 0x12e   :  { %v1392_v57 = vpop.f32.mrb[25].mxu1  ;;  %v820_v58 = vpop.f32.mrb[26].mxu0 }
 0x12f   :  { %v3463_v59 = vadd.f32 %v1390_v55, %v1100_v54  ;;  %v1101_v60 = vmul.f32 %v1037_v53, %v820_v58  ;;  %v1393_v61 = vpop.f32.mrb[26].mxu1  ;;  %v822_v62 = vpop.f32.mrb[27].mxu0  ;;  %v1607_v53 = vsel %vm1597_vm2, %v3409_v49, 0.0 }
 0x130   :  { %v1395_v63 = vpop.f32.mrb[27].mxu1 }
 0x131   :  { %v3465_v0 = vadd.f32 %v1393_v61, %v1101_v60  ;;  %v1609_v60 = vsel %vm1597_vm2, %v3431_v6, 0.0 }
 0x134   :  { %v825_v2 = vpop.f32.mrb[28].mxu0 }
 0x135   :  { %v1102_v4 = vmul.f32 %v1038_v1, %v825_v2  ;;  %v1398_v5 = vpop.f32.mrb[28].mxu1  ;;  %v827_v7 = vpop.f32.mrb[29].mxu0  ;;  %v1608_v2 = vadd.f32 %v1607_v53, %v1606_v47 }
 0x136   :  { %v1400_v8 = vpop.f32.mrb[29].mxu1  ;;  %v828_v10 = vpop.f32.mrb[30].mxu0  ;;  %v1044_v7 = vld [vmem:[%s5375_s4 + $0xa0] sm:$0xff] }
 0x137   :  { %v3473_v11 = vadd.f32 %v1398_v5, %v1102_v4  ;;  %v1103_v12 = vmul.f32 %v1039_v3, %v828_v10  ;;  %v1401_v14 = vpop.f32.mrb[30].mxu1  ;;  %v830_v15 = vpop.f32.mrb[31].mxu0  ;;  %v1610_v5 = vadd.f32 %v1609_v60, %v1608_v2  ;;  %v1611_v8 = vsel %vm1597_vm2, %v3433_v13, 0.0 }
 0x138   :  { %v1403_v16 = vpop.f32.mrb[31].mxu1 }
 0x139   :  { %v3477_v19 = vadd.f32 %v1401_v14, %v1103_v12  ;;  %v1045_v12 = vld [vmem:[%s5375_s4 + $0xa8] sm:$0xff]  ;;  %v1613_v14 = vsel %vm1597_vm2, %v3443_v27, 0.0 }
 0x13c   :  { %v833_v24 = vpop.f32.mrb[32].mxu0 }
 0x13d   :  { %v1104_v26 = vmul.f32 %v1040_v20, %v833_v24  ;;  %v1406_v28 = vpop.f32.mrb[32].mxu1  ;;  %v835_v29 = vpop.f32.mrb[33].mxu0  ;;  %v1612_v20 = vadd.f32 %v1611_v8, %v1610_v5  ;;  %v1623_v5 = vsel %vm1597_vm2, %v3465_v0, 0.0 }
 0x13e   :  { %v1408_v31 = vpop.f32.mrb[33].mxu1  ;;  %v836_v33 = vpop.f32.mrb[34].mxu0 }
 0x13f   :  { %v3491_v35 = vadd.f32 %v1406_v28, %v1104_v26  ;;  %v1105_v36 = vmul.f32 %v1041_v25, %v836_v33  ;;  %v1409_v37 = vpop.f32.mrb[34].mxu1  ;;  %v838_v38 = vpop.f32.mrb[35].mxu0  ;;  %v1614_v28 = vadd.f32 %v1613_v14, %v1612_v20  ;;  %v1046_v33 = vld [vmem:[%s5375_s4 + $0xb0] sm:$0xff] }
 0x140   :  { %v1411_v40 = vpop.f32.mrb[35].mxu1  ;;  %v1047_v38 = vld [vmem:[%s5375_s4 + $0xb8] sm:$0xff] }
 0x141   :  { %v3495_v44 = vadd.f32 %v1409_v37, %v1105_v36  ;;  %v1616_v36 = vadd.f32 %v1615_v30, %v1614_v28  ;;  %v1050_v28 = vld [vmem:[%s5375_s4 + $0xd0] sm:$0xff] }
 0x144   :  { %v841_v50 = vpop.f32.mrb[36].mxu0 }
 0x145   :  { %v1106_v54 = vmul.f32 %v1042_v46, %v841_v50  ;;  %v1414_v55 = vpop.f32.mrb[36].mxu1  ;;  %v843_v56 = vpop.f32.mrb[37].mxu0  ;;  %v1618_v46 = vadd.f32 %v1617_v34, %v1616_v36  ;;  %v1629_v34 = vsel %vm1597_vm2, %v3491_v35, 0.0 }
 0x146   :  { %v1416_v57 = vpop.f32.mrb[37].mxu1  ;;  %v844_v58 = vpop.f32.mrb[38].mxu0 }
 0x147   :  { %v3507_v61 = vadd.f32 %v1414_v55, %v1106_v54  ;;  %v1107_v62 = vmul.f32 %v1043_v51, %v844_v58  ;;  %v1417_v63 = vpop.f32.mrb[38].mxu1  ;;  %v846_v1 = vpop.f32.mrb[39].mxu0  ;;  %v1619_v51 = vsel %vm1597_vm2, %v3455_v48, 0.0  ;;  %v1621_v58 = vsel %vm1597_vm2, %v3463_v59, 0.0 }
 0x148   :  { %v1419_v3 = vpop.f32.mrb[39].mxu1 }
 0x149   :  { %v3509_v4 = vadd.f32 %v1417_v63, %v1107_v62  ;;  %v1620_v62 = vadd.f32 %v1619_v51, %v1618_v46  ;;  %v1048_v63 = vld [vmem:[%s5375_s4 + $0xc0] sm:$0xff]  ;;  %v1049_v3 = vld [vmem:[%s5375_s4 + $0xc8] sm:$0xff] }
 0x14b   :  { %v1622_v1 = vadd.f32 %v1621_v58, %v1620_v62  ;;  %v1052_v58 = vld [vmem:[%s5375_s4 + $0xe0] sm:$0xff]  ;;  %v1633_v62 = vsel %vm1597_vm2, %v3507_v61, 0.0 }
 0x14c   :  { %v849_v10 = vpop.f32.mrb[40].mxu0 }
 0x14d   :  { %v1108_v15 = vmul.f32 %v1044_v7, %v849_v10  ;;  %v1422_v16 = vpop.f32.mrb[40].mxu1  ;;  %v851_v17 = vpop.f32.mrb[41].mxu0 }
 0x14e   :  { %v1424_v21 = vpop.f32.mrb[41].mxu1  ;;  %v852_v22 = vpop.f32.mrb[42].mxu0 }
 0x14f   :  { %v3521_v23 = vadd.f32 %v1422_v16, %v1108_v15  ;;  %v1109_v24 = vmul.f32 %v1045_v12, %v852_v22  ;;  %v1425_v25 = vpop.f32.mrb[42].mxu1  ;;  %v854_v26 = vpop.f32.mrb[43].mxu0  ;;  %v1625_v15 = vsel %vm1597_vm2, %v3473_v11, 0.0  ;;  %v1624_v22 = vadd.f32 %v1623_v5, %v1622_v1 }
 0x150   :  { %v1427_v29 = vpop.f32.mrb[43].mxu1 }
 0x151   :  { %v3525_v31 = vadd.f32 %v1425_v25, %v1109_v24  ;;  %v1626_v26 = vadd.f32 %v1625_v15, %v1624_v22  ;;  %v1627_v29 = vsel %vm1597_vm2, %v3477_v19, 0.0 }
 0x154   :  { %v857_v37 = vpop.f32.mrb[44].mxu0 }
 0x155   :  { %v1110_v40 = vmul.f32 %v1046_v33, %v857_v37  ;;  %v1430_v41 = vpop.f32.mrb[44].mxu1  ;;  %v859_v45 = vpop.f32.mrb[45].mxu0  ;;  %v1051_v33 = vld [vmem:[%s5375_s4 + $0xd8] sm:$0xff] }
 0x156   :  { %v1432_v47 = vpop.f32.mrb[45].mxu1  ;;  %v860_v50 = vpop.f32.mrb[46].mxu0 }
 0x157   :  { %v3537_v53 = vadd.f32 %v1430_v41, %v1110_v40  ;;  %v1111_v54 = vmul.f32 %v1047_v38, %v860_v50  ;;  %v1433_v55 = vpop.f32.mrb[46].mxu1  ;;  %v862_v56 = vpop.f32.mrb[47].mxu0  ;;  %v1628_v40 = vadd.f32 %v1627_v29, %v1626_v26  ;;  %v1054_v29 = vld [vmem:[%s5375_s4 + $0xf0] sm:$0xff] }
 0x158   :  { %v1435_v57 = vpop.f32.mrb[47].mxu1  ;;  %v1631_v56 = vsel %vm1597_vm2, %v3495_v44, 0.0 }
 0x159   :  { %v3541_v60 = vadd.f32 %v1433_v55, %v1111_v54  ;;  %v1630_v54 = vadd.f32 %v1629_v34, %v1628_v40  ;;  %v1055_v34 = vld [vmem:[%s5375_s4 + $0xf8] sm:$0xff] }
 0x15c   :  { %v865_v2 = vpop.f32.mrb[48].mxu0 }
 0x15d   :  { %v1112_v7 = vmul.f32 %v1048_v63, %v865_v2  ;;  %v1438_v8 = vpop.f32.mrb[48].mxu1  ;;  %v867_v10 = vpop.f32.mrb[49].mxu0  ;;  %v1632_v63 = vadd.f32 %v1631_v56, %v1630_v54  ;;  %v1053_v2 = vld [vmem:[%s5375_s4 + $0xe8] sm:$0xff] }
 0x15e   :  { %v1440_v12 = vpop.f32.mrb[49].mxu1  ;;  %v868_v14 = vpop.f32.mrb[50].mxu0 }
 0x15f   :  { %v3553_v16 = vadd.f32 %v1438_v8, %v1112_v7  ;;  %v1113_v17 = vmul.f32 %v1049_v3, %v868_v14  ;;  %v1441_v20 = vpop.f32.mrb[50].mxu1  ;;  %v870_v21 = vpop.f32.mrb[51].mxu0  ;;  %v1634_v8 = vadd.f32 %v1633_v62, %v1632_v63  ;;  %v1635_v14 = vsel %vm1597_vm2, %v3509_v4, 0.0 }
 0x160   :  { %v1443_v24 = vpop.f32.mrb[51].mxu1 }
 0x161   :  { %v3555_v25 = vadd.f32 %v1441_v20, %v1113_v17  ;;  %v1637_v24 = vsel %vm1597_vm2, %v3521_v23, 0.0 }
 0x164   :  { %v873_v30 = vpop.f32.mrb[52].mxu0 }
 0x165   :  { %v1114_v36 = vmul.f32 %v1050_v28, %v873_v30  ;;  %v1446_v37 = vpop.f32.mrb[52].mxu1  ;;  %v875_v38 = vpop.f32.mrb[53].mxu0  ;;  %v1636_v28 = vadd.f32 %v1635_v14, %v1634_v8 }
 0x166   :  { %v1448_v41 = vpop.f32.mrb[53].mxu1  ;;  %v876_v45 = vpop.f32.mrb[54].mxu0 }
 0x167   :  { %v3567_v46 = vadd.f32 %v1446_v37, %v1114_v36  ;;  %v1115_v47 = vmul.f32 %v1051_v33, %v876_v45  ;;  %v1449_v50 = vpop.f32.mrb[54].mxu1  ;;  %v878_v51 = vpop.f32.mrb[55].mxu0  ;;  %v1638_v30 = vadd.f32 %v1637_v24, %v1636_v28  ;;  %v1639_v36 = vsel %vm1597_vm2, %v3525_v31, 0.0 }
 0x168   :  { %v1451_v55 = vpop.f32.mrb[55].mxu1 }
 0x169   :  { %v3571_v57 = vadd.f32 %v1449_v50, %v1115_v47  ;;  %v1641_v47 = vsel %vm1597_vm2, %v3537_v53, 0.0  ;;  %v1640_v56 = vadd.f32 %v1639_v36, %v1638_v30  ;;  %v1058_v36 = vld [vmem:[%s5375_s4 + $0x110] sm:$0xff] }
 0x16b   :  { %v1642_v63 = vadd.f32 %v1641_v47, %v1640_v56 }
 0x16c   :  { %v881_v1 = vpop.f32.mrb[56].mxu0 }
 0x16d   :  { %v1116_v3 = vmul.f32 %v1052_v58, %v881_v1  ;;  %v1454_v5 = vpop.f32.mrb[56].mxu1  ;;  %v883_v7 = vpop.f32.mrb[57].mxu0  ;;  %v1056_v1 = vld [vmem:[%s5375_s4 + $0x100] sm:$0xff] }
 0x16e   :  { %v1456_v10 = vpop.f32.mrb[57].mxu1  ;;  %v884_v12 = vpop.f32.mrb[58].mxu0  ;;  %v1645_v7 = vsel %vm1597_vm2, %v3553_v16, 0.0 }
 0x16f   :  { %v3583_v15 = vadd.f32 %v1454_v5, %v1116_v3  ;;  %v1117_v17 = vmul.f32 %v1053_v2, %v884_v12  ;;  %v1457_v20 = vpop.f32.mrb[58].mxu1  ;;  %v886_v21 = vpop.f32.mrb[59].mxu0  ;;  %v1643_v2 = vsel %vm1597_vm2, %v3541_v60, 0.0  ;;  %v1057_v5 = vld [vmem:[%s5375_s4 + $0x108] sm:$0xff] }
 0x170   :  { %v1459_v22 = vpop.f32.mrb[59].mxu1  ;;  %v1644_v14 = vadd.f32 %v1643_v2, %v1642_v63 }
 0x171   :  { %v3587_v26 = vadd.f32 %v1457_v20, %v1117_v17 }
 0x174   :  { %v889_v33 = vpop.f32.mrb[60].mxu0 }
 0x175   :  { %v1118_v37 = vmul.f32 %v1054_v29, %v889_v33  ;;  %v1462_v38 = vpop.f32.mrb[60].mxu1  ;;  %v891_v40 = vpop.f32.mrb[61].mxu0  ;;  %v1646_v29 = vadd.f32 %v1645_v7, %v1644_v14  ;;  %v1647_v33 = vsel %vm1597_vm2, %v3555_v25, 0.0  ;;  %v1653_v7 = vsel %vm1597_vm2, %v3583_v15, 0.0 }
 0x176   :  { %v1464_v41 = vpop.f32.mrb[61].mxu1  ;;  %v892_v45 = vpop.f32.mrb[62].mxu0 }
 0x177   :  { %v3599_v50 = vadd.f32 %v1462_v38, %v1118_v37  ;;  %v1119_v51 = vmul.f32 %v1055_v34, %v892_v45  ;;  %v1465_v54 = vpop.f32.mrb[62].mxu1  ;;  %v894_v55 = vpop.f32.mrb[63].mxu0  ;;  %v1649_v37 = vsel %vm1597_vm2, %v3567_v46, 0.0  ;;  %v1648_v38 = vadd.f32 %v1647_v33, %v1646_v29  ;;  %v1059_v41 = vld [vmem:[%s5375_s4 + $0x118] sm:$0xff] }
 0x178   :  { %v1467_v58 = vpop.f32.mrb[63].mxu1 }
 0x179   :  { %v3601_v62 = vadd.f32 %v1465_v54, %v1119_v51  ;;  %v1650_v54 = vadd.f32 %v1649_v37, %v1648_v38  ;;  %v1651_v58 = vsel %vm1597_vm2, %v3571_v57, 0.0 }
 0x17c   :  { %v897_v3 = vpop.f32.mrb[64].mxu0 }
 0x17d   :  { %v1120_v8 = vmul.f32 %v1056_v1, %v897_v3  ;;  %v1470_v10 = vpop.f32.mrb[64].mxu1  ;;  %v899_v12 = vpop.f32.mrb[65].mxu0 }
 0x17e   :  { %v1472_v17 = vpop.f32.mrb[65].mxu1  ;;  %v900_v20 = vpop.f32.mrb[66].mxu0  ;;  %v1060_v12 = vld [vmem:[%s5375_s4 + $0x120] sm:$0xff] }
 0x17f   :  { %v3613_v21 = vadd.f32 %v1470_v10, %v1120_v8  ;;  %v1121_v22 = vmul.f32 %v1057_v5, %v900_v20  ;;  %v1473_v24 = vpop.f32.mrb[66].mxu1  ;;  %v902_v28 = vpop.f32.mrb[67].mxu0  ;;  %v1652_v10 = vadd.f32 %v1651_v58, %v1650_v54  ;;  %v1061_v20 = vld [vmem:[%s5375_s4 + $0x128] sm:$0xff] }
 0x180   :  { %v1475_v30 = vpop.f32.mrb[67].mxu1 }
 0x181   :  { %v3617_v34 = vadd.f32 %v1473_v24, %v1121_v22  ;;  %v1654_v14 = vadd.f32 %v1653_v7, %v1652_v10  ;;  %v1655_v22 = vsel %vm1597_vm2, %v3587_v26, 0.0 }
 0x184   :  { %v905_v40 = vpop.f32.mrb[68].mxu0 }
 0x185   :  { %v1122_v45 = vmul.f32 %v1058_v36, %v905_v40  ;;  %v1478_v47 = vpop.f32.mrb[68].mxu1  ;;  %v907_v51 = vpop.f32.mrb[69].mxu0  ;;  %v1657_v36 = vsel %vm1597_vm2, %v3599_v50, 0.0 }
 0x186   :  { %v1480_v55 = vpop.f32.mrb[69].mxu1  ;;  %v908_v56 = vpop.f32.mrb[70].mxu0 }
 0x187   :  { %v3629_v63 = vadd.f32 %v1478_v47, %v1122_v45  ;;  %v1123_v1 = vmul.f32 %v1059_v41, %v908_v56  ;;  %v1481_v2 = vpop.f32.mrb[70].mxu1  ;;  %v910_v3 = vpop.f32.mrb[71].mxu0  ;;  %v1656_v45 = vadd.f32 %v1655_v22, %v1654_v14  ;;  %v1062_v55 = vld [vmem:[%s5375_s4 + $0x130] sm:$0xff]  ;;  %v1659_v56 = vsel %vm1597_vm2, %v3601_v62, 0.0 }
 0x188   :  { %v1483_v5 = vpop.f32.mrb[71].mxu1 }
 0x189   :  { %5418 = vst [vmem:[#allocation2_spill] sm:$0xff] %v3629_v63  ;;  %v3633_v8 = vadd.f32 %v1481_v2, %v1123_v1  ;;  %v1658_v54 = vadd.f32 %v1657_v36, %v1656_v45  ;;  %v1063_v1 = vld [vmem:[%s5375_s4 + $0x138] sm:$0xff]  ;;  %v1661_v2 = vsel %vm1597_vm2, %v3613_v21, 0.0  ;;  %v1064_v36 = vld [vmem:[%s5375_s4 + $0x140] sm:$0xff]  ;;  %v1065_v45 = vld [vmem:[%s5375_s4 + $0x148] sm:$0xff] }
 0x18b   :  { %5419 = vst [vmem:[#allocation3_spill] sm:$0xff] %v3633_v8  ;;  %v1660_v10 = vadd.f32 %v1659_v56, %v1658_v54 }
 0x18c   :  { %v913_v17 = vpop.f32.mrb[72].mxu0 }
 0x18d   :  { %v1124_v24 = vmul.f32 %v1060_v12, %v913_v17  ;;  %v1486_v28 = vpop.f32.mrb[72].mxu1  ;;  %v915_v29 = vpop.f32.mrb[73].mxu0 }
 0x18e   :  { %v1488_v30 = vpop.f32.mrb[73].mxu1  ;;  %v916_v33 = vpop.f32.mrb[74].mxu0 }
 0x18f   :  { %v3645_v37 = vadd.f32 %v1486_v28, %v1124_v24  ;;  %v1125_v38 = vmul.f32 %v1061_v20, %v916_v33  ;;  %v1489_v40 = vpop.f32.mrb[74].mxu1  ;;  %v918_v41 = vpop.f32.mrb[75].mxu0  ;;  %v1662_v28 = vadd.f32 %v1661_v2, %v1660_v10  ;;  %v1663_v30 = vsel %vm1597_vm2, %v3617_v34, 0.0 }
 0x190   :  { %v1491_v47 = vpop.f32.mrb[75].mxu1  ;;  %v1667_v2 = vsel %vm1597_vm2, %v3633_v8, 0.0 }
 0x191   :  { %5420 = vst [vmem:[#allocation4_spill] sm:$0xff] %v3645_v37  ;;  %v3647_v51 = vadd.f32 %v1489_v40, %v1125_v38  ;;  %v1665_v38 = vsel %vm1597_vm2, %v3629_v63, 0.0  ;;  %v1664_v40 = vadd.f32 %v1663_v30, %v1662_v28  ;;  %v1067_v30 = vld [vmem:[%s5375_s4 + $0x158] sm:$0xff] }
 0x193   :  { %5421 = vst [vmem:[#allocation5_spill] sm:$0xff] %v3647_v51  ;;  %v1666_v56 = vadd.f32 %v1665_v38, %v1664_v40 }
 0x194   :  { %v921_v58 = vpop.f32.mrb[76].mxu0 }
 0x195   :  { %v1126_v3 = vmul.f32 %v1062_v55, %v921_v58  ;;  %v1494_v5 = vpop.f32.mrb[76].mxu1  ;;  %v923_v7 = vpop.f32.mrb[77].mxu0 }
 0x196   :  { %v1496_v12 = vpop.f32.mrb[77].mxu1  ;;  %v924_v14 = vpop.f32.mrb[78].mxu0 }
 0x197   :  { %v3659_v17 = vadd.f32 %v1494_v5, %v1126_v3  ;;  %v1127_v20 = vmul.f32 %v1063_v1, %v924_v14  ;;  %v1497_v22 = vpop.f32.mrb[78].mxu1  ;;  %v926_v24 = vpop.f32.mrb[79].mxu0  ;;  %v1669_v14 = vsel %vm1597_vm2, %v3645_v37, 0.0 }
 0x198   :  { %v1499_v29 = vpop.f32.mrb[79].mxu1  ;;  %v1066_v24 = vld [vmem:[%s5375_s4 + $0x150] sm:$0xff] }
 0x199   :  { %5422 = vst [vmem:[#allocation6_spill] sm:$0xff] %v3659_v17  ;;  %v3663_v33 = vadd.f32 %v1497_v22, %v1127_v20  ;;  %v1668_v22 = vadd.f32 %v1667_v2, %v1666_v56 }
 0x19b   :  { %5423 = vst [vmem:[#allocation7_spill] sm:$0xff] %v3663_v33  ;;  %v1670_v28 = vadd.f32 %v1669_v14, %v1668_v22  ;;  %v1675_v14 = vsel %vm1597_vm2, %v3663_v33, 0.0 }
 0x19c   :  { %v929_v41 = vpop.f32.mrb[80].mxu0 }
 0x19d   :  { %v1128_v47 = vmul.f32 %v1064_v36, %v929_v41  ;;  %v1502_v54 = vpop.f32.mrb[80].mxu1  ;;  %v931_v55 = vpop.f32.mrb[81].mxu0  ;;  %v1671_v36 = vsel %vm1597_vm2, %v3647_v51, 0.0 }
 0x19e   :  { %v1504_v58 = vpop.f32.mrb[81].mxu1  ;;  %v932_v1 = vpop.f32.mrb[82].mxu0  ;;  %v1672_v2 = vadd.f32 %v1671_v36, %v1670_v28 }
 0x19f   :  { %v3675_v3 = vadd.f32 %v1502_v54, %v1128_v47  ;;  %v1129_v5 = vmul.f32 %v1065_v45, %v932_v1  ;;  %v1505_v7 = vpop.f32.mrb[82].mxu1  ;;  %v934_v10 = vpop.f32.mrb[83].mxu0  ;;  %v1673_v54 = vsel %vm1597_vm2, %v3659_v17, 0.0 }
 0x1a0   :  { %v1507_v12 = vpop.f32.mrb[83].mxu1  ;;  %v1674_v10 = vadd.f32 %v1673_v54, %v1672_v2 }
 0x1a1   :  { %5424 = vst [vmem:[#allocation8_spill] sm:$0xff] %v3675_v3  ;;  %v3679_v20 = vadd.f32 %v1505_v7, %v1129_v5  ;;  %v1068_v12 = vld [vmem:[%s5375_s4 + $0x160] sm:$0xff] }
 0x1a3   :  { %5425 = vst [vmem:[#allocation9_spill] sm:$0xff] %v3679_v20  ;;  %v1679_v2 = vsel %vm1597_vm2, %v3679_v20, 0.0 }
 0x1a4   :  { %v937_v29 = vpop.f32.mrb[84].mxu0 }
 0x1a5   :  { %v1130_v38 = vmul.f32 %v1066_v24, %v937_v29  ;;  %v1510_v40 = vpop.f32.mrb[84].mxu1  ;;  %v939_v41 = vpop.f32.mrb[85].mxu0  ;;  %v1069_v24 = vld [vmem:[%s5375_s4 + $0x168] sm:$0xff]  ;;  %v1677_v29 = vsel %vm1597_vm2, %v3675_v3, 0.0 }
 0x1a6   :  { %v1512_v45 = vpop.f32.mrb[85].mxu1  ;;  %v940_v47 = vpop.f32.mrb[86].mxu0 }
 0x1a7   :  { %v3691_v55 = vadd.f32 %v1510_v40, %v1130_v38  ;;  %v1131_v56 = vmul.f32 %v1067_v30, %v940_v47  ;;  %v1513_v58 = vpop.f32.mrb[86].mxu1  ;;  %v942_v1 = vpop.f32.mrb[87].mxu0  ;;  %v1676_v38 = vadd.f32 %v1675_v14, %v1674_v10 }
 0x1a8   :  { %v1515_v5 = vpop.f32.mrb[87].mxu1 }
 0x1a9   :  { %5426 = vst [vmem:[#allocation10_spill] sm:$0xff] %v3691_v55  ;;  %v3693_v7 = vadd.f32 %v1513_v58, %v1131_v56  ;;  %v1678_v58 = vadd.f32 %v1677_v29, %v1676_v38  ;;  %v1681_v10 = vsel %vm1597_vm2, %v3691_v55, 0.0 }
 0x1ab   :  { %5427 = vst [vmem:[#allocation11_spill] sm:$0xff] %v3693_v7  ;;  %v1680_v14 = vadd.f32 %v1679_v2, %v1678_v58 }
 0x1ac   :  { %v945_v22 = vpop.f32.mrb[88].mxu0 }
 0x1ad   :  { %v1132_v28 = vmul.f32 %v1068_v12, %v945_v22  ;;  %v1518_v30 = vpop.f32.mrb[88].mxu1  ;;  %v947_v36 = vpop.f32.mrb[89].mxu0  ;;  %v1070_v12 = vld [vmem:[%s5375_s4 + $0x170] sm:$0xff] }
 0x1ae   :  { %v1520_v40 = vpop.f32.mrb[89].mxu1  ;;  %v948_v41 = vpop.f32.mrb[90].mxu0  ;;  %v1682_v36 = vadd.f32 %v1681_v10, %v1680_v14  ;;  %v1072_v10 = vld [vmem:[%s5375_s4 + $0x180] sm:$0xff] }
 0x1af   :  { %v3705_v45 = vadd.f32 %v1518_v30, %v1132_v28  ;;  %v1133_v47 = vmul.f32 %v1069_v24, %v948_v41  ;;  %v1521_v54 = vpop.f32.mrb[90].mxu1  ;;  %v950_v56 = vpop.f32.mrb[91].mxu0  ;;  %v1071_v24 = vld [vmem:[%s5375_s4 + $0x178] sm:$0xff]  ;;  %v1683_v41 = vsel %vm1597_vm2, %v3693_v7, 0.0 }
 0x1b0   :  { %v1523_v1 = vpop.f32.mrb[91].mxu1 }
 0x1b1   :  { %5428 = vst [vmem:[#allocation12_spill] sm:$0xff] %v3705_v45  ;;  %v3709_v5 = vadd.f32 %v1521_v54, %v1133_v47  ;;  %v1685_v2 = vsel %vm1597_vm2, %v3705_v45, 0.0 }
 0x1b3   :  { %5429 = vst [vmem:[#allocation13_spill] sm:$0xff] %v3709_v5 }
 0x1b4   :  { %v953_v22 = vpop.f32.mrb[92].mxu0 }
 0x1b5   :  { %v1134_v29 = vmul.f32 %v1070_v12, %v953_v22  ;;  %v1526_v28 = vpop.f32.mrb[92].mxu1  ;;  %v955_v30 = vpop.f32.mrb[93].mxu0  ;;  %v1684_v12 = vadd.f32 %v1683_v41, %v1682_v36 }
 0x1b6   :  { %v1528_v38 = vpop.f32.mrb[93].mxu1  ;;  %v956_v40 = vpop.f32.mrb[94].mxu0 }
 0x1b7   :  { %v3721_v47 = vadd.f32 %v1526_v28, %v1134_v29  ;;  %v1135_v54 = vmul.f32 %v1071_v24, %v956_v40  ;;  %v1529_v56 = vpop.f32.mrb[94].mxu1  ;;  %v958_v1 = vpop.f32.mrb[95].mxu0  ;;  %v1686_v14 = vadd.f32 %v1685_v2, %v1684_v12  ;;  %v1073_v29 = vld [vmem:[%s5375_s4 + $0x188] sm:$0xff]  ;;  %v1687_v24 = vsel %vm1597_vm2, %v3709_v5, 0.0 }
 0x1b8   :  { %v1531_v58 = vpop.f32.mrb[95].mxu1 }
 0x1b9   :  { %5430 = vst [vmem:[#allocation14_spill] sm:$0xff] %v3721_v47  ;;  %v3725_v55 = vadd.f32 %v1529_v56, %v1135_v54  ;;  %v1689_v36 = vsel %vm1597_vm2, %v3721_v47, 0.0  ;;  %v1688_v2 = vadd.f32 %v1687_v24, %v1686_v14 }
 0x1bb   :  { %5431 = vst [vmem:[#allocation15_spill] sm:$0xff] %v3725_v55  ;;  %v1690_v7 = vadd.f32 %v1689_v36, %v1688_v2 }
 0x1bc   :  { %v961_v22 = vpop.f32.mrb[96].mxu0 }
 0x1bd   :  { %v1136_v28 = vmul.f32 %v1072_v10, %v961_v22  ;;  %v1534_v30 = vpop.f32.mrb[96].mxu1  ;;  %v963_v38 = vpop.f32.mrb[97].mxu0  ;;  %v1074_v10 = vld [vmem:[%s5375_s4 + $0x190] sm:$0xff]  ;;  %v1691_v22 = vsel %vm1597_vm2, %v3725_v55, 0.0 }
 0x1be   :  { %v1536_v40 = vpop.f32.mrb[97].mxu1  ;;  %v964_v54 = vpop.f32.mrb[98].mxu0 }
 0x1bf   :  { %v3737_v41 = vadd.f32 %v1534_v30, %v1136_v28  ;;  %v1137_v56 = vmul.f32 %v1073_v29, %v964_v54  ;;  %v1537_v1 = vpop.f32.mrb[98].mxu1  ;;  %v966_v58 = vpop.f32.mrb[99].mxu0  ;;  %v1075_v28 = vld [vmem:[%s5375_s4 + $0x198] sm:$0xff]  ;;  %v1692_v40 = vadd.f32 %v1691_v22, %v1690_v7 }
 0x1c0   :  { %v1539_v12 = vpop.f32.mrb[99].mxu1 }
 0x1c1   :  { %5432 = vst [vmem:[#allocation16_spill] sm:$0xff] %v3737_v41  ;;  %v3739_v45 = vadd.f32 %v1537_v1, %v1137_v56  ;;  %v1693_v29 = vsel %vm1597_vm2, %v3737_v41, 0.0 }
 0x1c2   :  { %v1694_v12 = vadd.f32 %v1693_v29, %v1692_v40 }
 0x1c3   :  { %5433 = vst [vmem:[#allocation17_spill] sm:$0xff] %v3739_v45  ;;  %v1695_v47 = vsel %vm1597_vm2, %v3739_v45, 0.0 }
 0x1c4   :  { %v969_v38 = vpop.f32.mrb[100].mxu0  ;;  %v1696_v22 = vadd.f32 %v1695_v47, %v1694_v12 }
 0x1c5   :  { %v1138_v14 = vmul.f32 %v1074_v10, %v969_v38  ;;  %v1542_v24 = vpop.f32.mrb[100].mxu1  ;;  %v971_v30 = vpop.f32.mrb[101].mxu0  ;;  %v1076_v10 = vld [vmem:[%s5375_s4 + $0x1a0] sm:$0xff] }
 0x1c6   :  { %v1544_v54 = vpop.f32.mrb[101].mxu1  ;;  %v972_v36 = vpop.f32.mrb[102].mxu0 }
 0x1c7   :  { %v3751_v56 = vadd.f32 %v1542_v24, %v1138_v14  ;;  %v1139_v1 = vmul.f32 %v1075_v28, %v972_v36  ;;  %v1545_v58 = vpop.f32.mrb[102].mxu1  ;;  %v974_v2 = vpop.f32.mrb[103].mxu0  ;;  %v1077_v28 = vld [vmem:[%s5375_s4 + $0x1a8] sm:$0xff] }
 0x1c8   :  { %v1547_v55 = vpop.f32.mrb[103].mxu1 }
 0x1c9   :  { %5434 = vst [vmem:[#allocation18_spill] sm:$0xff] %v3751_v56  ;;  %v3755_v5 = vadd.f32 %v1545_v58, %v1139_v1  ;;  %v1697_v7 = vsel %vm1597_vm2, %v3751_v56, 0.0 }
 0x1ca   :  { %v1698_v24 = vadd.f32 %v1697_v7, %v1696_v22  ;;  %v1078_v7 = vld [vmem:[%s5375_s4 + $0x1b0] sm:$0xff] }
 0x1cb   :  { %5435 = vst [vmem:[#allocation19_spill] sm:$0xff] %v3755_v5  ;;  %v1699_v54 = vsel %vm1597_vm2, %v3755_v5, 0.0 }
 0x1cc   :  { %v977_v38 = vpop.f32.mrb[104].mxu0 }
 0x1cd   :  { %v1140_v29 = vmul.f32 %v1076_v10, %v977_v38  ;;  %v1550_v55 = vpop.f32.mrb[104].mxu1  ;;  %v979_v14 = vpop.f32.mrb[105].mxu0  ;;  %v1700_v10 = vadd.f32 %v1699_v54, %v1698_v24 }
 0x1ce   :  { %v1552_v30 = vpop.f32.mrb[105].mxu1  ;;  %v980_v40 = vpop.f32.mrb[106].mxu0 }
 0x1cf   :  { %v3767_v36 = vadd.f32 %v1550_v55, %v1140_v29  ;;  %v1141_v1 = vmul.f32 %v1077_v28, %v980_v40  ;;  %v1553_v58 = vpop.f32.mrb[106].mxu1  ;;  %v982_v2 = vpop.f32.mrb[107].mxu0  ;;  %v1079_v29 = vld [vmem:[%s5375_s4 + $0x1b8] sm:$0xff] }
 0x1d0   :  { %v1555_v47 = vpop.f32.mrb[107].mxu1 }
 0x1d1   :  { %5436 = vst [vmem:[#allocation20_spill] sm:$0xff] %v3767_v36  ;;  %v1701_v12 = vsel %vm1597_vm2, %v3767_v36, 0.0  ;;  %v3771_v56 = vadd.f32 %v1553_v58, %v1141_v1 }
 0x1d2   :  { %v1702_v22 = vadd.f32 %v1701_v12, %v1700_v10 }
 0x1d3   :  { %5437 = vst [vmem:[#allocation21_spill] sm:$0xff] %v3771_v56  ;;  %v1703_v28 = vsel %vm1597_vm2, %v3771_v56, 0.0 }
 0x1d4   :  { %v985_v38 = vpop.f32.mrb[108].mxu0  ;;  %v1704_v47 = vadd.f32 %v1703_v28, %v1702_v22  ;;  %v1081_v22 = vld [vmem:[%s5375_s4 + $0x1c8] sm:$0xff] }
 0x1d5   :  { %v1142_v55 = vmul.f32 %v1078_v7, %v985_v38  ;;  %v1558_v14 = vpop.f32.mrb[108].mxu1  ;;  %v987_v30 = vpop.f32.mrb[109].mxu0  ;;  %v1080_v7 = vld [vmem:[%s5375_s4 + $0x1c0] sm:$0xff] }
 0x1d6   :  { %v1560_v40 = vpop.f32.mrb[109].mxu1  ;;  %v988_v1 = vpop.f32.mrb[110].mxu0 }
 0x1d7   :  { %v3781_v58 = vadd.f32 %v1558_v14, %v1142_v55  ;;  %v1143_v24 = vmul.f32 %v1079_v29, %v988_v1  ;;  %v1561_v54 = vpop.f32.mrb[110].mxu1  ;;  %v990_v2 = vpop.f32.mrb[111].mxu0 }
 0x1d8   :  { %v1563_v12 = vpop.f32.mrb[111].mxu1 }
 0x1d9   :  { %v1705_v10 = vsel %vm1597_vm2, %v3781_v58, 0.0  ;;  %v3785_v36 = vadd.f32 %v1561_v54, %v1143_v24 }
 0x1da   :  { %v1706_v5 = vadd.f32 %v1705_v10, %v1704_v47 }
 0x1db   :  { %v1707_v38 = vsel %vm1597_vm2, %v3785_v36, 0.0 }
 0x1dc   :  { %v1708_v55 = vadd.f32 %v1707_v38, %v1706_v5  ;;  %v993_v14 = vpop.f32.mrb[112].mxu0 }
 0x1dd   :  { %v1144_v29 = vmul.f32 %v1080_v7, %v993_v14  ;;  %v1566_v28 = vpop.f32.mrb[112].mxu1  ;;  %v995_v30 = vpop.f32.mrb[113].mxu0  ;;  %v1082_v7 = vld [vmem:[%s5375_s4 + $0x1d0] sm:$0xff] }
 0x1de   :  { %v1568_v40 = vpop.f32.mrb[113].mxu1  ;;  %v996_v1 = vpop.f32.mrb[114].mxu0 }
 0x1df   :  { %v3795_v24 = vadd.f32 %v1566_v28, %v1144_v29  ;;  %v1145_v54 = vmul.f32 %v1081_v22, %v996_v1  ;;  %v1569_v2 = vpop.f32.mrb[114].mxu1  ;;  %v998_v47 = vpop.f32.mrb[115].mxu0  ;;  %v1083_v22 = vld [vmem:[%s5375_s4 + $0x1d8] sm:$0xff] }
 0x1e0   :  { %v1571_v12 = vpop.f32.mrb[115].mxu1 }
 0x1e1   :  { %v1709_v10 = vsel %vm1597_vm2, %v3795_v24, 0.0  ;;  %v3799_v5 = vadd.f32 %v1569_v2, %v1145_v54 }
 0x1e2   :  { %v1710_v38 = vadd.f32 %v1709_v10, %v1708_v55 }
 0x1e3   :  { %v1711_v14 = vsel %vm1597_vm2, %v3799_v5, 0.0 }
 0x1e4   :  { %v1712_v30 = vadd.f32 %v1711_v14, %v1710_v38  ;;  %v1001_v29 = vpop.f32.mrb[116].mxu0  ;;  %v1084_v38 = vld [vmem:[%s5375_s4 + $0x1e0] sm:$0xff] }
 0x1e5   :  { %v1146_v28 = vmul.f32 %v1082_v7, %v1001_v29  ;;  %v1574_v40 = vpop.f32.mrb[116].mxu1  ;;  %v1003_v1 = vpop.f32.mrb[117].mxu0 }
 0x1e6   :  { %v1576_v47 = vpop.f32.mrb[117].mxu1  ;;  %v1004_v54 = vpop.f32.mrb[118].mxu0 }
 0x1e7   :  { %v1575_v2 = vadd.f32 %v1574_v40, %v1146_v28  ;;  %v1147_v55 = vmul.f32 %v1083_v22, %v1004_v54  ;;  %v1577_v12 = vpop.f32.mrb[118].mxu1  ;;  %v1006_v10 = vpop.f32.mrb[119].mxu0  ;;  %v1085_v28 = vld [vmem:[%s5375_s4 + $0x1e8] sm:$0xff] }
 0x1e8   :  { %v1579_v56 = vpop.f32.mrb[119].mxu1 }
 0x1e9   :  { %v1713_v45 = vsel %vm1597_vm2, %v1575_v2, 0.0  ;;  %v1578_v41 = vadd.f32 %v1577_v12, %v1147_v55 }
 0x1ea   :  { %v1714_v20 = vadd.f32 %v1713_v45, %v1712_v30 }
 0x1eb   :  { %v1715_v14 = vsel %vm1597_vm2, %v1578_v41, 0.0 }
 0x1ec   :  { %v1716_v7 = vadd.f32 %v1715_v14, %v1714_v20  ;;  %v1009_v29 = vpop.f32.mrb[120].mxu0  ;;  %v1086_v20 = vld [vmem:[%s5375_s4 + $0x1f0] sm:$0xff] }
 0x1ed   :  { %v1148_v22 = vmul.f32 %v1084_v38, %v1009_v29  ;;  %v1582_v40 = vpop.f32.mrb[120].mxu1  ;;  %v1011_v1 = vpop.f32.mrb[121].mxu0 }
 0x1ee   :  { %v1584_v56 = vpop.f32.mrb[121].mxu1  ;;  %v1012_v47 = vpop.f32.mrb[122].mxu0 }
 0x1ef   :  { %v1583_v54 = vadd.f32 %v1582_v40, %v1148_v22  ;;  %v1149_v55 = vmul.f32 %v1085_v28, %v1012_v47  ;;  %v1585_v45 = vpop.f32.mrb[122].mxu1  ;;  %v1014_v30 = vpop.f32.mrb[123].mxu0  ;;  %v1087_v22 = vld [vmem:[%s5375_s4 + $0x1f8] sm:$0xff] }
 0x1f0   :  { %v1587_v12 = vpop.f32.mrb[123].mxu1 }
 0x1f1   :  { %v1717_v10 = vsel %vm1597_vm2, %v1583_v54, 0.0  ;;  %v1586_v3 = vadd.f32 %v1585_v45, %v1149_v55 }
 0x1f2   :  { %v1718_v33 = vadd.f32 %v1717_v10, %v1716_v7 }
 0x1f3   :  { %v1719_v14 = vsel %vm1597_vm2, %v1586_v3, 0.0 }
 0x1f4   :  { %v1720_v38 = vadd.f32 %v1719_v14, %v1718_v33  ;;  %v1017_v29 = vpop.f32.mrb[124].mxu0 }
 0x1f5   :  { %v1150_v28 = vmul.f32 %v1086_v20, %v1017_v29  ;;  %v1590_v40 = vpop.f32.mrb[124].mxu1  ;;  %v1019_v1 = vpop.f32.mrb[125].mxu0 }
 0x1f6   :  { %v1592_v56 = vpop.f32.mrb[125].mxu1  ;;  %v1020_v47 = vpop.f32.mrb[126].mxu0 }
 0x1f7   :  { %v1591_v30 = vadd.f32 %v1590_v40, %v1150_v28  ;;  %v1151_v55 = vmul.f32 %v1087_v22, %v1020_v47  ;;  %v1593_v7 = vpop.f32.mrb[126].mxu1  ;;  %v1022_v45 = vpop.f32.mrb[127].mxu0 }
 0x1f8   :  { %v1595_v12 = vpop.f32.mrb[127].mxu1 }
 0x1f9   :  { %v1721_v10 = vsel %vm1597_vm2, %v1591_v30, 0.0  ;;  %v1594_v17 = vadd.f32 %v1593_v7, %v1151_v55 }
 0x1fa   :  { %v1722_v51 = vadd.f32 %v1721_v10, %v1720_v38 }
 0x1fb   :  { %v1723_v33 = vsel %vm1597_vm2, %v1594_v17, 0.0 }
 0x1fc   :  { %v1724_v14 = vadd.f32 %v1723_v33, %v1722_v51 }
 0x1fe   :  { %v1725_v37 = vrot.slane %v1724_v14, 4 }
 0x200   :  { %v1726_v8 = vadd.f32 %v1725_v37, %v1724_v14 }
 0x202   :  { %v1727_v63 = vrot.slane %v1726_v8, 2 }
 0x204   :  { %v1728_v20 = vadd.f32 %v1727_v63, %v1726_v8 }
 0x206   :  { %v1729_v29 = vrot.slane %v1728_v20, 1 }
 0x208   :  { %v1730_v1 = vadd.f32 %v1729_v29, %v1728_v20 }
 0x20a   :  { %v3827_v56 = vmul.f32 0.001953125, %v1730_v1 }
 0x20c   :  { %v3831_v22 = vsub.f32 %v3781_v58, %v3827_v56  ;;  %v3835_v28 = vsub.f32 %v3785_v36, %v3827_v56  ;;  %v3839_v38 = vsub.f32 %v3795_v24, %v3827_v56  ;;  %v3843_v37 = vsub.f32 %v3799_v5, %v3827_v56 }
 0x20d   :  { %v3846_v63 = vsub.f32 %v1575_v2, %v3827_v56  ;;  %v3849_v8 = vsub.f32 %v1578_v41, %v3827_v56  ;;  %v3852_v51 = vsub.f32 %v1583_v54, %v3827_v56  ;;  %v3855_v36 = vsub.f32 %v1586_v3, %v3827_v56 }
 0x20e   :  { %v3858_v58 = vsub.f32 %v1591_v30, %v3827_v56  ;;  %v3861_v24 = vsub.f32 %v1594_v17, %v3827_v56  ;;  %v3865_v5 = vsub.f32 %v3326_v43, %v3827_v56  ;;  %v3869_v41 = vsub.f32 %v3337_v52, %v3827_v56 }
 0x20f   :  { %5438 = vst [vmem:[#allocation22_spill] sm:$0xff] %v3849_v8  ;;  %5439 = vst [vmem:[#allocation23_spill] sm:$0xff] %v3852_v51  ;;  %v3873_v2 = vsub.f32 %v3362_v9, %v3827_v56  ;;  %v3877_v3 = vsub.f32 %v3373_v18, %v3827_v56  ;;  %v3885_v43 = vsub.f32 %v3398_v39, %v3827_v56 }
 0x210   :  { %5440 = vst [vmem:[#allocation24_spill] sm:$0xff] %v3855_v36  ;;  %5441 = vst [vmem:[#allocation25_spill] sm:$0xff] %v3858_v58  ;;  %v1797_v17 = vmul.f32 %v3865_v5, %v3865_v5  ;;  %v1798_v54 = vmul.f32 %v3869_v41, %v3869_v41  ;;  %v3891_v9 = vsub.f32 %v3409_v49, %v3827_v56 }
 0x211   :  { %v1799_v52 = vmul.f32 %v3873_v2, %v3873_v2  ;;  %v1800_v18 = vmul.f32 %v3877_v3, %v3877_v3  ;;  %v3899_v55 = vsub.f32 %v3431_v6, %v3827_v56  ;;  %v1801_v39 = vmul.f32 %v3885_v43, %v3885_v43 }
 0x212   :  { %v1861_v40 = vsel %vm1597_vm2, %v1797_v17, 0.0  ;;  %v1862_v47 = vsel %vm1597_vm2, %v1798_v54, 0.0  ;;  %v3906_v49 = vsub.f32 %v3433_v13, %v3827_v56  ;;  %v1802_v12 = vmul.f32 %v3891_v9, %v3891_v9 }
 0x213   :  { %v1863_v30 = vadd.f32 %v1862_v47, %v1861_v40  ;;  %v1864_v7 = vsel %vm1597_vm2, %v1799_v52, 0.0  ;;  %v1866_v10 = vsel %vm1597_vm2, %v1800_v18, 0.0  ;;  %v3913_v6 = vsub.f32 %v3443_v27, %v3827_v56 }
 0x214   :  { %v1803_v14 = vmul.f32 %v3899_v55, %v3899_v55  ;;  %v1868_v20 = vsel %vm1597_vm2, %v1801_v39, 0.0  ;;  %v3920_v13 = vsub.f32 %v3445_v32, %v3827_v56  ;;  %v1804_v1 = vmul.f32 %v3906_v49, %v3906_v49 }
 0x215   :  { %v1865_v45 = vadd.f32 %v1864_v7, %v1863_v30  ;;  %v1870_v17 = vsel %vm1597_vm2, %v1802_v12, 0.0  ;;  %v3927_v27 = vsub.f32 %v3453_v42, %v3827_v56  ;;  %v1805_v52 = vmul.f32 %v3913_v6, %v3913_v6 }
 0x216   :  { %v1872_v18 = vsel %vm1597_vm2, %v1803_v14, 0.0  ;;  %v3934_v32 = vsub.f32 %v3455_v48, %v3827_v56  ;;  %v1806_v47 = vmul.f32 %v3920_v13, %v3920_v13  ;;  %v1874_v30 = vsel %vm1597_vm2, %v1804_v1, 0.0 }
 0x217   :  { %v1867_v33 = vadd.f32 %v1866_v10, %v1865_v45  ;;  %v3941_v42 = vsub.f32 %v3463_v59, %v3827_v56  ;;  %v1807_v7 = vmul.f32 %v3927_v27, %v3927_v27  ;;  %v1876_v45 = vsel %vm1597_vm2, %v1805_v52, 0.0 }
 0x218   :  { %v3948_v48 = vsub.f32 %v3465_v0, %v3827_v56  ;;  %v1808_v10 = vmul.f32 %v3934_v32, %v3934_v32  ;;  %v3955_v59 = vsub.f32 %v3473_v11, %v3827_v56  ;;  %v3962_v0 = vsub.f32 %v3477_v19, %v3827_v56 }
 0x219   :  { %v1869_v29 = vadd.f32 %v1868_v20, %v1867_v33  ;;  %v1878_v33 = vsel %vm1597_vm2, %v1806_v47, 0.0  ;;  %v1809_v20 = vmul.f32 %v3941_v42, %v3941_v42  ;;  %v3969_v11 = vsub.f32 %v3491_v35, %v3827_v56 }
 0x21a   :  { %v3976_v19 = vsub.f32 %v3495_v44, %v3827_v56  ;;  %v3983_v35 = vsub.f32 %v3507_v61, %v3827_v56  ;;  %v3990_v44 = vsub.f32 %v3509_v4, %v3827_v56  ;;  %v3997_v61 = vsub.f32 %v3521_v23, %v3827_v56 }
 0x21b   :  { %v1871_v54 = vadd.f32 %v1870_v17, %v1869_v29  ;;  %v1880_v29 = vsel %vm1597_vm2, %v1807_v7, 0.0  ;;  %v1810_v17 = vmul.f32 %v3948_v48, %v3948_v48  ;;  %v4004_v4 = vsub.f32 %v3525_v31, %v3827_v56 }
 0x21c   :  { %v4011_v23 = vsub.f32 %v3537_v53, %v3827_v56  ;;  %v4018_v31 = vsub.f32 %v3541_v60, %v3827_v56  ;;  %v4025_v53 = vsub.f32 %v3553_v16, %v3827_v56  ;;  %v4032_v60 = vsub.f32 %v3555_v25, %v3827_v56 }
 0x21d   :  { %v1873_v40 = vadd.f32 %v1872_v18, %v1871_v54  ;;  %v1882_v54 = vsel %vm1597_vm2, %v1808_v10, 0.0  ;;  %v1811_v18 = vmul.f32 %v3955_v59, %v3955_v59  ;;  %v4039_v16 = vsub.f32 %v3567_v46, %v3827_v56 }
 0x21e   :  { %v4046_v25 = vsub.f32 %v3571_v57, %v3827_v56  ;;  %v4053_v46 = vsub.f32 %v3583_v15, %v3827_v56  ;;  %v4060_v57 = vsub.f32 %v3587_v26, %v3827_v56  ;;  %v4067_v15 = vsub.f32 %v3599_v50, %v3827_v56 }
 0x21f   :  { %v1875_v39 = vadd.f32 %v1874_v30, %v1873_v40  ;;  %v1884_v40 = vsel %vm1597_vm2, %v1809_v20, 0.0  ;;  %v1812_v30 = vmul.f32 %v3962_v0, %v3962_v0  ;;  %v4074_v26 = vsub.f32 %v3601_v62, %v3827_v56 }
 0x220   :  { %v4081_v50 = vsub.f32 %v3613_v21, %v3827_v56  ;;  %v4088_v62 = vsub.f32 %v3617_v34, %v3827_v56 }
 0x221   :  { %v1877_v12 = vadd.f32 %v1876_v45, %v1875_v39  ;;  %v1886_v39 = vsel %vm1597_vm2, %v1810_v17, 0.0  ;;  %v1813_v45 = vmul.f32 %v3969_v11, %v3969_v11 }
 0x223   :  { %v1879_v14 = vadd.f32 %v1878_v33, %v1877_v12  ;;  %v1888_v12 = vsel %vm1597_vm2, %v1811_v18, 0.0  ;;  %v1814_v33 = vmul.f32 %v3976_v19, %v3976_v19 }
 0x225   :  { %v1881_v1 = vadd.f32 %v1880_v29, %v1879_v14  ;;  %v1890_v14 = vsel %vm1597_vm2, %v1812_v30, 0.0  ;;  %v1815_v29 = vmul.f32 %v3983_v35, %v3983_v35 }
 0x227   :  { %v1883_v52 = vadd.f32 %v1882_v54, %v1881_v1  ;;  %v1892_v1 = vsel %vm1597_vm2, %v1813_v45, 0.0  ;;  %v1816_v54 = vmul.f32 %v3990_v44, %v3990_v44 }
 0x229   :  { %v1885_v47 = vadd.f32 %v1884_v40, %v1883_v52  ;;  %v1894_v52 = vsel %vm1597_vm2, %v1814_v33, 0.0  ;;  %v1817_v40 = vmul.f32 %v3997_v61, %v3997_v61 }
 0x22b   :  { %v1887_v7 = vadd.f32 %v1886_v39, %v1885_v47  ;;  %v1896_v47 = vsel %vm1597_vm2, %v1815_v29, 0.0  ;;  %v1818_v39 = vmul.f32 %v4004_v4, %v4004_v4 }
 0x22d   :  { %v1889_v10 = vadd.f32 %v1888_v12, %v1887_v7  ;;  %v1898_v7 = vsel %vm1597_vm2, %v1816_v54, 0.0  ;;  %v1819_v12 = vmul.f32 %v4011_v23, %v4011_v23 }
 0x22f   :  { %v1891_v20 = vadd.f32 %v1890_v14, %v1889_v10  ;;  %v1900_v10 = vsel %vm1597_vm2, %v1817_v40, 0.0  ;;  %v1820_v14 = vmul.f32 %v4018_v31, %v4018_v31 }
 0x231   :  { %v1893_v17 = vadd.f32 %v1892_v1, %v1891_v20  ;;  %v1902_v20 = vsel %vm1597_vm2, %v1818_v39, 0.0  ;;  %v1821_v1 = vmul.f32 %v4025_v53, %v4025_v53 }
 0x233   :  { %v1895_v18 = vadd.f32 %v1894_v52, %v1893_v17  ;;  %v1904_v17 = vsel %vm1597_vm2, %v1819_v12, 0.0  ;;  %v1822_v52 = vmul.f32 %v4032_v60, %v4032_v60 }
 0x235   :  { %v1897_v30 = vadd.f32 %v1896_v47, %v1895_v18  ;;  %v1906_v18 = vsel %vm1597_vm2, %v1820_v14, 0.0  ;;  %v1823_v47 = vmul.f32 %v4039_v16, %v4039_v16 }
 0x237   :  { %v1899_v45 = vadd.f32 %v1898_v7, %v1897_v30  ;;  %v1908_v30 = vsel %vm1597_vm2, %v1821_v1, 0.0  ;;  %v1824_v7 = vmul.f32 %v4046_v25, %v4046_v25 }
 0x239   :  { %v1901_v33 = vadd.f32 %v1900_v10, %v1899_v45  ;;  %v1910_v45 = vsel %vm1597_vm2, %v1822_v52, 0.0  ;;  %v1825_v10 = vmul.f32 %v4053_v46, %v4053_v46 }
 0x23b   :  { %v1903_v29 = vadd.f32 %v1902_v20, %v1901_v33  ;;  %v1912_v33 = vsel %vm1597_vm2, %v1823_v47, 0.0  ;;  %v1826_v20 = vmul.f32 %v4060_v57, %v4060_v57 }
 0x23d   :  { %v1905_v54 = vadd.f32 %v1904_v17, %v1903_v29  ;;  %v1914_v29 = vsel %vm1597_vm2, %v1824_v7, 0.0  ;;  %v1827_v17 = vmul.f32 %v4067_v15, %v4067_v15 }
 0x23f   :  { %v1907_v40 = vadd.f32 %v1906_v18, %v1905_v54  ;;  %v1916_v54 = vsel %vm1597_vm2, %v1825_v10, 0.0  ;;  %v1828_v18 = vmul.f32 %v4074_v26, %v4074_v26  ;;  %v1920_v7 = vsel %vm1597_vm2, %v1827_v17, 0.0 }
 0x240   :  { %v1830_v10 = vmul.f32 %v4088_v62, %v4088_v62 }
 0x241   :  { %v1909_v39 = vadd.f32 %v1908_v30, %v1907_v40  ;;  %v1918_v40 = vsel %vm1597_vm2, %v1826_v20, 0.0  ;;  %v5442_v30 = vld [vmem:[#allocation2_spill] sm:$0xff]  ;;  %v5444_v20 = vld [vmem:[#allocation4_spill] sm:$0xff] }
 0x242   :  { %v4095_v21 = vsub.f32 %v5442_v30, %v3827_v56 }
 0x243   :  { %v1911_v12 = vadd.f32 %v1910_v45, %v1909_v39  ;;  %v1829_v39 = vmul.f32 %v4081_v50, %v4081_v50 }
 0x245   :  { %v1913_v14 = vadd.f32 %v1912_v33, %v1911_v12  ;;  %v5443_v12 = vld [vmem:[#allocation3_spill] sm:$0xff]  ;;  %v1922_v33 = vsel %vm1597_vm2, %v1828_v18, 0.0  ;;  %v1924_v17 = vsel %vm1597_vm2, %v1829_v39, 0.0  ;;  %v1926_v18 = vsel %vm1597_vm2, %v1830_v10, 0.0 }
 0x246   :  { %v4102_v34 = vsub.f32 %v5443_v12, %v3827_v56 }
 0x247   :  { %v1915_v1 = vadd.f32 %v1914_v29, %v1913_v14  ;;  %v4109_v29 = vsub.f32 %v5444_v20, %v3827_v56 }
 0x249   :  { %v1917_v52 = vadd.f32 %v1916_v54, %v1915_v1  ;;  %5445 = vst [vmem:[#allocation2_spill] sm:$0xff] %v4109_v29  ;;  %v1831_v1 = vmul.f32 %v4095_v21, %v4095_v21  ;;  %v1833_v12 = vmul.f32 %v4109_v29, %v4109_v29 }
 0x24b   :  { %v1919_v47 = vadd.f32 %v1918_v40, %v1917_v52  ;;  %v5446_v52 = vld [vmem:[#allocation5_spill] sm:$0xff]  ;;  %v1928_v39 = vsel %vm1597_vm2, %v1831_v1, 0.0  ;;  %v1932_v1 = vsel %vm1597_vm2, %v1833_v12, 0.0 }
 0x24c   :  { %v4116_v40 = vsub.f32 %v5446_v52, %v3827_v56  ;;  %v5452_v52 = vld [vmem:[#allocation8_spill] sm:$0xff] }
 0x24d   :  { %v1921_v45 = vadd.f32 %v1920_v7, %v1919_v47  ;;  %v1832_v47 = vmul.f32 %v4102_v34, %v4102_v34  ;;  %v5448_v7 = vld [vmem:[#allocation6_spill] sm:$0xff] }
 0x24e   :  { %5447 = vst [vmem:[#allocation3_spill] sm:$0xff] %v4116_v40 }
 0x24f   :  { %v1923_v14 = vadd.f32 %v1922_v33, %v1921_v45  ;;  %v4123_v45 = vsub.f32 %v5448_v7, %v3827_v56  ;;  %v1930_v10 = vsel %vm1597_vm2, %v1832_v47, 0.0 }
 0x251   :  { %v1925_v54 = vadd.f32 %v1924_v17, %v1923_v14  ;;  %5449 = vst [vmem:[#allocation4_spill] sm:$0xff] %v4123_v45  ;;  %v5450_v14 = vld [vmem:[#allocation7_spill] sm:$0xff]  ;;  %v1834_v17 = vmul.f32 %v4116_v40, %v4116_v40  ;;  %v1835_v7 = vmul.f32 %v4123_v45, %v4123_v45 }
 0x252   :  { %v4130_v20 = vsub.f32 %v5450_v14, %v3827_v56 }
 0x253   :  { %v1927_v30 = vadd.f32 %v1926_v18, %v1925_v54  ;;  %v4137_v18 = vsub.f32 %v5452_v52, %v3827_v56  ;;  %v1934_v47 = vsel %vm1597_vm2, %v1834_v17, 0.0  ;;  %v1936_v12 = vsel %vm1597_vm2, %v1835_v7, 0.0 }
 0x254   :  { %5451 = vst [vmem:[#allocation5_spill] sm:$0xff] %v4130_v20  ;;  %v1836_v40 = vmul.f32 %v4130_v20, %v4130_v20 }
 0x255   :  { %v1929_v33 = vadd.f32 %v1928_v39, %v1927_v30  ;;  %5453 = vst [vmem:[#allocation6_spill] sm:$0xff] %v4137_v18  ;;  %v5454_v39 = vld [vmem:[#allocation9_spill] sm:$0xff]  ;;  %v1837_v45 = vmul.f32 %v4137_v18, %v4137_v18 }
 0x256   :  { %v4144_v14 = vsub.f32 %v5454_v39, %v3827_v56  ;;  %v1938_v17 = vsel %vm1597_vm2, %v1836_v40, 0.0 }
 0x257   :  { %v1931_v54 = vadd.f32 %v1930_v10, %v1929_v33  ;;  %v5456_v10 = vld [vmem:[#allocation10_spill] sm:$0xff]  ;;  %v1940_v7 = vsel %vm1597_vm2, %v1837_v45, 0.0 }
 0x258   :  { %5455 = vst [vmem:[#allocation7_spill] sm:$0xff] %v4144_v14  ;;  %v4151_v52 = vsub.f32 %v5456_v10, %v3827_v56  ;;  %v1838_v20 = vmul.f32 %v4144_v14, %v4144_v14 }
 0x259   :  { %v1933_v30 = vadd.f32 %v1932_v1, %v1931_v54  ;;  %v5458_v1 = vld [vmem:[#allocation11_spill] sm:$0xff] }
 0x25a   :  { %5457 = vst [vmem:[#allocation8_spill] sm:$0xff] %v4151_v52  ;;  %v4158_v39 = vsub.f32 %v5458_v1, %v3827_v56  ;;  %v1839_v18 = vmul.f32 %v4151_v52, %v4151_v52  ;;  %v1942_v40 = vsel %vm1597_vm2, %v1838_v20, 0.0 }
 0x25b   :  { %v1935_v33 = vadd.f32 %v1934_v47, %v1933_v30  ;;  %v5460_v47 = vld [vmem:[#allocation12_spill] sm:$0xff] }
 0x25c   :  { %5459 = vst [vmem:[#allocation9_spill] sm:$0xff] %v4158_v39  ;;  %v4165_v10 = vsub.f32 %v5460_v47, %v3827_v56  ;;  %v1840_v14 = vmul.f32 %v4158_v39, %v4158_v39  ;;  %v1944_v45 = vsel %vm1597_vm2, %v1839_v18, 0.0 }
 0x25d   :  { %v1937_v54 = vadd.f32 %v1936_v12, %v1935_v33  ;;  %v5462_v12 = vld [vmem:[#allocation13_spill] sm:$0xff] }
 0x25e   :  { %5461 = vst [vmem:[#allocation10_spill] sm:$0xff] %v4165_v10  ;;  %v4172_v1 = vsub.f32 %v5462_v12, %v3827_v56  ;;  %v1841_v52 = vmul.f32 %v4165_v10, %v4165_v10  ;;  %v1946_v20 = vsel %vm1597_vm2, %v1840_v14, 0.0 }
 0x25f   :  { %v1939_v30 = vadd.f32 %v1938_v17, %v1937_v54  ;;  %v5464_v17 = vld [vmem:[#allocation14_spill] sm:$0xff] }
 0x260   :  { %5463 = vst [vmem:[#allocation11_spill] sm:$0xff] %v4172_v1  ;;  %v4179_v47 = vsub.f32 %v5464_v17, %v3827_v56  ;;  %v1842_v39 = vmul.f32 %v4172_v1, %v4172_v1  ;;  %v1948_v18 = vsel %vm1597_vm2, %v1841_v52, 0.0 }
 0x261   :  { %v1941_v33 = vadd.f32 %v1940_v7, %v1939_v30  ;;  %v5466_v7 = vld [vmem:[#allocation15_spill] sm:$0xff] }
 0x262   :  { %5465 = vst [vmem:[#allocation12_spill] sm:$0xff] %v4179_v47  ;;  %v4186_v12 = vsub.f32 %v5466_v7, %v3827_v56  ;;  %v1843_v10 = vmul.f32 %v4179_v47, %v4179_v47  ;;  %v1950_v14 = vsel %vm1597_vm2, %v1842_v39, 0.0 }
 0x263   :  { %v1943_v54 = vadd.f32 %v1942_v40, %v1941_v33  ;;  %v5468_v40 = vld [vmem:[#allocation16_spill] sm:$0xff] }
 0x264   :  { %5467 = vst [vmem:[#allocation13_spill] sm:$0xff] %v4186_v12  ;;  %v4193_v17 = vsub.f32 %v5468_v40, %v3827_v56  ;;  %v1844_v1 = vmul.f32 %v4186_v12, %v4186_v12  ;;  %v1952_v52 = vsel %vm1597_vm2, %v1843_v10, 0.0 }
 0x265   :  { %v1945_v30 = vadd.f32 %v1944_v45, %v1943_v54  ;;  %v5470_v45 = vld [vmem:[#allocation17_spill] sm:$0xff] }
 0x266   :  { %5469 = vst [vmem:[#allocation14_spill] sm:$0xff] %v4193_v17  ;;  %v4200_v7 = vsub.f32 %v5470_v45, %v3827_v56  ;;  %v1845_v47 = vmul.f32 %v4193_v17, %v4193_v17  ;;  %v1954_v39 = vsel %vm1597_vm2, %v1844_v1, 0.0 }
 0x267   :  { %v1947_v33 = vadd.f32 %v1946_v20, %v1945_v30  ;;  %v5472_v20 = vld [vmem:[#allocation18_spill] sm:$0xff] }
 0x268   :  { %5471 = vst [vmem:[#allocation15_spill] sm:$0xff] %v4200_v7  ;;  %v4207_v40 = vsub.f32 %v5472_v20, %v3827_v56  ;;  %v1846_v12 = vmul.f32 %v4200_v7, %v4200_v7  ;;  %v1956_v10 = vsel %vm1597_vm2, %v1845_v47, 0.0 }
 0x269   :  { %v1949_v54 = vadd.f32 %v1948_v18, %v1947_v33  ;;  %v5473_v18 = vld [vmem:[#allocation19_spill] sm:$0xff] }
 0x26a   :  { %v4214_v45 = vsub.f32 %v5473_v18, %v3827_v56  ;;  %v1847_v17 = vmul.f32 %v4207_v40, %v4207_v40  ;;  %v1958_v1 = vsel %vm1597_vm2, %v1846_v12, 0.0  ;;  %v1852_v12 = vmul.f32 %v3835_v28, %v3835_v28 }
 0x26b   :  { %v1951_v30 = vadd.f32 %v1950_v14, %v1949_v54  ;;  %v5475_v14 = vld [vmem:[#allocation20_spill] sm:$0xff] }
 0x26c   :  { %5474 = vst [vmem:[#allocation16_spill] sm:$0xff] %v4214_v45  ;;  %v4221_v20 = vsub.f32 %v5475_v14, %v3827_v56  ;;  %v1848_v7 = vmul.f32 %v4214_v45, %v4214_v45  ;;  %v1960_v14 = vsel %vm1597_vm2, %v1847_v17, 0.0  ;;  %v1853_v17 = vmul.f32 %v3839_v38, %v3839_v38 }
 0x26d   :  { %v1953_v33 = vadd.f32 %v1952_v52, %v1951_v30  ;;  %v5476_v52 = vld [vmem:[#allocation21_spill] sm:$0xff] }
 0x26e   :  { %v4228_v18 = vsub.f32 %v5476_v52, %v3827_v56  ;;  %v1851_v56 = vmul.f32 %v3831_v22, %v3831_v22 }
 0x26f   :  { %v1955_v54 = vadd.f32 %v1954_v39, %v1953_v33  ;;  %v1849_v39 = vmul.f32 %v4221_v20, %v4221_v20 }
 0x270   :  { %v1850_v47 = vmul.f32 %v4228_v18, %v4228_v18 }
 0x271   :  { %v1957_v30 = vadd.f32 %v1956_v10, %v1955_v54  ;;  %v1962_v54 = vsel %vm1597_vm2, %v1848_v7, 0.0  ;;  %v1964_v52 = vsel %vm1597_vm2, %v1849_v39, 0.0  ;;  %v1970_v7 = vsel %vm1597_vm2, %v1852_v12, 0.0 }
 0x272   :  { %v1855_v39 = vmul.f32 %v3846_v63, %v3846_v63  ;;  %v1858_v12 = vmul.f32 %v3855_v36, %v3855_v36 }
 0x273   :  { %v1959_v33 = vadd.f32 %v1958_v1, %v1957_v30  ;;  %v1966_v30 = vsel %vm1597_vm2, %v1850_v47, 0.0 }
 0x275   :  { %v1961_v29 = vadd.f32 %v1960_v14, %v1959_v33  ;;  %v1968_v33 = vsel %vm1597_vm2, %v1851_v56, 0.0  ;;  %v1857_v56 = vmul.f32 %v3852_v51, %v3852_v51 }
 0x277   :  { %v1963_v10 = vadd.f32 %v1962_v54, %v1961_v29  ;;  %v1854_v29 = vmul.f32 %v3843_v37, %v3843_v37 }
 0x279   :  { %v1965_v45 = vadd.f32 %v1964_v52, %v1963_v10  ;;  %v1972_v10 = vsel %vm1597_vm2, %v1853_v17, 0.0  ;;  %v1974_v47 = vsel %vm1597_vm2, %v1854_v29, 0.0  ;;  %v1859_v17 = vmul.f32 %v3858_v58, %v3858_v58 }
 0x27a   :  { %v1860_v29 = vmul.f32 %v3861_v24, %v3861_v24 }
 0x27b   :  { %v1967_v1 = vadd.f32 %v1966_v30, %v1965_v45  ;;  %v1856_v45 = vmul.f32 %v3849_v8, %v3849_v8 }
 0x27d   :  { %v1969_v14 = vadd.f32 %v1968_v33, %v1967_v1  ;;  %v1976_v1 = vsel %vm1597_vm2, %v1855_v39, 0.0  ;;  %v1984_v39 = vsel %vm1597_vm2, %v1859_v17, 0.0 }
 0x27f   :  { %v1971_v54 = vadd.f32 %v1970_v7, %v1969_v14  ;;  %v1978_v14 = vsel %vm1597_vm2, %v1856_v45, 0.0 }
 0x281   :  { %v1973_v52 = vadd.f32 %v1972_v10, %v1971_v54  ;;  %v1980_v54 = vsel %vm1597_vm2, %v1857_v56, 0.0 }
 0x283   :  { %v1975_v30 = vadd.f32 %v1974_v47, %v1973_v52  ;;  %v1982_v52 = vsel %vm1597_vm2, %v1858_v12, 0.0 }
 0x285   :  { %v1977_v33 = vadd.f32 %v1976_v1, %v1975_v30  ;;  %v1986_v1 = vsel %vm1597_vm2, %v1860_v29, 0.0  ;;  %v5479_v29 = vld [vmem:[#allocation4_spill] sm:$0xff] }
 0x287   :  { %v1979_v7 = vadd.f32 %v1978_v14, %v1977_v33 }
 0x289   :  { %v1981_v10 = vadd.f32 %v1980_v54, %v1979_v7 }
 0x28b   :  { %v1983_v47 = vadd.f32 %v1982_v52, %v1981_v10  ;;  %v5478_v10 = vld [vmem:[#allocation3_spill] sm:$0xff]  ;;  %v5480_v52 = vld [vmem:[#allocation5_spill] sm:$0xff] }
 0x28d   :  { %v1985_v30 = vadd.f32 %v1984_v39, %v1983_v47  ;;  %v5481_v47 = vld [vmem:[#allocation6_spill] sm:$0xff]  ;;  %v5482_v39 = vld [vmem:[#allocation7_spill] sm:$0xff] }
 0x28f   :  { %v1987_v36 = vadd.f32 %v1986_v1, %v1985_v30  ;;  %v5483_v1 = vld [vmem:[#allocation8_spill] sm:$0xff] }
 0x291   :  { %v1988_v45 = vrot.slane %v1987_v36, 4 }
 0x293   :  { %v1989_v33 = vadd.f32 %v1988_v45, %v1987_v36 }
 0x295   :  { %v1990_v14 = vrot.slane %v1989_v33, 2 }
 0x297   :  { %v1991_v51 = vadd.f32 %v1990_v14, %v1989_v33  ;;  %v5484_v33 = vld [vmem:[#allocation9_spill] sm:$0xff] }
 0x299   :  { %v1992_v58 = vrot.slane %v1991_v51, 1 }
 0x29b   :  { %v1993_v8 = vadd.f32 %v1992_v58, %v1991_v51 }
 0x29d   :  { %v1994_v56 = vmul.f32 0.001953125, %v1993_v8 }
 0x29f   :  { %v1995_v7 = vadd.f32 1e-05, %v1994_v56  ;;  %v5486_v56 = vld [vmem:[#allocation10_spill] sm:$0xff] }
 0x2a1   :  { %2442 = vrsqrt.f32 %v1995_v7 }
 0x2ab   :  { %v4271_v54 = vpop.eup %2442 }
 0x2ac   :  { %v4275_v12 = vmul.f32 %v4271_v54, %v3865_v5  ;;  %v4279_v17 = vmul.f32 %v4271_v54, %v3869_v41  ;;  %v4283_v36 = vmul.f32 %v4271_v54, %v3873_v2  ;;  %v4287_v51 = vmul.f32 %v4271_v54, %v3877_v3 }
 0x2ad   :  { %v4291_v8 = vmul.f32 %v4271_v54, %v3885_v43  ;;  %v4295_v58 = vmul.f32 %v4271_v54, %v3891_v9  ;;  %v4299_v5 = vmul.f32 %v4271_v54, %v3899_v55  ;;  %v4303_v41 = vmul.f32 %v4271_v54, %v3906_v49 }
 0x2ae   :  { %v4307_v2 = vmul.f32 %v4271_v54, %v3913_v6  ;;  %v4311_v3 = vmul.f32 %v4271_v54, %v3920_v13  ;;  %v4315_v43 = vmul.f32 %v4271_v54, %v3927_v27  ;;  %v4319_v9 = vmul.f32 %v4271_v54, %v3934_v32 }
 0x2af   :  { %v4323_v55 = vmul.f32 %v4271_v54, %v3941_v42  ;;  %v4327_v49 = vmul.f32 %v4271_v54, %v3948_v48  ;;  %v4331_v6 = vmul.f32 %v4271_v54, %v3955_v59  ;;  %v4335_v13 = vmul.f32 %v4271_v54, %v3962_v0 }
 0x2b0   :  { %v4339_v27 = vmul.f32 %v4271_v54, %v3969_v11  ;;  %v4343_v32 = vmul.f32 %v4271_v54, %v3976_v19  ;;  %v4347_v42 = vmul.f32 %v4271_v54, %v3983_v35  ;;  %v4351_v48 = vmul.f32 %v4271_v54, %v3990_v44 }
 0x2b1   :  { %v4355_v59 = vmul.f32 %v4271_v54, %v3997_v61  ;;  %v4359_v0 = vmul.f32 %v4271_v54, %v4004_v4  ;;  %v4363_v11 = vmul.f32 %v4271_v54, %v4011_v23  ;;  %v4367_v19 = vmul.f32 %v4271_v54, %v4018_v31 }
 0x2b2   :  { %v4371_v35 = vmul.f32 %v4271_v54, %v4025_v53  ;;  %v4375_v44 = vmul.f32 %v4271_v54, %v4032_v60  ;;  %v4379_v61 = vmul.f32 %v4271_v54, %v4039_v16  ;;  %v4383_v4 = vmul.f32 %v4271_v54, %v4046_v25 }
 0x2b3   :  { %v4387_v23 = vmul.f32 %v4271_v54, %v4053_v46  ;;  %v4391_v31 = vmul.f32 %v4271_v54, %v4060_v57  ;;  %v4395_v53 = vmul.f32 %v4271_v54, %v4067_v15  ;;  %v4399_v60 = vmul.f32 %v4271_v54, %v4074_v26  ;;  %v5477_v15 = vld [vmem:[#allocation2_spill] sm:$0xff] }
 0x2b4   :  { %v4403_v16 = vmul.f32 %v4271_v54, %v4081_v50  ;;  %v4407_v25 = vmul.f32 %v4271_v54, %v4088_v62  ;;  %v4411_v46 = vmul.f32 %v4271_v54, %v4095_v21  ;;  %v4415_v57 = vmul.f32 %v4271_v54, %v4102_v34 }
 0x2b5   :  { %v4419_v26 = vmul.f32 %v4271_v54, %v5477_v15  ;;  %v4423_v50 = vmul.f32 %v4271_v54, %v5478_v10  ;;  %v4427_v62 = vmul.f32 %v4271_v54, %v5479_v29  ;;  %v4431_v21 = vmul.f32 %v4271_v54, %v5480_v52  ;;  %v5487_v15 = vld [vmem:[#allocation11_spill] sm:$0xff]  ;;  %v5489_v29 = vld [vmem:[#allocation12_spill] sm:$0xff] }
 0x2b6   :  { %v4435_v34 = vmul.f32 %v4271_v54, %v5481_v47  ;;  %v4439_v30 = vmul.f32 %v4271_v54, %v5482_v39  ;;  %v4443_v45 = vmul.f32 %v4271_v54, %v5483_v1  ;;  %v4447_v14 = vmul.f32 %v4271_v54, %v5484_v33  ;;  %v5490_v47 = vld [vmem:[#allocation13_spill] sm:$0xff]  ;;  %v5491_v1 = vld [vmem:[#allocation14_spill] sm:$0xff] }
 0x2b7   :  { %v4451_v7 = vmul.f32 %v4271_v54, %v5486_v56  ;;  %v4455_v10 = vmul.f32 %v4271_v54, %v5487_v15  ;;  %v4459_v52 = vmul.f32 %v4271_v54, %v5489_v29  ;;  %v4463_v39 = vmul.f32 %v4271_v54, %v5490_v47 }
 0x2b8   :  { %5485 = vst [vmem:[#allocation17_spill] sm:$0xff] %v4447_v14  ;;  %v4467_v33 = vmul.f32 %v4271_v54, %v5491_v1  ;;  %v5492_v14 = vld [vmem:[#allocation15_spill] sm:$0xff]  ;;  %v4475_v15 = vmul.f32 %v4271_v54, %v4207_v40  ;;  %v4483_v47 = vmul.f32 %v4271_v54, %v4221_v20  ;;  %v4487_v1 = vmul.f32 %v4271_v54, %v4228_v18 }
 0x2b9   :  { %5488 = vst [vmem:[#allocation18_spill] sm:$0xff] %v4455_v10  ;;  %v4471_v56 = vmul.f32 %v4271_v54, %v5492_v14  ;;  %v5493_v10 = vld [vmem:[#allocation16_spill] sm:$0xff]  ;;  %v4491_v14 = vmul.f32 %v4271_v54, %v3831_v22  ;;  %v4495_v40 = vmul.f32 %v4271_v54, %v3835_v28  ;;  %v4504_v20 = vmul.f32 %v4271_v54, %v3839_v38 }
 0x2ba   :  { %v4479_v29 = vmul.f32 %v4271_v54, %v5493_v10  ;;  %5494 = vst [vmem:[#allocation19_spill] sm:$0xff] %v4483_v47  ;;  %5495 = vst [vmem:[#allocation20_spill] sm:$0xff] %v4487_v1  ;;  %v4500_v10 = vld [vmem:[%s5376_s5] ss:$0 sm:$0xff]  ;;  %v4508_v18 = vmul.f32 %v4271_v54, %v3843_v37  ;;  %v4512_v22 = vmul.f32 %v4271_v54, %v3846_v63  ;;  %v5501_v47 = vld [vmem:[#allocation24_spill] sm:$0xff] }
 0x2bb   :  { %5496 = vst [vmem:[#allocation21_spill] sm:$0xff] %v4491_v14  ;;  %5497 = vst [vmem:[#allocation2_spill] sm:$0xff] %v4495_v40  ;;  %v5499_v14 = vld [vmem:[#allocation22_spill] sm:$0xff]  ;;  %v5500_v40 = vld [vmem:[#allocation23_spill] sm:$0xff]  ;;  %v4524_v38 = vmul.f32 %v4271_v54, %v5501_v47  ;;  %v4532_v63 = vmul.f32 %v4271_v54, %v3861_v24  ;;  %v4544_v47 = vmul.f32 %v4500_v10, %v4283_v36 }
 0x2bc   :  { %5498 = vst [vmem:[#allocation3_spill] sm:$0xff] %v4504_v20  ;;  %v4516_v28 = vmul.f32 %v4271_v54, %v5499_v14  ;;  %v4520_v1 = vmul.f32 %v4271_v54, %v5500_v40  ;;  %v5502_v20 = vld [vmem:[#allocation25_spill] sm:$0xff]  ;;  %v4536_v14 = vmul.f32 %v4500_v10, %v4275_v12  ;;  %v4540_v40 = vmul.f32 %v4500_v10, %v4279_v17 }
 0x2bd   :  { %v4528_v37 = vmul.f32 %v4271_v54, %v5502_v20  ;;  %v4548_v20 = vmul.f32 %v4500_v10, %v4287_v51  ;;  %v4552_v24 = vmul.f32 %v4500_v10, %v4291_v8  ;;  %v4556_v54 = vmul.f32 %v4500_v10, %v4295_v58 }
 0x2be   :  { %v4560_v12 = vmul.f32 %v4500_v10, %v4299_v5  ;;  %v4564_v17 = vmul.f32 %v4500_v10, %v4303_v41  ;;  %v4568_v36 = vmul.f32 %v4500_v10, %v4307_v2  ;;  %v4572_v51 = vmul.f32 %v4500_v10, %v4311_v3 }
 0x2bf   :  { %v4576_v8 = vmul.f32 %v4500_v10, %v4315_v43  ;;  %v4580_v58 = vmul.f32 %v4500_v10, %v4319_v9  ;;  %v4584_v5 = vmul.f32 %v4500_v10, %v4323_v55  ;;  %v4588_v41 = vmul.f32 %v4500_v10, %v4327_v49 }
 0x2c0   :  { %v4592_v2 = vmul.f32 %v4500_v10, %v4331_v6  ;;  %v4596_v3 = vmul.f32 %v4500_v10, %v4335_v13  ;;  %v4600_v43 = vmul.f32 %v4500_v10, %v4339_v27  ;;  %v4604_v9 = vmul.f32 %v4500_v10, %v4343_v32 }
 0x2c1   :  { %v4608_v55 = vmul.f32 %v4500_v10, %v4347_v42  ;;  %v4612_v49 = vmul.f32 %v4500_v10, %v4351_v48  ;;  %v4616_v6 = vmul.f32 %v4500_v10, %v4355_v59  ;;  %v4620_v13 = vmul.f32 %v4500_v10, %v4359_v0 }
 0x2c2   :  { %v4624_v27 = vmul.f32 %v4500_v10, %v4363_v11  ;;  %v4628_v32 = vmul.f32 %v4500_v10, %v4367_v19  ;;  %v4632_v42 = vmul.f32 %v4500_v10, %v4371_v35  ;;  %v4636_v48 = vmul.f32 %v4500_v10, %v4375_v44 }
 0x2c3   :  { %v4640_v59 = vmul.f32 %v4500_v10, %v4379_v61  ;;  %v4644_v0 = vmul.f32 %v4500_v10, %v4383_v4  ;;  %v4648_v11 = vmul.f32 %v4500_v10, %v4387_v23  ;;  %v4652_v19 = vmul.f32 %v4500_v10, %v4391_v31 }
 0x2c4   :  { %v4656_v35 = vmul.f32 %v4500_v10, %v4395_v53  ;;  %v4660_v44 = vmul.f32 %v4500_v10, %v4399_v60  ;;  %v4664_v61 = vmul.f32 %v4500_v10, %v4403_v16  ;;  %v4668_v4 = vmul.f32 %v4500_v10, %v4407_v25 }
 0x2c5   :  { %v4672_v23 = vmul.f32 %v4500_v10, %v4411_v46  ;;  %v4676_v31 = vmul.f32 %v4500_v10, %v4415_v57  ;;  %v4680_v53 = vmul.f32 %v4500_v10, %v4419_v26  ;;  %v4684_v60 = vmul.f32 %v4500_v10, %v4423_v50  ;;  %v5504_v50 = vld [vmem:[#allocation17_spill] sm:$0xff] }
 0x2c6   :  { %v4688_v16 = vmul.f32 %v4500_v10, %v4427_v62  ;;  %v4692_v25 = vmul.f32 %v4500_v10, %v4431_v21  ;;  %v4696_v46 = vmul.f32 %v4500_v10, %v4435_v34  ;;  %v4700_v57 = vmul.f32 %v4500_v10, %v4439_v30 }
 0x2c7   :  { %v4704_v26 = vmul.f32 %v4500_v10, %v4443_v45  ;;  %v4708_v62 = vmul.f32 %v4500_v10, %v5504_v50  ;;  %v4712_v21 = vmul.f32 %v4500_v10, %v4451_v7  ;;  %v4720_v30 = vmul.f32 %v4500_v10, %v4459_v52 }
 0x2c8   :  { %5503 = vst [vmem:[#allocation4_spill] sm:$0xff] %v4692_v25  ;;  %v5505_v25 = vld [vmem:[#allocation18_spill] sm:$0xff]  ;;  %v4724_v45 = vmul.f32 %v4500_v10, %v4463_v39  ;;  %v4728_v50 = vmul.f32 %v4500_v10, %v4467_v33  ;;  %v4732_v7 = vmul.f32 %v4500_v10, %v4471_v56  ;;  %v4740_v52 = vmul.f32 %v4500_v10, %v4479_v29 }
 0x2c9   :  { %v4716_v34 = vmul.f32 %v4500_v10, %v5505_v25  ;;  %5506 = vst [vmem:[#allocation5_spill] sm:$0xff] %v4720_v30  ;;  %v4736_v25 = vmul.f32 %v4500_v10, %v4475_v15  ;;  %v5511_v30 = vld [vmem:[#allocation19_spill] sm:$0xff]  ;;  %v4761_v29 = vld [vmem:[%s5377_s6] ss:$0 sm:$0xff] }
 0x2ca   :  { %5507 = vst [vmem:[#allocation6_spill] sm:$0xff] %v4724_v45  ;;  %5508 = vst [vmem:[#allocation7_spill] sm:$0xff] %v4728_v50  ;;  %v4744_v39 = vmul.f32 %v4500_v10, %v5511_v30  ;;  %v5512_v45 = vld [vmem:[#allocation20_spill] sm:$0xff]  ;;  %v5513_v50 = vld [vmem:[#allocation21_spill] sm:$0xff] }
 0x2cb   :  { %5509 = vst [vmem:[#allocation8_spill] sm:$0xff] %v4732_v7  ;;  %5510 = vst [vmem:[#allocation9_spill] sm:$0xff] %v4740_v52  ;;  %v4748_v33 = vmul.f32 %v4500_v10, %v5512_v45  ;;  %v4752_v56 = vmul.f32 %v4500_v10, %v5513_v50  ;;  %v5514_v7 = vld [vmem:[#allocation2_spill] sm:$0xff]  ;;  %v5516_v52 = vld [vmem:[#allocation3_spill] sm:$0xff]  ;;  %v4769_v45 = vmul.f32 %v4500_v10, %v4508_v18 }
 0x2cc   :  { %v4756_v15 = vmul.f32 %v4500_v10, %v5514_v7  ;;  %v4765_v30 = vmul.f32 %v4500_v10, %v5516_v52  ;;  %v4773_v50 = vmul.f32 %v4500_v10, %v4512_v22  ;;  %v4777_v7 = vmul.f32 %v4500_v10, %v4516_v28 }
 0x2cd   :  { %v4785_v52 = vmul.f32 %v4500_v10, %v4524_v38  ;;  %v4789_v18 = vmul.f32 %v4500_v10, %v4528_v37  ;;  %v4793_v22 = vmul.f32 %v4500_v10, %v4532_v63  ;;  %v4797_v28 = vadd.f32 %v4761_v29, %v4536_v14 }
 0x2ce   :  { %5515 = vst [vmem:[#allocation10_spill] sm:$0xff] %v4756_v15  ;;  %v4781_v15 = vmul.f32 %v4500_v10, %v4520_v1  ;;  %v4801_v1 = vadd.f32 %v4761_v29, %v4540_v40  ;;  %v4805_v38 = vadd.f32 %v4761_v29, %v4544_v47  ;;  %v4809_v37 = vadd.f32 %v4761_v29, %v4548_v20 }
 0x2cf   :  { %v4813_v10 = vadd.f32 %v4761_v29, %v4552_v24  ;;  %v4817_v63 = vadd.f32 %v4761_v29, %v4556_v54  ;;  %v4821_v14 = vadd.f32 %v4761_v29, %v4560_v12  ;;  %v4825_v40 = vadd.f32 %v4761_v29, %v4564_v17 }
 0x2d0   :  { %v4829_v47 = vadd.f32 %v4761_v29, %v4568_v36  ;;  %v4833_v20 = vadd.f32 %v4761_v29, %v4572_v51  ;;  %v4837_v24 = vadd.f32 %v4761_v29, %v4576_v8  ;;  %v4841_v54 = vadd.f32 %v4761_v29, %v4580_v58 }
 0x2d1   :  { %v4845_v12 = vadd.f32 %v4761_v29, %v4584_v5  ;;  %v4849_v17 = vadd.f32 %v4761_v29, %v4588_v41  ;;  %v4853_v36 = vadd.f32 %v4761_v29, %v4592_v2  ;;  %v4857_v51 = vadd.f32 %v4761_v29, %v4596_v3 }
 0x2d2   :  { %v4861_v8 = vadd.f32 %v4761_v29, %v4600_v43  ;;  %v4865_v58 = vadd.f32 %v4761_v29, %v4604_v9  ;;  %v4869_v5 = vadd.f32 %v4761_v29, %v4608_v55  ;;  %v4873_v41 = vadd.f32 %v4761_v29, %v4612_v49 }
 0x2d3   :  { %v4877_v2 = vadd.f32 %v4761_v29, %v4616_v6  ;;  %v4881_v3 = vadd.f32 %v4761_v29, %v4620_v13  ;;  %v4885_v43 = vadd.f32 %v4761_v29, %v4624_v27  ;;  %v4889_v9 = vadd.f32 %v4761_v29, %v4628_v32 }
 0x2d4   :  { %v4893_v55 = vadd.f32 %v4761_v29, %v4632_v42  ;;  %v4897_v49 = vadd.f32 %v4761_v29, %v4636_v48  ;;  %v4901_v6 = vadd.f32 %v4761_v29, %v4640_v59  ;;  %v4905_v13 = vadd.f32 %v4761_v29, %v4644_v0 }
 0x2d5   :  { %v4909_v27 = vadd.f32 %v4761_v29, %v4648_v11  ;;  %v4913_v32 = vadd.f32 %v4761_v29, %v4652_v19  ;;  %v4917_v42 = vadd.f32 %v4761_v29, %v4656_v35  ;;  %v4921_v48 = vadd.f32 %v4761_v29, %v4660_v44 }
 0x2d6   :  { %v4925_v59 = vadd.f32 %v4761_v29, %v4664_v61  ;;  %v4929_v0 = vadd.f32 %v4761_v29, %v4668_v4  ;;  %v4933_v11 = vadd.f32 %v4761_v29, %v4672_v23  ;;  %v4937_v19 = vadd.f32 %v4761_v29, %v4676_v31  ;;  %v5517_v4 = vld [vmem:[#allocation4_spill] sm:$0xff] }
 0x2d7   :  { %v4941_v35 = vadd.f32 %v4761_v29, %v4680_v53  ;;  %v4945_v44 = vadd.f32 %v4761_v29, %v4684_v60  ;;  %v4949_v61 = vadd.f32 %v4761_v29, %v4688_v16  ;;  %v4953_v23 = vadd.f32 %v4761_v29, %v5517_v4 }
 0x2d8   :  { %v4957_v31 = vadd.f32 %v4761_v29, %v4696_v46  ;;  %v4961_v53 = vadd.f32 %v4761_v29, %v4700_v57  ;;  %v4965_v60 = vadd.f32 %v4761_v29, %v4704_v26  ;;  %v4969_v16 = vadd.f32 %v4761_v29, %v4708_v62 }
 0x2d9   :  { %v4973_v4 = vadd.f32 %v4761_v29, %v4712_v21  ;;  %v4977_v46 = vadd.f32 %v4761_v29, %v4716_v34  ;;  %v4997_v34 = vadd.f32 %v4761_v29, %v4736_v25 }
 0x2da   :  { %5518 = vst [vmem:[#allocation11_spill] sm:$0xff] %v4957_v31  ;;  %5519 = vst [vmem:[#allocation12_spill] sm:$0xff] %v4961_v53  ;;  %v5523_v31 = vld [vmem:[#allocation5_spill] sm:$0xff]  ;;  %v5524_v53 = vld [vmem:[#allocation6_spill] sm:$0xff] }
 0x2db   :  { %5520 = vst [vmem:[#allocation13_spill] sm:$0xff] %v4965_v60  ;;  %5521 = vst [vmem:[#allocation14_spill] sm:$0xff] %v4969_v16  ;;  %v4981_v57 = vadd.f32 %v4761_v29, %v5523_v31  ;;  %v4985_v26 = vadd.f32 %v4761_v29, %v5524_v53  ;;  %v5525_v60 = vld [vmem:[#allocation7_spill] sm:$0xff]  ;;  %v5526_v16 = vld [vmem:[#allocation8_spill] sm:$0xff]  ;;  %v5005_v53 = vadd.f32 %v4761_v29, %v4744_v39 }
 0x2dc   :  { %5522 = vst [vmem:[#allocation15_spill] sm:$0xff] %v4977_v46  ;;  %v4989_v62 = vadd.f32 %v4761_v29, %v5525_v60  ;;  %v4993_v21 = vadd.f32 %v4761_v29, %v5526_v16  ;;  %v5528_v46 = vld [vmem:[#allocation9_spill] sm:$0xff]  ;;  %v5009_v60 = vadd.f32 %v4761_v29, %v4748_v33  ;;  %v5013_v16 = vadd.f32 %v4761_v29, %v4752_v56 }
 0x2dd   :  { %v5001_v31 = vadd.f32 %v4761_v29, %v5528_v46  ;;  %v5021_v46 = vadd.f32 %v4761_v29, %v4765_v30  ;;  %v5025_v39 = vadd.f32 %v4761_v29, %v4769_v45  ;;  %v5029_v33 = vadd.f32 %v4761_v29, %v4773_v50 }
 0x2de   :  { %5527 = vst [vmem:[#allocation16_spill] sm:$0xff] %v4993_v21  ;;  %v5529_v21 = vld [vmem:[#allocation10_spill] sm:$0xff]  ;;  %v5033_v56 = vadd.f32 %v4761_v29, %v4777_v7  ;;  %v5041_v30 = vadd.f32 %v4761_v29, %v4785_v52  ;;  %v5045_v45 = vadd.f32 %v4761_v29, %v4789_v18  ;;  %v5049_v50 = vadd.f32 %v4761_v29, %v4793_v22 }
 0x2df   :  { %v5017_v25 = vadd.f32 %v4761_v29, %v5529_v21  ;;  %5530 = vst [vmem:[#allocation22_spill] sm:$0xff] %v5029_v33  ;;  %v5037_v21 = vadd.f32 %v4761_v29, %v4781_v15  ;;  %v2203_v33 = vmax.f32 %v4797_v28, 0.0  ;;  %v2204_v7 = vmax.f32 %v4801_v1, 0.0 }
 0x2e0   :  { %5531 = vst [vmem:[#allocation23_spill] sm:$0xff] %v5033_v56  ;;  %5533 = vst [vmem:[#allocation25_spill] sm:$0xff] %v5041_v30  ;;  %v2205_v56 = vmax.f32 %v4805_v38, 0.0  ;;  %v2206_v15 = vmax.f32 %v4809_v37, 0.0  ;;  %v2208_v52 = vmax.f32 %v4817_v63, 0.0  ;;  %v2209_v30 = vmax.f32 %v4821_v14, 0.0 }
 0x2e1   :  { %5532 = vst [vmem:[#allocation24_spill] sm:$0xff] %v5037_v21  ;;  %5534 = vst [vmem:[#allocation17_spill] sm:$0xff] %v5045_v45  ;;  %v2207_v21 = vmax.f32 %v4813_v10, 0.0  ;;  %v2210_v18 = vmax.f32 %v4825_v40, 0.0  ;;  %v2211_v45 = vmax.f32 %v4829_v47, 0.0  ;;  %v2212_v29 = vmax.f32 %v4833_v20, 0.0 }
 0x2e2   :  { %v2213_v22 = vmax.f32 %v4837_v24, 0.0  ;;  %v2214_v28 = vmax.f32 %v4841_v54, 0.0  ;;  %2267 = vst.msk [vmem:[%s5378_s7] sm:$0xff] %vm1597_vm2, %v2203_v33  ;;  %2268 = vst.msk [vmem:[%s5378_s7 + $0x8] sm:$0xff] %vm1597_vm2, %v2204_v7  ;;  %v2215_v1 = vmax.f32 %v4845_v12, 0.0  ;;  %v2216_v38 = vmax.f32 %v4849_v17, 0.0 }
 0x2e3   :  { %2269 = vst.msk [vmem:[%s5378_s7 + $0x10] sm:$0xff] %vm1597_vm2, %v2205_v56  ;;  %2270 = vst.msk [vmem:[%s5378_s7 + $0x18] sm:$0xff] %vm1597_vm2, %v2206_v15  ;;  %v2217_v37 = vmax.f32 %v4853_v36, 0.0  ;;  %v2218_v10 = vmax.f32 %v4857_v51, 0.0  ;;  %v2219_v63 = vmax.f32 %v4861_v8, 0.0  ;;  %v2220_v14 = vmax.f32 %v4865_v58, 0.0 }
 0x2e4   :  { %2271 = vst.msk [vmem:[%s5378_s7 + $0x20] sm:$0xff] %vm1597_vm2, %v2207_v21  ;;  %2272 = vst.msk [vmem:[%s5378_s7 + $0x28] sm:$0xff] %vm1597_vm2, %v2208_v52  ;;  %v2221_v40 = vmax.f32 %v4869_v5, 0.0  ;;  %v2222_v47 = vmax.f32 %v4873_v41, 0.0  ;;  %v2223_v20 = vmax.f32 %v4877_v2, 0.0  ;;  %v2224_v24 = vmax.f32 %v4881_v3, 0.0 }
 0x2e5   :  { %2273 = vst.msk [vmem:[%s5378_s7 + $0x30] sm:$0xff] %vm1597_vm2, %v2209_v30  ;;  %2274 = vst.msk [vmem:[%s5378_s7 + $0x38] sm:$0xff] %vm1597_vm2, %v2210_v18  ;;  %v2225_v54 = vmax.f32 %v4885_v43, 0.0  ;;  %v2226_v12 = vmax.f32 %v4889_v9, 0.0  ;;  %v2227_v17 = vmax.f32 %v4893_v55, 0.0  ;;  %v2228_v36 = vmax.f32 %v4897_v49, 0.0 }
 0x2e6   :  { %2275 = vst.msk [vmem:[%s5378_s7 + $0x40] sm:$0xff] %vm1597_vm2, %v2211_v45  ;;  %2276 = vst.msk [vmem:[%s5378_s7 + $0x48] sm:$0xff] %vm1597_vm2, %v2212_v29  ;;  %v2229_v51 = vmax.f32 %v4901_v6, 0.0  ;;  %v2230_v8 = vmax.f32 %v4905_v13, 0.0  ;;  %v2231_v58 = vmax.f32 %v4909_v27, 0.0  ;;  %v2232_v5 = vmax.f32 %v4913_v32, 0.0 }
 0x2e7   :  { %2277 = vst.msk [vmem:[%s5378_s7 + $0x50] sm:$0xff] %vm1597_vm2, %v2213_v22  ;;  %2278 = vst.msk [vmem:[%s5378_s7 + $0x58] sm:$0xff] %vm1597_vm2, %v2214_v28  ;;  %v2233_v41 = vmax.f32 %v4917_v42, 0.0  ;;  %v2234_v2 = vmax.f32 %v4921_v48, 0.0  ;;  %v2235_v3 = vmax.f32 %v4925_v59, 0.0  ;;  %v2236_v43 = vmax.f32 %v4929_v0, 0.0 }
 0x2e8   :  { %2279 = vst.msk [vmem:[%s5378_s7 + $0x60] sm:$0xff] %vm1597_vm2, %v2215_v1  ;;  %2280 = vst.msk [vmem:[%s5378_s7 + $0x68] sm:$0xff] %vm1597_vm2, %v2216_v38  ;;  %v2237_v9 = vmax.f32 %v4933_v11, 0.0  ;;  %v2238_v55 = vmax.f32 %v4937_v19, 0.0  ;;  %v2239_v49 = vmax.f32 %v4941_v35, 0.0  ;;  %v2240_v6 = vmax.f32 %v4945_v44, 0.0 }
 0x2e9   :  { %2281 = vst.msk [vmem:[%s5378_s7 + $0x70] sm:$0xff] %vm1597_vm2, %v2217_v37  ;;  %2282 = vst.msk [vmem:[%s5378_s7 + $0x78] sm:$0xff] %vm1597_vm2, %v2218_v10  ;;  %v2241_v13 = vmax.f32 %v4949_v61, 0.0  ;;  %v2242_v27 = vmax.f32 %v4953_v23, 0.0  ;;  %v5535_v32 = vld [vmem:[#allocation11_spill] sm:$0xff]  ;;  %v5536_v48 = vld [vmem:[#allocation12_spill] sm:$0xff] }
 0x2ea   :  { %2283 = vst.msk [vmem:[%s5378_s7 + $0x80] sm:$0xff] %vm1597_vm2, %v2219_v63  ;;  %2284 = vst.msk [vmem:[%s5378_s7 + $0x88] sm:$0xff] %vm1597_vm2, %v2220_v14  ;;  %v2243_v42 = vmax.f32 %v5535_v32, 0.0  ;;  %v2244_v59 = vmax.f32 %v5536_v48, 0.0  ;;  %v5537_v0 = vld [vmem:[#allocation13_spill] sm:$0xff]  ;;  %v5538_v19 = vld [vmem:[#allocation14_spill] sm:$0xff] }
 0x2eb   :  { %2285 = vst.msk [vmem:[%s5378_s7 + $0x90] sm:$0xff] %vm1597_vm2, %v2221_v40  ;;  %2286 = vst.msk [vmem:[%s5378_s7 + $0x98] sm:$0xff] %vm1597_vm2, %v2222_v47  ;;  %v2245_v11 = vmax.f32 %v5537_v0, 0.0  ;;  %v2246_v35 = vmax.f32 %v5538_v19, 0.0  ;;  %v2247_v44 = vmax.f32 %v4973_v4, 0.0  ;;  %v5539_v61 = vld [vmem:[#allocation15_spill] sm:$0xff] }
 0x2ec   :  { %2287 = vst.msk [vmem:[%s5378_s7 + $0xa0] sm:$0xff] %vm1597_vm2, %v2223_v20  ;;  %2288 = vst.msk [vmem:[%s5378_s7 + $0xa8] sm:$0xff] %vm1597_vm2, %v2224_v24  ;;  %v2248_v23 = vmax.f32 %v5539_v61, 0.0  ;;  %v2249_v33 = vmax.f32 %v4981_v57, 0.0  ;;  %v2250_v56 = vmax.f32 %v4985_v26, 0.0  ;;  %v2251_v4 = vmax.f32 %v4989_v62, 0.0 }
 0x2ed   :  { %2289 = vst.msk [vmem:[%s5378_s7 + $0xb0] sm:$0xff] %vm1597_vm2, %v2225_v54  ;;  %2290 = vst.msk [vmem:[%s5378_s7 + $0xb8] sm:$0xff] %vm1597_vm2, %v2226_v12  ;;  %v5540_v57 = vld [vmem:[#allocation16_spill] sm:$0xff]  ;;  %v2253_v21 = vmax.f32 %v4997_v34, 0.0  ;;  %v2254_v30 = vmax.f32 %v5001_v31, 0.0  ;;  %v2255_v62 = vmax.f32 %v5005_v53, 0.0 }
 0x2ee   :  { %2291 = vst.msk [vmem:[%s5378_s7 + $0xc0] sm:$0xff] %vm1597_vm2, %v2227_v17  ;;  %2292 = vst.msk [vmem:[%s5378_s7 + $0xc8] sm:$0xff] %vm1597_vm2, %v2228_v36  ;;  %v2252_v26 = vmax.f32 %v5540_v57, 0.0  ;;  %v2256_v34 = vmax.f32 %v5009_v60, 0.0  ;;  %v2257_v31 = vmax.f32 %v5013_v16, 0.0  ;;  %v2258_v45 = vmax.f32 %v5017_v25, 0.0 }
 0x2ef   :  { %2293 = vst.msk [vmem:[%s5378_s7 + $0xd0] sm:$0xff] %vm1597_vm2, %v2229_v51  ;;  %2294 = vst.msk [vmem:[%s5378_s7 + $0xd8] sm:$0xff] %vm1597_vm2, %v2230_v8  ;;  %v2259_v53 = vmax.f32 %v5021_v46, 0.0  ;;  %v2260_v60 = vmax.f32 %v5025_v39, 0.0  ;;  %v5541_v16 = vld [vmem:[#allocation22_spill] sm:$0xff]  ;;  %v5542_v7 = vld [vmem:[#allocation23_spill] sm:$0xff] }
 0x2f0   :  { %2295 = vst.msk [vmem:[%s5378_s7 + $0xe0] sm:$0xff] %vm1597_vm2, %v2231_v58  ;;  %2296 = vst.msk [vmem:[%s5378_s7 + $0xe8] sm:$0xff] %vm1597_vm2, %v2232_v5  ;;  %v2261_v25 = vmax.f32 %v5541_v16, 0.0  ;;  %v2262_v15 = vmax.f32 %v5542_v7, 0.0  ;;  %v5543_v46 = vld [vmem:[#allocation24_spill] sm:$0xff]  ;;  %v5544_v52 = vld [vmem:[#allocation25_spill] sm:$0xff] }
 0x2f1   :  { %2297 = vst.msk [vmem:[%s5378_s7 + $0xf0] sm:$0xff] %vm1597_vm2, %v2233_v41  ;;  %2298 = vst.msk [vmem:[%s5378_s7 + $0xf8] sm:$0xff] %vm1597_vm2, %v2234_v2  ;;  %v2263_v39 = vmax.f32 %v5543_v46, 0.0  ;;  %v2264_v18 = vmax.f32 %v5544_v52, 0.0  ;;  %v5545_v29 = vld [vmem:[#allocation17_spill] sm:$0xff]  ;;  %v2266_v28 = vmax.f32 %v5049_v50, 0.0 }
 0x2f2   :  { %2299 = vst.msk [vmem:[%s5378_s7 + $0x100] sm:$0xff] %vm1597_vm2, %v2235_v3  ;;  %2300 = vst.msk [vmem:[%s5378_s7 + $0x108] sm:$0xff] %vm1597_vm2, %v2236_v43  ;;  %v2265_v22 = vmax.f32 %v5545_v29, 0.0 }
 0x2f3   :  { %2301 = vst.msk [vmem:[%s5378_s7 + $0x110] sm:$0xff] %vm1597_vm2, %v2237_v9  ;;  %2302 = vst.msk [vmem:[%s5378_s7 + $0x118] sm:$0xff] %vm1597_vm2, %v2238_v55 }
 0x2f4   :  { %2303 = vst.msk [vmem:[%s5378_s7 + $0x120] sm:$0xff] %vm1597_vm2, %v2239_v49  ;;  %2304 = vst.msk [vmem:[%s5378_s7 + $0x128] sm:$0xff] %vm1597_vm2, %v2240_v6 }
 0x2f5   :  { %2305 = vst.msk [vmem:[%s5378_s7 + $0x130] sm:$0xff] %vm1597_vm2, %v2241_v13  ;;  %2306 = vst.msk [vmem:[%s5378_s7 + $0x138] sm:$0xff] %vm1597_vm2, %v2242_v27 }
 0x2f6   :  { %2307 = vst.msk [vmem:[%s5378_s7 + $0x140] sm:$0xff] %vm1597_vm2, %v2243_v42  ;;  %2308 = vst.msk [vmem:[%s5378_s7 + $0x148] sm:$0xff] %vm1597_vm2, %v2244_v59 }
 0x2f7   :  { %2309 = vst.msk [vmem:[%s5378_s7 + $0x150] sm:$0xff] %vm1597_vm2, %v2245_v11  ;;  %2310 = vst.msk [vmem:[%s5378_s7 + $0x158] sm:$0xff] %vm1597_vm2, %v2246_v35 }
 0x2f8   :  { %2311 = vst.msk [vmem:[%s5378_s7 + $0x160] sm:$0xff] %vm1597_vm2, %v2247_v44  ;;  %2312 = vst.msk [vmem:[%s5378_s7 + $0x168] sm:$0xff] %vm1597_vm2, %v2248_v23 }
 0x2f9   :  { %2313 = vst.msk [vmem:[%s5378_s7 + $0x170] sm:$0xff] %vm1597_vm2, %v2249_v33  ;;  %2314 = vst.msk [vmem:[%s5378_s7 + $0x178] sm:$0xff] %vm1597_vm2, %v2250_v56 }
 0x2fa   :  { %2315 = vst.msk [vmem:[%s5378_s7 + $0x180] sm:$0xff] %vm1597_vm2, %v2251_v4  ;;  %2316 = vst.msk [vmem:[%s5378_s7 + $0x188] sm:$0xff] %vm1597_vm2, %v2252_v26 }
 0x2fb   :  { %2317 = vst.msk [vmem:[%s5378_s7 + $0x190] sm:$0xff] %vm1597_vm2, %v2253_v21  ;;  %2318 = vst.msk [vmem:[%s5378_s7 + $0x198] sm:$0xff] %vm1597_vm2, %v2254_v30 }
 0x2fc   :  { %2319 = vst.msk [vmem:[%s5378_s7 + $0x1a0] sm:$0xff] %vm1597_vm2, %v2255_v62  ;;  %2320 = vst.msk [vmem:[%s5378_s7 + $0x1a8] sm:$0xff] %vm1597_vm2, %v2256_v34 }
 0x2fd   :  { %2321 = vst.msk [vmem:[%s5378_s7 + $0x1b0] sm:$0xff] %vm1597_vm2, %v2257_v31  ;;  %2322 = vst.msk [vmem:[%s5378_s7 + $0x1b8] sm:$0xff] %vm1597_vm2, %v2258_v45 }
 0x2fe   :  { %2323 = vst.msk [vmem:[%s5378_s7 + $0x1c0] sm:$0xff] %vm1597_vm2, %v2259_v53  ;;  %2324 = vst.msk [vmem:[%s5378_s7 + $0x1c8] sm:$0xff] %vm1597_vm2, %v2260_v60 }
 0x2ff   :  { %2325 = vst.msk [vmem:[%s5378_s7 + $0x1d0] sm:$0xff] %vm1597_vm2, %v2261_v25  ;;  %2326 = vst.msk [vmem:[%s5378_s7 + $0x1d8] sm:$0xff] %vm1597_vm2, %v2262_v15 }
 0x300   :  { %2327 = vst.msk [vmem:[%s5378_s7 + $0x1e0] sm:$0xff] %vm1597_vm2, %v2263_v39  ;;  %2328 = vst.msk [vmem:[%s5378_s7 + $0x1e8] sm:$0xff] %vm1597_vm2, %v2264_v18 }
 0x301   :  { %2329 = vst.msk [vmem:[%s5378_s7 + $0x1f0] sm:$0xff] %vm1597_vm2, %v2265_v22  ;;  %2330 = vst.msk [vmem:[%s5378_s7 + $0x1f8] sm:$0xff] %vm1597_vm2, %v2266_v28 }

</bundles_post_ra>
